<compile_context>
chip_gen: v7x
topology: tpu7x:2x2x1
jax: 0.10.0
libtpu: 0.0.40
codegen_flags: <defaults>
</compile_context>

<pallas_src>
import functools

import jax
import jax.numpy as jnp
import numpy as np
from jax.experimental import pallas as pl
from jax.experimental.pallas import tpu as pltpu


BLOCK_DEPTH = 7
MID_DEPTH = 4
IN_CH = 2 * MID_DEPTH                       # 8
CAT_CH = 2 * MID_DEPTH * BLOCK_DEPTH        # 56


# ----------------------------------------------------------------------------
# The fused kernel (P images packed along lanes per grid step)
# ----------------------------------------------------------------------------
def _cnn_fused_kernel(H, W, s, P,
                      x_ref, w0_ref, b0_ref, wb_ref, bb_ref, wu_ref, bu_ref,
                      m_ref, mu_ref, rep_ref, bil_ref,
                      o_ref):
    HW = H * W
    HWs = HW * s * s
    PHW = P * HW
    PHWs = P * HWs
    Ws = W * s

    def tap_rows(a, row_w, mref):
        """9 shifted+masked copies of `a` (C, L); tap order (kh, kw) row-major.

        Circular lane rotation (pltpu.roll -> XLU) + precomputed border masks
        replace zero-padding; wrapped / cross-image lanes are exactly the
        lanes the masks zero.
        """
        n = a.shape[-1]
        rows = []
        for kh in range(3):
            for kw in range(3):
                t = kh * 3 + kw
                off = (kh - 1) * row_w + (kw - 1)
                if off == 0:                       # centre tap: mask is all-ones
                    rows.append(a)
                    continue
                # want out[j] = a[j + off]; roll matches np.roll semantics.
                shifted = pltpu.roll(a, (-off) % n, 1)
                rows.append(shifted * mref[t:t + 1, :])
        return rows

    x = x_ref[0]                                                    # (1, PHW) f32

    # ---- conv_layer 1 -> 8: im2col rows built in registers ------------------
    p0 = jnp.concatenate(tap_rows(x, W, m_ref), axis=0).astype(jnp.bfloat16)
    h = jnp.dot(w0_ref[...], p0,
                preferred_element_type=jnp.float32) + b0_ref[...]   # (8, PHW)

    # ---- 7 x [Conv2d(8 -> 4) + CReLU], CReLU folded into the weights --------
    feats = []
    for i in range(BLOCK_DEPTH):
        patch = jnp.concatenate(tap_rows(h, W, m_ref),
                                axis=0).astype(jnp.bfloat16)        # (72, PHW)
        acc = jnp.dot(wb_ref[i], patch,
                      preferred_element_type=jnp.float32) + bb_ref[i]
        h = jnp.maximum(acc, 0.0)                                   # (8, PHW)
        feats.append(h.astype(jnp.bfloat16))
    cat = jnp.concatenate(feats, axis=0)                            # (56, PHW) bf16

    # ---- upscaler: reduce channels BEFORE upsampling -------------------------
    # V[t] = wu[t](56) . cat   -> one (9,56)x(56,PHW) matmul
    V = jnp.dot(wu_ref[...], cat, preferred_element_type=jnp.float32)   # (9, PHW)

    # nearest upsample + bilinear residual per packed image; rep/bil are
    # per-image (HW, HWs) so constants/FLOPs stay linear in P.
    u_parts, r_parts = [], []
    for p in range(P):
        sl = slice(p * HW, (p + 1) * HW)
        u_parts.append(jnp.dot(V[:, sl].astype(jnp.bfloat16), rep_ref[...],
                               preferred_element_type=jnp.float32))     # (9, HWs)
        r_parts.append(jnp.dot(x[:, sl].astype(jnp.bfloat16), bil_ref[...],
                               preferred_element_type=jnp.float32))     # (1, HWs)
    U = u_parts[0] if P == 1 else jnp.concatenate(u_parts, axis=-1)     # (9, PHWs)
    res = r_parts[0] if P == 1 else jnp.concatenate(r_parts, axis=-1)   # (1, PHWs)

    # apply the 9 upscaled-resolution taps to the channel-reduced U (VPU adds,
    # XLU rolls -- no (56, HWs) temporaries anymore).
    out = res + bu_ref[...]
    for kh in range(3):
        for kw in range(3):
            t = kh * 3 + kw
            off = (kh - 1) * Ws + (kw - 1)
            row = U[t:t + 1, :]
            if off != 0:
                row = pltpu.roll(row, (-off) % PHWs, 1) * mu_ref[t:t + 1, :]
            out = out + row

    o_ref[0] = out.astype(o_ref.dtype)


# ----------------------------------------------------------------------------
# Constant matrices (trace-time numpy -> baked as jit constants)
# ----------------------------------------------------------------------------
def _tap_masks(H, W):
    """(9, H*W) validity masks for the 9 taps of a 3x3 / pad-1 conv."""
    hh, ww = np.meshgrid(np.arange(H), np.arange(W), indexing="ij")
    rows = []
    for kh in range(3):
        for kw in range(3):
            dy, dx = kh - 1, kw - 1
            ok = (hh + dy >= 0) & (hh + dy < H) & (ww + dx >= 0) & (ww + dx < W)
            rows.append(ok.reshape(-1))
    return np.stack(rows).astype(np.float32)


def _nearest_matrix(H, W, s):
    """(H*W, Hs*Ws) 0/1 matrix: flat_x @ R == nearest-upsampled flat_x."""
    Hs, Ws = H * s, W * s
    src = (np.arange(Hs)[:, None] // s) * W + (np.arange(Ws)[None, :] // s)
    R = np.zeros((H * W, Hs * Ws), np.float32)
    R[src.reshape(-1), np.arange(Hs * Ws)] = 1.0
    return R


def _bilinear_matrix(in_size, scale):
    """PyTorch-compatible 1-D bilinear weights, align_corners=False. (out, in)."""
    out_size = in_size * scale
    src = (np.arange(out_size, dtype=np.float64) + 0.5) / float(scale) - 0.5
    src = np.maximum(src, 0.0)
    i0 = np.minimum(np.floor(src).astype(np.int64), in_size - 1)
    i1 = np.minimum(i0 + 1, in_size - 1)
    lam = src - i0
    A = np.zeros((out_size, in_size), np.float64)
    A[np.arange(out_size), i0] += 1.0 - lam
    A[np.arange(out_size), i1] += lam
    return A


def _bilinear_flat_matrix(H, W, s):
    """(H*W, Hs*Ws) so that flat_x @ B == flat(bilinear_upsample(x))."""
    return np.kron(_bilinear_matrix(H, s).T,
                   _bilinear_matrix(W, s).T).astype(np.float32)


def _flatten_conv_w(w):
    """(3, 3, Cin, Cout) -> (Cout, 9*Cin); taps row-major, channel fastest."""
    cout = w.shape[3]
    return jnp.transpose(w, (3, 0, 1, 2)).reshape(cout, 9 * w.shape[2])


# ----------------------------------------------------------------------------
# Parameters (deterministic synthetic init; shapes match the PyTorch module)
# ----------------------------------------------------------------------------
def init_params(key):
    params = {}
    k = key

    def nrm(k, shape, scale):
        return scale * jax.random.normal(k, shape, dtype=jnp.float32)

    k, sub = jax.random.split(k)
    params["conv_layer_w"] = nrm(sub, (3, 3, 1, IN_CH), 0.3)        # 1 -> 8
    k, sub = jax.random.split(k)
    params["conv_layer_b"] = nrm(sub, (IN_CH,), 0.1)

    params["block_w"], params["block_b"] = [], []
    for _ in range(BLOCK_DEPTH):
        k, sub = jax.random.split(k)
        params["block_w"].append(nrm(sub, (3, 3, IN_CH, MID_DEPTH), 0.1))  # 8 -> 4
        k, sub = jax.random.split(k)
        params["block_b"].append(nrm(sub, (MID_DEPTH,), 0.05))

    k, sub = jax.random.split(k)
    params["upscaler_w"] = nrm(sub, (3, 3, CAT_CH, 1), 0.05)        # 56 -> 1
    k, sub = jax.random.split(k)
    params["upscaler_b"] = nrm(sub, (1,), 0.05)
    return params


# ----------------------------------------------------------------------------
# Forward pass (matches CNN.forward) -- one fused pallas_call
# ----------------------------------------------------------------------------
def cnn_forward(x_nchw, params, upscale_factor, *, images_per_step=None):
    N, C, H, W = x_nchw.shape
    assert C == 1
    s = int(upscale_factor)
    HW = H * W
    Hs, Ws = H * s, W * s
    HWs = Hs * Ws

    if images_per_step is None:
        # Keep a 2-way 'parallel' grid (both v7x TensorCores busy) and pack the
        # remaining batch into lanes (amortizes per-step overhead on v5e/v6e).
        images_per_step = N // 2 if (N >= 2 and N % 2 == 0) else 1
    P = int(images_per_step)
    assert N % P == 0, "images_per_step must divide the batch"
    ns = N // P
    PHW, PHWs = P * HW, P * HWs

    # NCHW (C == 1) -> lane-flat (ns, 1, P*HW): pure reshape, no transpose.
    x_flat = x_nchw.reshape(ns, 1, PHW).astype(jnp.float32)

    # Weights in im2col layout (Cout, 9*Cin) cast to bf16; biases stay f32.
    w0 = _flatten_conv_w(params["conv_layer_w"]).astype(jnp.bfloat16)        # (8, 9)
    b0 = params["conv_layer_b"].reshape(IN_CH, 1).astype(jnp.float32)
    wb = jnp.stack([_flatten_conv_w(w) for w in params["block_w"]])          # (7,4,72)
    bb = jnp.stack([b.reshape(MID_DEPTH, 1) for b in params["block_b"]])     # (7,4,1)
    # Fold CReLU into the block weights: CReLU(Wp+b) = relu([W;-W]p + [b;-b])
    wb = jnp.concatenate([wb, -wb], axis=1).astype(jnp.bfloat16)             # (7,8,72)
    bb = jnp.concatenate([bb, -bb], axis=1).astype(jnp.float32)              # (7,8,1)
    wu = _flatten_conv_w(params["upscaler_w"]).reshape(9, CAT_CH)            # (9,56)
    wu = wu.astype(jnp.bfloat16)
    bu = params["upscaler_b"].reshape(1, 1).astype(jnp.float32)

    # Trace-time constants (bf16-exact: 0/1 masks, 0/1 replication, s=2 bilinear):
    m9 = jnp.asarray(np.tile(_tap_masks(H, W), (1, P)), dtype=jnp.bfloat16)    # (9, PHW)
    m9u = jnp.asarray(np.tile(_tap_masks(Hs, Ws), (1, P)), dtype=jnp.bfloat16)  # (9, PHWs)
    rep = jnp.asarray(_nearest_matrix(H, W, s), dtype=jnp.bfloat16)            # (HW, HWs)
    bil = jnp.asarray(_bilinear_flat_matrix(H, W, s), dtype=jnp.bfloat16)      # (HW, HWs)

    kernel = functools.partial(_cnn_fused_kernel, H, W, s, P)
    full = lambda shape: pl.BlockSpec(shape, lambda n, _s=shape: (0,) * len(_s))

    flops_per_image = (2 * HW * (IN_CH * 9
                                 + BLOCK_DEPTH * IN_CH * 9 * IN_CH
                                 + 9 * CAT_CH)
                       + 2 * (9 + 1) * HW * HWs)
    bytes_accessed = int(4 * N * (HW + HWs)
                         + 2 * (rep.size + bil.size + m9.size + m9u.size)
                         + 2 * (w0.size + wb.size + wu.size)
                         + 4 * (b0.size + bb.size + bu.size))

    out_flat = pl.pallas_call(
        kernel,
        out_shape=jax.ShapeDtypeStruct((ns, 1, PHWs), jnp.float32),
        grid=(ns,),
        in_specs=[
            pl.BlockSpec((1, 1, PHW), lambda n: (n, 0, 0)),        # x
            full((IN_CH, 9)),                                      # w0
            full((IN_CH, 1)),                                      # b0
            full((BLOCK_DEPTH, IN_CH, 9 * IN_CH)),                 # wb (+/- folded)
            full((BLOCK_DEPTH, IN_CH, 1)),                         # bb (+/- folded)
            full((9, CAT_CH)),                                     # wu (tap-major)
            full((1, 1)),                                          # bu
            full((9, PHW)),                                        # masks, base res
            full((9, PHWs)),                                       # masks, upscaled
            full((HW, HWs)),                                       # nearest matrix
            full((HW, HWs)),                                       # bilinear matrix
        ],
        out_specs=pl.BlockSpec((1, 1, PHWs), lambda n: (n, 0, 0)),
        compiler_params=pltpu.CompilerParams(
            dimension_semantics=("parallel",),
            vmem_limit_bytes=32 * 1024 * 1024),
        cost_estimate=pl.CostEstimate(
            flops=N * flops_per_image,
            transcendentals=0,
            bytes_accessed=bytes_accessed),
    )(x_flat, w0, b0, wb, bb, wu, bu, m9, m9u, rep, bil)

    # (ns, 1, P*HWs) -> NCHW (C == 1): pure reshape (images are step-major).
    return out_flat.reshape(N, 1, Hs, Ws)


# ----------------------------------------------------------------------------
# Pure-JAX/XLA reference (matches the PyTorch module) for validation
# ----------------------------------------------------------------------------
def _reference_forward(x_nchw, params, s):
    prec = jax.lax.Precision.HIGHEST

    def conv(x, w, b):
        y = jax.lax.conv_general_dilated(
            x, w, window_strides=(1, 1), padding=((1, 1), (1, 1)),
            dimension_numbers=("NCHW", "HWIO", "NCHW"), precision=prec)
        return y + b.reshape(1, -1, 1, 1)

    old = x_nchw.astype(jnp.float32)
    h = conv(old, params["conv_layer_w"], params["conv_layer_b"])
    feats = []
    for i in range(BLOCK_DEPTH):
        a = conv(h, params["block_w"][i], params["block_b"][i])
        h = jnp.maximum(jnp.concatenate([a, -a], axis=1), 0.0)   # CReLU
        feats.append(h)
    cat = jnp.concatenate(feats, axis=1)
    up = jnp.repeat(jnp.repeat(cat, s, axis=2), s, axis=3)       # nearest
    out = conv(up, params["upscaler_w"], params["upscaler_b"])
    _, _, H, W = x_nchw.shape
    ah = jnp.asarray(_bilinear_matrix(H, s), jnp.float32)
    aw = jnp.asarray(_bilinear_matrix(W, s), jnp.float32)
    bil = jnp.einsum("ph,nchw,qw->ncpq", ah, old, aw, precision=prec)
    return out + bil


if __name__ == "__main__":
    key = jax.random.PRNGKey(0)
    k_x, k_p = jax.random.split(key)

    upscale_factor = 2
    x = jax.random.normal(k_x, (2, 1, 16, 16), dtype=jnp.float32)   # NCHW
    params = init_params(k_p)

    ref = _reference_forward(x, params, upscale_factor)

    # Default config: >=2 'parallel' grid steps so both v7x TensorCores work.
    fwd = jax.jit(functools.partial(cnn_forward, upscale_factor=upscale_factor))
    out = jax.block_until_ready(fwd(x, params))
    assert out.shape == (2, 1, 32, 32), out.shape
    assert out.dtype == jnp.float32
    max_err = float(jnp.max(jnp.abs(out - ref)))
    assert max_err < 5e-2, f"kernel mismatch vs reference (max |err| = {max_err})"

    # Batch-packed config: whole batch in one grid step (lanes = N*H*W) --
    # the preferred layout on single-TensorCore parts (v5e / v6e).
    fwd_packed = jax.jit(functools.partial(
        cnn_forward, upscale_factor=upscale_factor, images_per_step=2))
    out_packed = jax.block_until_ready(fwd_packed(x, params))
    max_err_packed = float(jnp.max(jnp.abs(out_packed - ref)))
    assert max_err_packed < 5e-2, (
        f"packed kernel mismatch vs reference (max |err| = {max_err_packed})")

    print("KERNEL_OK")
</pallas_src>

<mosaic_0001>
module attributes {stable_mosaic.version = 11 : i64} {
  func.func @_cnn_fused_kernel(%arg0: i32, %arg1: memref<1x1x256xf32, #tpu.memory_space<vmem>>, %arg2: memref<8x9xbf16, #tpu.memory_space<vmem>>, %arg3: memref<8x1xf32, #tpu.memory_space<vmem>>, %arg4: memref<7x8x72xbf16, #tpu.memory_space<vmem>>, %arg5: memref<7x8x1xf32, #tpu.memory_space<vmem>>, %arg6: memref<9x56xbf16, #tpu.memory_space<vmem>>, %arg7: memref<1x1xf32, #tpu.memory_space<vmem>>, %arg8: memref<9x256xbf16, #tpu.memory_space<vmem>>, %arg9: memref<9x1024xbf16, #tpu.memory_space<vmem>>, %arg10: memref<256x1024xbf16, #tpu.memory_space<vmem>>, %arg11: memref<256x1024xbf16, #tpu.memory_space<vmem>>, %arg12: memref<1x1x1024xf32, #tpu.memory_space<vmem>>) attributes {dimension_semantics = [#tpu.dimension_semantics<parallel>], iteration_bounds = array<i64: 2>, scalar_prefetch = 0 : i64, scratch_operands = 0 : i64, tpu.core_type = #tpu.core_type<tc>, window_params = [{transform_indices = @transform_0, window_bounds = array<i64: 1, 1, 256>}, {pipeline_mode = #tpu.pipeline_mode<synchronous>, transform_indices = @transform_1, window_bounds = array<i64: 8, 9>}, {pipeline_mode = #tpu.pipeline_mode<synchronous>, transform_indices = @transform_2, window_bounds = array<i64: 8, 1>}, {pipeline_mode = #tpu.pipeline_mode<synchronous>, transform_indices = @transform_3, window_bounds = array<i64: 7, 8, 72>}, {pipeline_mode = #tpu.pipeline_mode<synchronous>, transform_indices = @transform_4, window_bounds = array<i64: 7, 8, 1>}, {pipeline_mode = #tpu.pipeline_mode<synchronous>, transform_indices = @transform_5, window_bounds = array<i64: 9, 56>}, {pipeline_mode = #tpu.pipeline_mode<synchronous>, transform_indices = @transform_6, window_bounds = array<i64: 1, 1>}, {pipeline_mode = #tpu.pipeline_mode<synchronous>, transform_indices = @transform_7, window_bounds = array<i64: 9, 256>}, {pipeline_mode = #tpu.pipeline_mode<synchronous>, transform_indices = @transform_8, window_bounds = array<i64: 9, 1024>}, {pipeline_mode = #tpu.pipeline_mode<synchronous>, transform_indices = @transform_9, window_bounds = array<i64: 256, 1024>}, {pipeline_mode = #tpu.pipeline_mode<synchronous>, transform_indices = @transform_10, window_bounds = array<i64: 256, 1024>}, {transform_indices = @transform_11, window_bounds = array<i64: 1, 1, 1024>}]} {
    %c0 = arith.constant 0 : index
    %c0_0 = arith.constant 0 : index
    %c0_1 = arith.constant 0 : index
    %0 = vector.load %arg1[%c0, %c0_0, %c0_1] : memref<1x1x256xf32, #tpu.memory_space<vmem>>, vector<1x1x256xf32>
    %1 = vector.shape_cast %0 : vector<1x1x256xf32> to vector<1x256xf32>
    %c17_i32 = arith.constant 17 : i32
    %2 = tpu.dynamic_rotate %1 by %c17_i32 dim 1 : vector<1x256xf32>, i32 -> vector<1x256xf32>
    %c0_2 = arith.constant 0 : index
    %c0_3 = arith.constant 0 : index
    %3 = vector.load %arg8[%c0_2, %c0_3] : memref<9x256xbf16, #tpu.memory_space<vmem>>, vector<1x256xbf16>
    %4 = arith.extf %3 : vector<1x256xbf16> to vector<1x256xf32>
    %5 = arith.mulf %2, %4 : vector<1x256xf32>
    %c16_i32 = arith.constant 16 : i32
    %6 = tpu.dynamic_rotate %1 by %c16_i32 dim 1 : vector<1x256xf32>, i32 -> vector<1x256xf32>
    %c1 = arith.constant 1 : index
    %c0_4 = arith.constant 0 : index
    %7 = vector.load %arg8[%c1, %c0_4] : memref<9x256xbf16, #tpu.memory_space<vmem>>, vector<1x256xbf16>
    %8 = arith.extf %7 : vector<1x256xbf16> to vector<1x256xf32>
    %9 = arith.mulf %6, %8 : vector<1x256xf32>
    %c15_i32 = arith.constant 15 : i32
    %10 = tpu.dynamic_rotate %1 by %c15_i32 dim 1 : vector<1x256xf32>, i32 -> vector<1x256xf32>
    %c2 = arith.constant 2 : index
    %c0_5 = arith.constant 0 : index
    %11 = vector.load %arg8[%c2, %c0_5] : memref<9x256xbf16, #tpu.memory_space<vmem>>, vector<1x256xbf16>
    %12 = arith.extf %11 : vector<1x256xbf16> to vector<1x256xf32>
    %13 = arith.mulf %10, %12 : vector<1x256xf32>
    %c1_i32 = arith.constant 1 : i32
    %14 = tpu.dynamic_rotate %1 by %c1_i32 dim 1 : vector<1x256xf32>, i32 -> vector<1x256xf32>
    %c3 = arith.constant 3 : index
    %c0_6 = arith.constant 0 : index
    %15 = vector.load %arg8[%c3, %c0_6] : memref<9x256xbf16, #tpu.memory_space<vmem>>, vector<1x256xbf16>
    %16 = arith.extf %15 : vector<1x256xbf16> to vector<1x256xf32>
    %17 = arith.mulf %14, %16 : vector<1x256xf32>
    %c255_i32 = arith.constant 255 : i32
    %18 = tpu.dynamic_rotate %1 by %c255_i32 dim 1 : vector<1x256xf32>, i32 -> vector<1x256xf32>
    %c5 = arith.constant 5 : index
    %c0_7 = arith.constant 0 : index
    %19 = vector.load %arg8[%c5, %c0_7] : memref<9x256xbf16, #tpu.memory_space<vmem>>, vector<1x256xbf16>
    %20 = arith.extf %19 : vector<1x256xbf16> to vector<1x256xf32>
    %21 = arith.mulf %18, %20 : vector<1x256xf32>
    %c241_i32 = arith.constant 241 : i32
    %22 = tpu.dynamic_rotate %1 by %c241_i32 dim 1 : vector<1x256xf32>, i32 -> vector<1x256xf32>
    %c6 = arith.constant 6 : index
    %c0_8 = arith.constant 0 : index
    %23 = vector.load %arg8[%c6, %c0_8] : memref<9x256xbf16, #tpu.memory_space<vmem>>, vector<1x256xbf16>
    %24 = arith.extf %23 : vector<1x256xbf16> to vector<1x256xf32>
    %25 = arith.mulf %22, %24 : vector<1x256xf32>
    %c240_i32 = arith.constant 240 : i32
    %26 = tpu.dynamic_rotate %1 by %c240_i32 dim 1 : vector<1x256xf32>, i32 -> vector<1x256xf32>
    %c7 = arith.constant 7 : index
    %c0_9 = arith.constant 0 : index
    %27 = vector.load %arg8[%c7, %c0_9] : memref<9x256xbf16, #tpu.memory_space<vmem>>, vector<1x256xbf16>
    %28 = arith.extf %27 : vector<1x256xbf16> to vector<1x256xf32>
    %29 = arith.mulf %26, %28 : vector<1x256xf32>
    %c239_i32 = arith.constant 239 : i32
    %30 = tpu.dynamic_rotate %1 by %c239_i32 dim 1 : vector<1x256xf32>, i32 -> vector<1x256xf32>
    %c8 = arith.constant 8 : index
    %c0_10 = arith.constant 0 : index
    %31 = vector.load %arg8[%c8, %c0_10] : memref<9x256xbf16, #tpu.memory_space<vmem>>, vector<1x256xbf16>
    %32 = arith.extf %31 : vector<1x256xbf16> to vector<1x256xf32>
    %33 = arith.mulf %30, %32 : vector<1x256xf32>
    %34 = tpu.concatenate %5, %9, %13, %17, %1, %21, %25, %29, %33 in 0 : vector<1x256xf32>, vector<1x256xf32>, vector<1x256xf32>, vector<1x256xf32>, vector<1x256xf32>, vector<1x256xf32>, vector<1x256xf32>, vector<1x256xf32>, vector<1x256xf32> -> vector<9x256xf32>
    %35 = arith.truncf %34 : vector<9x256xf32> to vector<9x256xbf16>
    %c0_11 = arith.constant 0 : index
    %c0_12 = arith.constant 0 : index
    %36 = vector.load %arg2[%c0_11, %c0_12] : memref<8x9xbf16, #tpu.memory_space<vmem>>, vector<8x9xbf16>
    %cst = arith.constant dense<0.000000e+00> : vector<8x256xf32>
    %37 = tpu.matmul %36, %35, %cst {dimension_numbers = #tpu.dot_dimension_numbers<[1], [0], [0], [1], [0, 0, 1, 1], [], []>} : vector<8x9xbf16>, vector<9x256xbf16>, vector<8x256xf32> -> vector<8x256xf32>
    %c0_13 = arith.constant 0 : index
    %c0_14 = arith.constant 0 : index
    %38 = vector.load %arg3[%c0_13, %c0_14] : memref<8x1xf32, #tpu.memory_space<vmem>>, vector<8x1xf32>
    %39 = vector.broadcast %38 : vector<8x1xf32> to vector<8x256xf32>
    %40 = arith.addf %37, %39 : vector<8x256xf32>
    %c17_i32_15 = arith.constant 17 : i32
    %41 = tpu.dynamic_rotate %40 by %c17_i32_15 dim 1 : vector<8x256xf32>, i32 -> vector<8x256xf32>
    %c0_16 = arith.constant 0 : index
    %c0_17 = arith.constant 0 : index
    %42 = vector.load %arg8[%c0_16, %c0_17] : memref<9x256xbf16, #tpu.memory_space<vmem>>, vector<1x256xbf16>
    %43 = arith.extf %42 : vector<1x256xbf16> to vector<1x256xf32>
    %44 = vector.broadcast %43 : vector<1x256xf32> to vector<8x256xf32>
    %45 = arith.mulf %41, %44 : vector<8x256xf32>
    %c16_i32_18 = arith.constant 16 : i32
    %46 = tpu.dynamic_rotate %40 by %c16_i32_18 dim 1 : vector<8x256xf32>, i32 -> vector<8x256xf32>
    %c1_19 = arith.constant 1 : index
    %c0_20 = arith.constant 0 : index
    %47 = vector.load %arg8[%c1_19, %c0_20] : memref<9x256xbf16, #tpu.memory_space<vmem>>, vector<1x256xbf16>
    %48 = arith.extf %47 : vector<1x256xbf16> to vector<1x256xf32>
    %49 = vector.broadcast %48 : vector<1x256xf32> to vector<8x256xf32>
    %50 = arith.mulf %46, %49 : vector<8x256xf32>
    %c15_i32_21 = arith.constant 15 : i32
    %51 = tpu.dynamic_rotate %40 by %c15_i32_21 dim 1 : vector<8x256xf32>, i32 -> vector<8x256xf32>
    %c2_22 = arith.constant 2 : index
    %c0_23 = arith.constant 0 : index
    %52 = vector.load %arg8[%c2_22, %c0_23] : memref<9x256xbf16, #tpu.memory_space<vmem>>, vector<1x256xbf16>
    %53 = arith.extf %52 : vector<1x256xbf16> to vector<1x256xf32>
    %54 = vector.broadcast %53 : vector<1x256xf32> to vector<8x256xf32>
    %55 = arith.mulf %51, %54 : vector<8x256xf32>
    %c1_i32_24 = arith.constant 1 : i32
    %56 = tpu.dynamic_rotate %40 by %c1_i32_24 dim 1 : vector<8x256xf32>, i32 -> vector<8x256xf32>
    %c3_25 = arith.constant 3 : index
    %c0_26 = arith.constant 0 : index
    %57 = vector.load %arg8[%c3_25, %c0_26] : memref<9x256xbf16, #tpu.memory_space<vmem>>, vector<1x256xbf16>
    %58 = arith.extf %57 : vector<1x256xbf16> to vector<1x256xf32>
    %59 = vector.broadcast %58 : vector<1x256xf32> to vector<8x256xf32>
    %60 = arith.mulf %56, %59 : vector<8x256xf32>
    %c255_i32_27 = arith.constant 255 : i32
    %61 = tpu.dynamic_rotate %40 by %c255_i32_27 dim 1 : vector<8x256xf32>, i32 -> vector<8x256xf32>
    %c5_28 = arith.constant 5 : index
    %c0_29 = arith.constant 0 : index
    %62 = vector.load %arg8[%c5_28, %c0_29] : memref<9x256xbf16, #tpu.memory_space<vmem>>, vector<1x256xbf16>
    %63 = arith.extf %62 : vector<1x256xbf16> to vector<1x256xf32>
    %64 = vector.broadcast %63 : vector<1x256xf32> to vector<8x256xf32>
    %65 = arith.mulf %61, %64 : vector<8x256xf32>
    %c241_i32_30 = arith.constant 241 : i32
    %66 = tpu.dynamic_rotate %40 by %c241_i32_30 dim 1 : vector<8x256xf32>, i32 -> vector<8x256xf32>
    %c6_31 = arith.constant 6 : index
    %c0_32 = arith.constant 0 : index
    %67 = vector.load %arg8[%c6_31, %c0_32] : memref<9x256xbf16, #tpu.memory_space<vmem>>, vector<1x256xbf16>
    %68 = arith.extf %67 : vector<1x256xbf16> to vector<1x256xf32>
    %69 = vector.broadcast %68 : vector<1x256xf32> to vector<8x256xf32>
    %70 = arith.mulf %66, %69 : vector<8x256xf32>
    %c240_i32_33 = arith.constant 240 : i32
    %71 = tpu.dynamic_rotate %40 by %c240_i32_33 dim 1 : vector<8x256xf32>, i32 -> vector<8x256xf32>
    %c7_34 = arith.constant 7 : index
    %c0_35 = arith.constant 0 : index
    %72 = vector.load %arg8[%c7_34, %c0_35] : memref<9x256xbf16, #tpu.memory_space<vmem>>, vector<1x256xbf16>
    %73 = arith.extf %72 : vector<1x256xbf16> to vector<1x256xf32>
    %74 = vector.broadcast %73 : vector<1x256xf32> to vector<8x256xf32>
    %75 = arith.mulf %71, %74 : vector<8x256xf32>
    %c239_i32_36 = arith.constant 239 : i32
    %76 = tpu.dynamic_rotate %40 by %c239_i32_36 dim 1 : vector<8x256xf32>, i32 -> vector<8x256xf32>
    %c8_37 = arith.constant 8 : index
    %c0_38 = arith.constant 0 : index
    %77 = vector.load %arg8[%c8_37, %c0_38] : memref<9x256xbf16, #tpu.memory_space<vmem>>, vector<1x256xbf16>
    %78 = arith.extf %77 : vector<1x256xbf16> to vector<1x256xf32>
    %79 = vector.broadcast %78 : vector<1x256xf32> to vector<8x256xf32>
    %80 = arith.mulf %76, %79 : vector<8x256xf32>
    %81 = tpu.concatenate %45, %50, %55, %60, %40, %65, %70, %75, %80 in 0 : vector<8x256xf32>, vector<8x256xf32>, vector<8x256xf32>, vector<8x256xf32>, vector<8x256xf32>, vector<8x256xf32>, vector<8x256xf32>, vector<8x256xf32>, vector<8x256xf32> -> vector<72x256xf32>
    %82 = arith.truncf %81 : vector<72x256xf32> to vector<72x256xbf16>
    %c0_39 = arith.constant 0 : index
    %c0_40 = arith.constant 0 : index
    %c0_41 = arith.constant 0 : index
    %83 = vector.load %arg4[%c0_39, %c0_40, %c0_41] : memref<7x8x72xbf16, #tpu.memory_space<vmem>>, vector<1x8x72xbf16>
    %84 = vector.shape_cast %83 : vector<1x8x72xbf16> to vector<8x72xbf16>
    %cst_42 = arith.constant dense<0.000000e+00> : vector<8x256xf32>
    %85 = tpu.matmul %84, %82, %cst_42 {dimension_numbers = #tpu.dot_dimension_numbers<[1], [0], [0], [1], [0, 0, 1, 1], [], []>} : vector<8x72xbf16>, vector<72x256xbf16>, vector<8x256xf32> -> vector<8x256xf32>
    %c0_43 = arith.constant 0 : index
    %c0_44 = arith.constant 0 : index
    %c0_45 = arith.constant 0 : index
    %86 = vector.load %arg5[%c0_43, %c0_44, %c0_45] : memref<7x8x1xf32, #tpu.memory_space<vmem>>, vector<1x8x1xf32>
    %87 = vector.shape_cast %86 : vector<1x8x1xf32> to vector<8x1xf32>
    %88 = vector.broadcast %87 : vector<8x1xf32> to vector<8x256xf32>
    %89 = arith.addf %85, %88 : vector<8x256xf32>
    %cst_46 = arith.constant 0.000000e+00 : f32
    %90 = vector.broadcast %cst_46 : f32 to vector<8x256xf32>
    %91 = arith.maximumf %89, %90 : vector<8x256xf32>
    %92 = arith.truncf %91 : vector<8x256xf32> to vector<8x256xbf16>
    %c17_i32_47 = arith.constant 17 : i32
    %93 = tpu.dynamic_rotate %91 by %c17_i32_47 dim 1 : vector<8x256xf32>, i32 -> vector<8x256xf32>
    %c0_48 = arith.constant 0 : index
    %c0_49 = arith.constant 0 : index
    %94 = vector.load %arg8[%c0_48, %c0_49] : memref<9x256xbf16, #tpu.memory_space<vmem>>, vector<1x256xbf16>
    %95 = arith.extf %94 : vector<1x256xbf16> to vector<1x256xf32>
    %96 = vector.broadcast %95 : vector<1x256xf32> to vector<8x256xf32>
    %97 = arith.mulf %93, %96 : vector<8x256xf32>
    %c16_i32_50 = arith.constant 16 : i32
    %98 = tpu.dynamic_rotate %91 by %c16_i32_50 dim 1 : vector<8x256xf32>, i32 -> vector<8x256xf32>
    %c1_51 = arith.constant 1 : index
    %c0_52 = arith.constant 0 : index
    %99 = vector.load %arg8[%c1_51, %c0_52] : memref<9x256xbf16, #tpu.memory_space<vmem>>, vector<1x256xbf16>
    %100 = arith.extf %99 : vector<1x256xbf16> to vector<1x256xf32>
    %101 = vector.broadcast %100 : vector<1x256xf32> to vector<8x256xf32>
    %102 = arith.mulf %98, %101 : vector<8x256xf32>
    %c15_i32_53 = arith.constant 15 : i32
    %103 = tpu.dynamic_rotate %91 by %c15_i32_53 dim 1 : vector<8x256xf32>, i32 -> vector<8x256xf32>
    %c2_54 = arith.constant 2 : index
    %c0_55 = arith.constant 0 : index
    %104 = vector.load %arg8[%c2_54, %c0_55] : memref<9x256xbf16, #tpu.memory_space<vmem>>, vector<1x256xbf16>
    %105 = arith.extf %104 : vector<1x256xbf16> to vector<1x256xf32>
    %106 = vector.broadcast %105 : vector<1x256xf32> to vector<8x256xf32>
    %107 = arith.mulf %103, %106 : vector<8x256xf32>
    %c1_i32_56 = arith.constant 1 : i32
    %108 = tpu.dynamic_rotate %91 by %c1_i32_56 dim 1 : vector<8x256xf32>, i32 -> vector<8x256xf32>
    %c3_57 = arith.constant 3 : index
    %c0_58 = arith.constant 0 : index
    %109 = vector.load %arg8[%c3_57, %c0_58] : memref<9x256xbf16, #tpu.memory_space<vmem>>, vector<1x256xbf16>
    %110 = arith.extf %109 : vector<1x256xbf16> to vector<1x256xf32>
    %111 = vector.broadcast %110 : vector<1x256xf32> to vector<8x256xf32>
    %112 = arith.mulf %108, %111 : vector<8x256xf32>
    %c255_i32_59 = arith.constant 255 : i32
    %113 = tpu.dynamic_rotate %91 by %c255_i32_59 dim 1 : vector<8x256xf32>, i32 -> vector<8x256xf32>
    %c5_60 = arith.constant 5 : index
    %c0_61 = arith.constant 0 : index
    %114 = vector.load %arg8[%c5_60, %c0_61] : memref<9x256xbf16, #tpu.memory_space<vmem>>, vector<1x256xbf16>
    %115 = arith.extf %114 : vector<1x256xbf16> to vector<1x256xf32>
    %116 = vector.broadcast %115 : vector<1x256xf32> to vector<8x256xf32>
    %117 = arith.mulf %113, %116 : vector<8x256xf32>
    %c241_i32_62 = arith.constant 241 : i32
    %118 = tpu.dynamic_rotate %91 by %c241_i32_62 dim 1 : vector<8x256xf32>, i32 -> vector<8x256xf32>
    %c6_63 = arith.constant 6 : index
    %c0_64 = arith.constant 0 : index
    %119 = vector.load %arg8[%c6_63, %c0_64] : memref<9x256xbf16, #tpu.memory_space<vmem>>, vector<1x256xbf16>
    %120 = arith.extf %119 : vector<1x256xbf16> to vector<1x256xf32>
    %121 = vector.broadcast %120 : vector<1x256xf32> to vector<8x256xf32>
    %122 = arith.mulf %118, %121 : vector<8x256xf32>
    %c240_i32_65 = arith.constant 240 : i32
    %123 = tpu.dynamic_rotate %91 by %c240_i32_65 dim 1 : vector<8x256xf32>, i32 -> vector<8x256xf32>
    %c7_66 = arith.constant 7 : index
    %c0_67 = arith.constant 0 : index
    %124 = vector.load %arg8[%c7_66, %c0_67] : memref<9x256xbf16, #tpu.memory_space<vmem>>, vector<1x256xbf16>
    %125 = arith.extf %124 : vector<1x256xbf16> to vector<1x256xf32>
    %126 = vector.broadcast %125 : vector<1x256xf32> to vector<8x256xf32>
    %127 = arith.mulf %123, %126 : vector<8x256xf32>
    %c239_i32_68 = arith.constant 239 : i32
    %128 = tpu.dynamic_rotate %91 by %c239_i32_68 dim 1 : vector<8x256xf32>, i32 -> vector<8x256xf32>
    %c8_69 = arith.constant 8 : index
    %c0_70 = arith.constant 0 : index
    %129 = vector.load %arg8[%c8_69, %c0_70] : memref<9x256xbf16, #tpu.memory_space<vmem>>, vector<1x256xbf16>
    %130 = arith.extf %129 : vector<1x256xbf16> to vector<1x256xf32>
    %131 = vector.broadcast %130 : vector<1x256xf32> to vector<8x256xf32>
    %132 = arith.mulf %128, %131 : vector<8x256xf32>
    %133 = tpu.concatenate %97, %102, %107, %112, %91, %117, %122, %127, %132 in 0 : vector<8x256xf32>, vector<8x256xf32>, vector<8x256xf32>, vector<8x256xf32>, vector<8x256xf32>, vector<8x256xf32>, vector<8x256xf32>, vector<8x256xf32>, vector<8x256xf32> -> vector<72x256xf32>
    %134 = arith.truncf %133 : vector<72x256xf32> to vector<72x256xbf16>
    %c1_71 = arith.constant 1 : index
    %c0_72 = arith.constant 0 : index
    %c0_73 = arith.constant 0 : index
    %135 = vector.load %arg4[%c1_71, %c0_72, %c0_73] : memref<7x8x72xbf16, #tpu.memory_space<vmem>>, vector<1x8x72xbf16>
    %136 = vector.shape_cast %135 : vector<1x8x72xbf16> to vector<8x72xbf16>
    %cst_74 = arith.constant dense<0.000000e+00> : vector<8x256xf32>
    %137 = tpu.matmul %136, %134, %cst_74 {dimension_numbers = #tpu.dot_dimension_numbers<[1], [0], [0], [1], [0, 0, 1, 1], [], []>} : vector<8x72xbf16>, vector<72x256xbf16>, vector<8x256xf32> -> vector<8x256xf32>
    %c1_75 = arith.constant 1 : index
    %c0_76 = arith.constant 0 : index
    %c0_77 = arith.constant 0 : index
    %138 = vector.load %arg5[%c1_75, %c0_76, %c0_77] : memref<7x8x1xf32, #tpu.memory_space<vmem>>, vector<1x8x1xf32>
    %139 = vector.shape_cast %138 : vector<1x8x1xf32> to vector<8x1xf32>
    %140 = vector.broadcast %139 : vector<8x1xf32> to vector<8x256xf32>
    %141 = arith.addf %137, %140 : vector<8x256xf32>
    %cst_78 = arith.constant 0.000000e+00 : f32
    %142 = vector.broadcast %cst_78 : f32 to vector<8x256xf32>
    %143 = arith.maximumf %141, %142 : vector<8x256xf32>
    %144 = arith.truncf %143 : vector<8x256xf32> to vector<8x256xbf16>
    %c17_i32_79 = arith.constant 17 : i32
    %145 = tpu.dynamic_rotate %143 by %c17_i32_79 dim 1 : vector<8x256xf32>, i32 -> vector<8x256xf32>
    %c0_80 = arith.constant 0 : index
    %c0_81 = arith.constant 0 : index
    %146 = vector.load %arg8[%c0_80, %c0_81] : memref<9x256xbf16, #tpu.memory_space<vmem>>, vector<1x256xbf16>
    %147 = arith.extf %146 : vector<1x256xbf16> to vector<1x256xf32>
    %148 = vector.broadcast %147 : vector<1x256xf32> to vector<8x256xf32>
    %149 = arith.mulf %145, %148 : vector<8x256xf32>
    %c16_i32_82 = arith.constant 16 : i32
    %150 = tpu.dynamic_rotate %143 by %c16_i32_82 dim 1 : vector<8x256xf32>, i32 -> vector<8x256xf32>
    %c1_83 = arith.constant 1 : index
    %c0_84 = arith.constant 0 : index
    %151 = vector.load %arg8[%c1_83, %c0_84] : memref<9x256xbf16, #tpu.memory_space<vmem>>, vector<1x256xbf16>
    %152 = arith.extf %151 : vector<1x256xbf16> to vector<1x256xf32>
    %153 = vector.broadcast %152 : vector<1x256xf32> to vector<8x256xf32>
    %154 = arith.mulf %150, %153 : vector<8x256xf32>
    %c15_i32_85 = arith.constant 15 : i32
    %155 = tpu.dynamic_rotate %143 by %c15_i32_85 dim 1 : vector<8x256xf32>, i32 -> vector<8x256xf32>
    %c2_86 = arith.constant 2 : index
    %c0_87 = arith.constant 0 : index
    %156 = vector.load %arg8[%c2_86, %c0_87] : memref<9x256xbf16, #tpu.memory_space<vmem>>, vector<1x256xbf16>
    %157 = arith.extf %156 : vector<1x256xbf16> to vector<1x256xf32>
    %158 = vector.broadcast %157 : vector<1x256xf32> to vector<8x256xf32>
    %159 = arith.mulf %155, %158 : vector<8x256xf32>
    %c1_i32_88 = arith.constant 1 : i32
    %160 = tpu.dynamic_rotate %143 by %c1_i32_88 dim 1 : vector<8x256xf32>, i32 -> vector<8x256xf32>
    %c3_89 = arith.constant 3 : index
    %c0_90 = arith.constant 0 : index
    %161 = vector.load %arg8[%c3_89, %c0_90] : memref<9x256xbf16, #tpu.memory_space<vmem>>, vector<1x256xbf16>
    %162 = arith.extf %161 : vector<1x256xbf16> to vector<1x256xf32>
    %163 = vector.broadcast %162 : vector<1x256xf32> to vector<8x256xf32>
    %164 = arith.mulf %160, %163 : vector<8x256xf32>
    %c255_i32_91 = arith.constant 255 : i32
    %165 = tpu.dynamic_rotate %143 by %c255_i32_91 dim 1 : vector<8x256xf32>, i32 -> vector<8x256xf32>
    %c5_92 = arith.constant 5 : index
    %c0_93 = arith.constant 0 : index
    %166 = vector.load %arg8[%c5_92, %c0_93] : memref<9x256xbf16, #tpu.memory_space<vmem>>, vector<1x256xbf16>
    %167 = arith.extf %166 : vector<1x256xbf16> to vector<1x256xf32>
    %168 = vector.broadcast %167 : vector<1x256xf32> to vector<8x256xf32>
    %169 = arith.mulf %165, %168 : vector<8x256xf32>
    %c241_i32_94 = arith.constant 241 : i32
    %170 = tpu.dynamic_rotate %143 by %c241_i32_94 dim 1 : vector<8x256xf32>, i32 -> vector<8x256xf32>
    %c6_95 = arith.constant 6 : index
    %c0_96 = arith.constant 0 : index
    %171 = vector.load %arg8[%c6_95, %c0_96] : memref<9x256xbf16, #tpu.memory_space<vmem>>, vector<1x256xbf16>
    %172 = arith.extf %171 : vector<1x256xbf16> to vector<1x256xf32>
    %173 = vector.broadcast %172 : vector<1x256xf32> to vector<8x256xf32>
    %174 = arith.mulf %170, %173 : vector<8x256xf32>
    %c240_i32_97 = arith.constant 240 : i32
    %175 = tpu.dynamic_rotate %143 by %c240_i32_97 dim 1 : vector<8x256xf32>, i32 -> vector<8x256xf32>
    %c7_98 = arith.constant 7 : index
    %c0_99 = arith.constant 0 : index
    %176 = vector.load %arg8[%c7_98, %c0_99] : memref<9x256xbf16, #tpu.memory_space<vmem>>, vector<1x256xbf16>
    %177 = arith.extf %176 : vector<1x256xbf16> to vector<1x256xf32>
    %178 = vector.broadcast %177 : vector<1x256xf32> to vector<8x256xf32>
    %179 = arith.mulf %175, %178 : vector<8x256xf32>
    %c239_i32_100 = arith.constant 239 : i32
    %180 = tpu.dynamic_rotate %143 by %c239_i32_100 dim 1 : vector<8x256xf32>, i32 -> vector<8x256xf32>
    %c8_101 = arith.constant 8 : index
    %c0_102 = arith.constant 0 : index
    %181 = vector.load %arg8[%c8_101, %c0_102] : memref<9x256xbf16, #tpu.memory_space<vmem>>, vector<1x256xbf16>
    %182 = arith.extf %181 : vector<1x256xbf16> to vector<1x256xf32>
    %183 = vector.broadcast %182 : vector<1x256xf32> to vector<8x256xf32>
    %184 = arith.mulf %180, %183 : vector<8x256xf32>
    %185 = tpu.concatenate %149, %154, %159, %164, %143, %169, %174, %179, %184 in 0 : vector<8x256xf32>, vector<8x256xf32>, vector<8x256xf32>, vector<8x256xf32>, vector<8x256xf32>, vector<8x256xf32>, vector<8x256xf32>, vector<8x256xf32>, vector<8x256xf32> -> vector<72x256xf32>
    %186 = arith.truncf %185 : vector<72x256xf32> to vector<72x256xbf16>
    %c2_103 = arith.constant 2 : index
    %c0_104 = arith.constant 0 : index
    %c0_105 = arith.constant 0 : index
    %187 = vector.load %arg4[%c2_103, %c0_104, %c0_105] : memref<7x8x72xbf16, #tpu.memory_space<vmem>>, vector<1x8x72xbf16>
    %188 = vector.shape_cast %187 : vector<1x8x72xbf16> to vector<8x72xbf16>
    %cst_106 = arith.constant dense<0.000000e+00> : vector<8x256xf32>
    %189 = tpu.matmul %188, %186, %cst_106 {dimension_numbers = #tpu.dot_dimension_numbers<[1], [0], [0], [1], [0, 0, 1, 1], [], []>} : vector<8x72xbf16>, vector<72x256xbf16>, vector<8x256xf32> -> vector<8x256xf32>
    %c2_107 = arith.constant 2 : index
    %c0_108 = arith.constant 0 : index
    %c0_109 = arith.constant 0 : index
    %190 = vector.load %arg5[%c2_107, %c0_108, %c0_109] : memref<7x8x1xf32, #tpu.memory_space<vmem>>, vector<1x8x1xf32>
    %191 = vector.shape_cast %190 : vector<1x8x1xf32> to vector<8x1xf32>
    %192 = vector.broadcast %191 : vector<8x1xf32> to vector<8x256xf32>
    %193 = arith.addf %189, %192 : vector<8x256xf32>
    %cst_110 = arith.constant 0.000000e+00 : f32
    %194 = vector.broadcast %cst_110 : f32 to vector<8x256xf32>
    %195 = arith.maximumf %193, %194 : vector<8x256xf32>
    %196 = arith.truncf %195 : vector<8x256xf32> to vector<8x256xbf16>
    %c17_i32_111 = arith.constant 17 : i32
    %197 = tpu.dynamic_rotate %195 by %c17_i32_111 dim 1 : vector<8x256xf32>, i32 -> vector<8x256xf32>
    %c0_112 = arith.constant 0 : index
    %c0_113 = arith.constant 0 : index
    %198 = vector.load %arg8[%c0_112, %c0_113] : memref<9x256xbf16, #tpu.memory_space<vmem>>, vector<1x256xbf16>
    %199 = arith.extf %198 : vector<1x256xbf16> to vector<1x256xf32>
    %200 = vector.broadcast %199 : vector<1x256xf32> to vector<8x256xf32>
    %201 = arith.mulf %197, %200 : vector<8x256xf32>
    %c16_i32_114 = arith.constant 16 : i32
    %202 = tpu.dynamic_rotate %195 by %c16_i32_114 dim 1 : vector<8x256xf32>, i32 -> vector<8x256xf32>
    %c1_115 = arith.constant 1 : index
    %c0_116 = arith.constant 0 : index
    %203 = vector.load %arg8[%c1_115, %c0_116] : memref<9x256xbf16, #tpu.memory_space<vmem>>, vector<1x256xbf16>
    %204 = arith.extf %203 : vector<1x256xbf16> to vector<1x256xf32>
    %205 = vector.broadcast %204 : vector<1x256xf32> to vector<8x256xf32>
    %206 = arith.mulf %202, %205 : vector<8x256xf32>
    %c15_i32_117 = arith.constant 15 : i32
    %207 = tpu.dynamic_rotate %195 by %c15_i32_117 dim 1 : vector<8x256xf32>, i32 -> vector<8x256xf32>
    %c2_118 = arith.constant 2 : index
    %c0_119 = arith.constant 0 : index
    %208 = vector.load %arg8[%c2_118, %c0_119] : memref<9x256xbf16, #tpu.memory_space<vmem>>, vector<1x256xbf16>
    %209 = arith.extf %208 : vector<1x256xbf16> to vector<1x256xf32>
    %210 = vector.broadcast %209 : vector<1x256xf32> to vector<8x256xf32>
    %211 = arith.mulf %207, %210 : vector<8x256xf32>
    %c1_i32_120 = arith.constant 1 : i32
    %212 = tpu.dynamic_rotate %195 by %c1_i32_120 dim 1 : vector<8x256xf32>, i32 -> vector<8x256xf32>
    %c3_121 = arith.constant 3 : index
    %c0_122 = arith.constant 0 : index
    %213 = vector.load %arg8[%c3_121, %c0_122] : memref<9x256xbf16, #tpu.memory_space<vmem>>, vector<1x256xbf16>
    %214 = arith.extf %213 : vector<1x256xbf16> to vector<1x256xf32>
    %215 = vector.broadcast %214 : vector<1x256xf32> to vector<8x256xf32>
    %216 = arith.mulf %212, %215 : vector<8x256xf32>
    %c255_i32_123 = arith.constant 255 : i32
    %217 = tpu.dynamic_rotate %195 by %c255_i32_123 dim 1 : vector<8x256xf32>, i32 -> vector<8x256xf32>
    %c5_124 = arith.constant 5 : index
    %c0_125 = arith.constant 0 : index
    %218 = vector.load %arg8[%c5_124, %c0_125] : memref<9x256xbf16, #tpu.memory_space<vmem>>, vector<1x256xbf16>
    %219 = arith.extf %218 : vector<1x256xbf16> to vector<1x256xf32>
    %220 = vector.broadcast %219 : vector<1x256xf32> to vector<8x256xf32>
    %221 = arith.mulf %217, %220 : vector<8x256xf32>
    %c241_i32_126 = arith.constant 241 : i32
    %222 = tpu.dynamic_rotate %195 by %c241_i32_126 dim 1 : vector<8x256xf32>, i32 -> vector<8x256xf32>
    %c6_127 = arith.constant 6 : index
    %c0_128 = arith.constant 0 : index
    %223 = vector.load %arg8[%c6_127, %c0_128] : memref<9x256xbf16, #tpu.memory_space<vmem>>, vector<1x256xbf16>
    %224 = arith.extf %223 : vector<1x256xbf16> to vector<1x256xf32>
    %225 = vector.broadcast %224 : vector<1x256xf32> to vector<8x256xf32>
    %226 = arith.mulf %222, %225 : vector<8x256xf32>
    %c240_i32_129 = arith.constant 240 : i32
    %227 = tpu.dynamic_rotate %195 by %c240_i32_129 dim 1 : vector<8x256xf32>, i32 -> vector<8x256xf32>
    %c7_130 = arith.constant 7 : index
    %c0_131 = arith.constant 0 : index
    %228 = vector.load %arg8[%c7_130, %c0_131] : memref<9x256xbf16, #tpu.memory_space<vmem>>, vector<1x256xbf16>
    %229 = arith.extf %228 : vector<1x256xbf16> to vector<1x256xf32>
    %230 = vector.broadcast %229 : vector<1x256xf32> to vector<8x256xf32>
    %231 = arith.mulf %227, %230 : vector<8x256xf32>
    %c239_i32_132 = arith.constant 239 : i32
    %232 = tpu.dynamic_rotate %195 by %c239_i32_132 dim 1 : vector<8x256xf32>, i32 -> vector<8x256xf32>
    %c8_133 = arith.constant 8 : index
    %c0_134 = arith.constant 0 : index
    %233 = vector.load %arg8[%c8_133, %c0_134] : memref<9x256xbf16, #tpu.memory_space<vmem>>, vector<1x256xbf16>
    %234 = arith.extf %233 : vector<1x256xbf16> to vector<1x256xf32>
    %235 = vector.broadcast %234 : vector<1x256xf32> to vector<8x256xf32>
    %236 = arith.mulf %232, %235 : vector<8x256xf32>
    %237 = tpu.concatenate %201, %206, %211, %216, %195, %221, %226, %231, %236 in 0 : vector<8x256xf32>, vector<8x256xf32>, vector<8x256xf32>, vector<8x256xf32>, vector<8x256xf32>, vector<8x256xf32>, vector<8x256xf32>, vector<8x256xf32>, vector<8x256xf32> -> vector<72x256xf32>
    %238 = arith.truncf %237 : vector<72x256xf32> to vector<72x256xbf16>
    %c3_135 = arith.constant 3 : index
    %c0_136 = arith.constant 0 : index
    %c0_137 = arith.constant 0 : index
    %239 = vector.load %arg4[%c3_135, %c0_136, %c0_137] : memref<7x8x72xbf16, #tpu.memory_space<vmem>>, vector<1x8x72xbf16>
    %240 = vector.shape_cast %239 : vector<1x8x72xbf16> to vector<8x72xbf16>
    %cst_138 = arith.constant dense<0.000000e+00> : vector<8x256xf32>
    %241 = tpu.matmul %240, %238, %cst_138 {dimension_numbers = #tpu.dot_dimension_numbers<[1], [0], [0], [1], [0, 0, 1, 1], [], []>} : vector<8x72xbf16>, vector<72x256xbf16>, vector<8x256xf32> -> vector<8x256xf32>
    %c3_139 = arith.constant 3 : index
    %c0_140 = arith.constant 0 : index
    %c0_141 = arith.constant 0 : index
    %242 = vector.load %arg5[%c3_139, %c0_140, %c0_141] : memref<7x8x1xf32, #tpu.memory_space<vmem>>, vector<1x8x1xf32>
    %243 = vector.shape_cast %242 : vector<1x8x1xf32> to vector<8x1xf32>
    %244 = vector.broadcast %243 : vector<8x1xf32> to vector<8x256xf32>
    %245 = arith.addf %241, %244 : vector<8x256xf32>
    %cst_142 = arith.constant 0.000000e+00 : f32
    %246 = vector.broadcast %cst_142 : f32 to vector<8x256xf32>
    %247 = arith.maximumf %245, %246 : vector<8x256xf32>
    %248 = arith.truncf %247 : vector<8x256xf32> to vector<8x256xbf16>
    %c17_i32_143 = arith.constant 17 : i32
    %249 = tpu.dynamic_rotate %247 by %c17_i32_143 dim 1 : vector<8x256xf32>, i32 -> vector<8x256xf32>
    %c0_144 = arith.constant 0 : index
    %c0_145 = arith.constant 0 : index
    %250 = vector.load %arg8[%c0_144, %c0_145] : memref<9x256xbf16, #tpu.memory_space<vmem>>, vector<1x256xbf16>
    %251 = arith.extf %250 : vector<1x256xbf16> to vector<1x256xf32>
    %252 = vector.broadcast %251 : vector<1x256xf32> to vector<8x256xf32>
    %253 = arith.mulf %249, %252 : vector<8x256xf32>
    %c16_i32_146 = arith.constant 16 : i32
    %254 = tpu.dynamic_rotate %247 by %c16_i32_146 dim 1 : vector<8x256xf32>, i32 -> vector<8x256xf32>
    %c1_147 = arith.constant 1 : index
    %c0_148 = arith.constant 0 : index
    %255 = vector.load %arg8[%c1_147, %c0_148] : memref<9x256xbf16, #tpu.memory_space<vmem>>, vector<1x256xbf16>
    %256 = arith.extf %255 : vector<1x256xbf16> to vector<1x256xf32>
    %257 = vector.broadcast %256 : vector<1x256xf32> to vector<8x256xf32>
    %258 = arith.mulf %254, %257 : vector<8x256xf32>
    %c15_i32_149 = arith.constant 15 : i32
    %259 = tpu.dynamic_rotate %247 by %c15_i32_149 dim 1 : vector<8x256xf32>, i32 -> vector<8x256xf32>
    %c2_150 = arith.constant 2 : index
    %c0_151 = arith.constant 0 : index
    %260 = vector.load %arg8[%c2_150, %c0_151] : memref<9x256xbf16, #tpu.memory_space<vmem>>, vector<1x256xbf16>
    %261 = arith.extf %260 : vector<1x256xbf16> to vector<1x256xf32>
    %262 = vector.broadcast %261 : vector<1x256xf32> to vector<8x256xf32>
    %263 = arith.mulf %259, %262 : vector<8x256xf32>
    %c1_i32_152 = arith.constant 1 : i32
    %264 = tpu.dynamic_rotate %247 by %c1_i32_152 dim 1 : vector<8x256xf32>, i32 -> vector<8x256xf32>
    %c3_153 = arith.constant 3 : index
    %c0_154 = arith.constant 0 : index
    %265 = vector.load %arg8[%c3_153, %c0_154] : memref<9x256xbf16, #tpu.memory_space<vmem>>, vector<1x256xbf16>
    %266 = arith.extf %265 : vector<1x256xbf16> to vector<1x256xf32>
    %267 = vector.broadcast %266 : vector<1x256xf32> to vector<8x256xf32>
    %268 = arith.mulf %264, %267 : vector<8x256xf32>
    %c255_i32_155 = arith.constant 255 : i32
    %269 = tpu.dynamic_rotate %247 by %c255_i32_155 dim 1 : vector<8x256xf32>, i32 -> vector<8x256xf32>
    %c5_156 = arith.constant 5 : index
    %c0_157 = arith.constant 0 : index
    %270 = vector.load %arg8[%c5_156, %c0_157] : memref<9x256xbf16, #tpu.memory_space<vmem>>, vector<1x256xbf16>
    %271 = arith.extf %270 : vector<1x256xbf16> to vector<1x256xf32>
    %272 = vector.broadcast %271 : vector<1x256xf32> to vector<8x256xf32>
    %273 = arith.mulf %269, %272 : vector<8x256xf32>
    %c241_i32_158 = arith.constant 241 : i32
    %274 = tpu.dynamic_rotate %247 by %c241_i32_158 dim 1 : vector<8x256xf32>, i32 -> vector<8x256xf32>
    %c6_159 = arith.constant 6 : index
    %c0_160 = arith.constant 0 : index
    %275 = vector.load %arg8[%c6_159, %c0_160] : memref<9x256xbf16, #tpu.memory_space<vmem>>, vector<1x256xbf16>
    %276 = arith.extf %275 : vector<1x256xbf16> to vector<1x256xf32>
    %277 = vector.broadcast %276 : vector<1x256xf32> to vector<8x256xf32>
    %278 = arith.mulf %274, %277 : vector<8x256xf32>
    %c240_i32_161 = arith.constant 240 : i32
    %279 = tpu.dynamic_rotate %247 by %c240_i32_161 dim 1 : vector<8x256xf32>, i32 -> vector<8x256xf32>
    %c7_162 = arith.constant 7 : index
    %c0_163 = arith.constant 0 : index
    %280 = vector.load %arg8[%c7_162, %c0_163] : memref<9x256xbf16, #tpu.memory_space<vmem>>, vector<1x256xbf16>
    %281 = arith.extf %280 : vector<1x256xbf16> to vector<1x256xf32>
    %282 = vector.broadcast %281 : vector<1x256xf32> to vector<8x256xf32>
    %283 = arith.mulf %279, %282 : vector<8x256xf32>
    %c239_i32_164 = arith.constant 239 : i32
    %284 = tpu.dynamic_rotate %247 by %c239_i32_164 dim 1 : vector<8x256xf32>, i32 -> vector<8x256xf32>
    %c8_165 = arith.constant 8 : index
    %c0_166 = arith.constant 0 : index
    %285 = vector.load %arg8[%c8_165, %c0_166] : memref<9x256xbf16, #tpu.memory_space<vmem>>, vector<1x256xbf16>
    %286 = arith.extf %285 : vector<1x256xbf16> to vector<1x256xf32>
    %287 = vector.broadcast %286 : vector<1x256xf32> to vector<8x256xf32>
    %288 = arith.mulf %284, %287 : vector<8x256xf32>
    %289 = tpu.concatenate %253, %258, %263, %268, %247, %273, %278, %283, %288 in 0 : vector<8x256xf32>, vector<8x256xf32>, vector<8x256xf32>, vector<8x256xf32>, vector<8x256xf32>, vector<8x256xf32>, vector<8x256xf32>, vector<8x256xf32>, vector<8x256xf32> -> vector<72x256xf32>
    %290 = arith.truncf %289 : vector<72x256xf32> to vector<72x256xbf16>
    %c4 = arith.constant 4 : index
    %c0_167 = arith.constant 0 : index
    %c0_168 = arith.constant 0 : index
    %291 = vector.load %arg4[%c4, %c0_167, %c0_168] : memref<7x8x72xbf16, #tpu.memory_space<vmem>>, vector<1x8x72xbf16>
    %292 = vector.shape_cast %291 : vector<1x8x72xbf16> to vector<8x72xbf16>
    %cst_169 = arith.constant dense<0.000000e+00> : vector<8x256xf32>
    %293 = tpu.matmul %292, %290, %cst_169 {dimension_numbers = #tpu.dot_dimension_numbers<[1], [0], [0], [1], [0, 0, 1, 1], [], []>} : vector<8x72xbf16>, vector<72x256xbf16>, vector<8x256xf32> -> vector<8x256xf32>
    %c4_170 = arith.constant 4 : index
    %c0_171 = arith.constant 0 : index
    %c0_172 = arith.constant 0 : index
    %294 = vector.load %arg5[%c4_170, %c0_171, %c0_172] : memref<7x8x1xf32, #tpu.memory_space<vmem>>, vector<1x8x1xf32>
    %295 = vector.shape_cast %294 : vector<1x8x1xf32> to vector<8x1xf32>
    %296 = vector.broadcast %295 : vector<8x1xf32> to vector<8x256xf32>
    %297 = arith.addf %293, %296 : vector<8x256xf32>
    %cst_173 = arith.constant 0.000000e+00 : f32
    %298 = vector.broadcast %cst_173 : f32 to vector<8x256xf32>
    %299 = arith.maximumf %297, %298 : vector<8x256xf32>
    %300 = arith.truncf %299 : vector<8x256xf32> to vector<8x256xbf16>
    %c17_i32_174 = arith.constant 17 : i32
    %301 = tpu.dynamic_rotate %299 by %c17_i32_174 dim 1 : vector<8x256xf32>, i32 -> vector<8x256xf32>
    %c0_175 = arith.constant 0 : index
    %c0_176 = arith.constant 0 : index
    %302 = vector.load %arg8[%c0_175, %c0_176] : memref<9x256xbf16, #tpu.memory_space<vmem>>, vector<1x256xbf16>
    %303 = arith.extf %302 : vector<1x256xbf16> to vector<1x256xf32>
    %304 = vector.broadcast %303 : vector<1x256xf32> to vector<8x256xf32>
    %305 = arith.mulf %301, %304 : vector<8x256xf32>
    %c16_i32_177 = arith.constant 16 : i32
    %306 = tpu.dynamic_rotate %299 by %c16_i32_177 dim 1 : vector<8x256xf32>, i32 -> vector<8x256xf32>
    %c1_178 = arith.constant 1 : index
    %c0_179 = arith.constant 0 : index
    %307 = vector.load %arg8[%c1_178, %c0_179] : memref<9x256xbf16, #tpu.memory_space<vmem>>, vector<1x256xbf16>
    %308 = arith.extf %307 : vector<1x256xbf16> to vector<1x256xf32>
    %309 = vector.broadcast %308 : vector<1x256xf32> to vector<8x256xf32>
    %310 = arith.mulf %306, %309 : vector<8x256xf32>
    %c15_i32_180 = arith.constant 15 : i32
    %311 = tpu.dynamic_rotate %299 by %c15_i32_180 dim 1 : vector<8x256xf32>, i32 -> vector<8x256xf32>
    %c2_181 = arith.constant 2 : index
    %c0_182 = arith.constant 0 : index
    %312 = vector.load %arg8[%c2_181, %c0_182] : memref<9x256xbf16, #tpu.memory_space<vmem>>, vector<1x256xbf16>
    %313 = arith.extf %312 : vector<1x256xbf16> to vector<1x256xf32>
    %314 = vector.broadcast %313 : vector<1x256xf32> to vector<8x256xf32>
    %315 = arith.mulf %311, %314 : vector<8x256xf32>
    %c1_i32_183 = arith.constant 1 : i32
    %316 = tpu.dynamic_rotate %299 by %c1_i32_183 dim 1 : vector<8x256xf32>, i32 -> vector<8x256xf32>
    %c3_184 = arith.constant 3 : index
    %c0_185 = arith.constant 0 : index
    %317 = vector.load %arg8[%c3_184, %c0_185] : memref<9x256xbf16, #tpu.memory_space<vmem>>, vector<1x256xbf16>
    %318 = arith.extf %317 : vector<1x256xbf16> to vector<1x256xf32>
    %319 = vector.broadcast %318 : vector<1x256xf32> to vector<8x256xf32>
    %320 = arith.mulf %316, %319 : vector<8x256xf32>
    %c255_i32_186 = arith.constant 255 : i32
    %321 = tpu.dynamic_rotate %299 by %c255_i32_186 dim 1 : vector<8x256xf32>, i32 -> vector<8x256xf32>
    %c5_187 = arith.constant 5 : index
    %c0_188 = arith.constant 0 : index
    %322 = vector.load %arg8[%c5_187, %c0_188] : memref<9x256xbf16, #tpu.memory_space<vmem>>, vector<1x256xbf16>
    %323 = arith.extf %322 : vector<1x256xbf16> to vector<1x256xf32>
    %324 = vector.broadcast %323 : vector<1x256xf32> to vector<8x256xf32>
    %325 = arith.mulf %321, %324 : vector<8x256xf32>
    %c241_i32_189 = arith.constant 241 : i32
    %326 = tpu.dynamic_rotate %299 by %c241_i32_189 dim 1 : vector<8x256xf32>, i32 -> vector<8x256xf32>
    %c6_190 = arith.constant 6 : index
    %c0_191 = arith.constant 0 : index
    %327 = vector.load %arg8[%c6_190, %c0_191] : memref<9x256xbf16, #tpu.memory_space<vmem>>, vector<1x256xbf16>
    %328 = arith.extf %327 : vector<1x256xbf16> to vector<1x256xf32>
    %329 = vector.broadcast %328 : vector<1x256xf32> to vector<8x256xf32>
    %330 = arith.mulf %326, %329 : vector<8x256xf32>
    %c240_i32_192 = arith.constant 240 : i32
    %331 = tpu.dynamic_rotate %299 by %c240_i32_192 dim 1 : vector<8x256xf32>, i32 -> vector<8x256xf32>
    %c7_193 = arith.constant 7 : index
    %c0_194 = arith.constant 0 : index
    %332 = vector.load %arg8[%c7_193, %c0_194] : memref<9x256xbf16, #tpu.memory_space<vmem>>, vector<1x256xbf16>
    %333 = arith.extf %332 : vector<1x256xbf16> to vector<1x256xf32>
    %334 = vector.broadcast %333 : vector<1x256xf32> to vector<8x256xf32>
    %335 = arith.mulf %331, %334 : vector<8x256xf32>
    %c239_i32_195 = arith.constant 239 : i32
    %336 = tpu.dynamic_rotate %299 by %c239_i32_195 dim 1 : vector<8x256xf32>, i32 -> vector<8x256xf32>
    %c8_196 = arith.constant 8 : index
    %c0_197 = arith.constant 0 : index
    %337 = vector.load %arg8[%c8_196, %c0_197] : memref<9x256xbf16, #tpu.memory_space<vmem>>, vector<1x256xbf16>
    %338 = arith.extf %337 : vector<1x256xbf16> to vector<1x256xf32>
    %339 = vector.broadcast %338 : vector<1x256xf32> to vector<8x256xf32>
    %340 = arith.mulf %336, %339 : vector<8x256xf32>
    %341 = tpu.concatenate %305, %310, %315, %320, %299, %325, %330, %335, %340 in 0 : vector<8x256xf32>, vector<8x256xf32>, vector<8x256xf32>, vector<8x256xf32>, vector<8x256xf32>, vector<8x256xf32>, vector<8x256xf32>, vector<8x256xf32>, vector<8x256xf32> -> vector<72x256xf32>
    %342 = arith.truncf %341 : vector<72x256xf32> to vector<72x256xbf16>
    %c5_198 = arith.constant 5 : index
    %c0_199 = arith.constant 0 : index
    %c0_200 = arith.constant 0 : index
    %343 = vector.load %arg4[%c5_198, %c0_199, %c0_200] : memref<7x8x72xbf16, #tpu.memory_space<vmem>>, vector<1x8x72xbf16>
    %344 = vector.shape_cast %343 : vector<1x8x72xbf16> to vector<8x72xbf16>
    %cst_201 = arith.constant dense<0.000000e+00> : vector<8x256xf32>
    %345 = tpu.matmul %344, %342, %cst_201 {dimension_numbers = #tpu.dot_dimension_numbers<[1], [0], [0], [1], [0, 0, 1, 1], [], []>} : vector<8x72xbf16>, vector<72x256xbf16>, vector<8x256xf32> -> vector<8x256xf32>
    %c5_202 = arith.constant 5 : index
    %c0_203 = arith.constant 0 : index
    %c0_204 = arith.constant 0 : index
    %346 = vector.load %arg5[%c5_202, %c0_203, %c0_204] : memref<7x8x1xf32, #tpu.memory_space<vmem>>, vector<1x8x1xf32>
    %347 = vector.shape_cast %346 : vector<1x8x1xf32> to vector<8x1xf32>
    %348 = vector.broadcast %347 : vector<8x1xf32> to vector<8x256xf32>
    %349 = arith.addf %345, %348 : vector<8x256xf32>
    %cst_205 = arith.constant 0.000000e+00 : f32
    %350 = vector.broadcast %cst_205 : f32 to vector<8x256xf32>
    %351 = arith.maximumf %349, %350 : vector<8x256xf32>
    %352 = arith.truncf %351 : vector<8x256xf32> to vector<8x256xbf16>
    %c17_i32_206 = arith.constant 17 : i32
    %353 = tpu.dynamic_rotate %351 by %c17_i32_206 dim 1 : vector<8x256xf32>, i32 -> vector<8x256xf32>
    %c0_207 = arith.constant 0 : index
    %c0_208 = arith.constant 0 : index
    %354 = vector.load %arg8[%c0_207, %c0_208] : memref<9x256xbf16, #tpu.memory_space<vmem>>, vector<1x256xbf16>
    %355 = arith.extf %354 : vector<1x256xbf16> to vector<1x256xf32>
    %356 = vector.broadcast %355 : vector<1x256xf32> to vector<8x256xf32>
    %357 = arith.mulf %353, %356 : vector<8x256xf32>
    %c16_i32_209 = arith.constant 16 : i32
    %358 = tpu.dynamic_rotate %351 by %c16_i32_209 dim 1 : vector<8x256xf32>, i32 -> vector<8x256xf32>
    %c1_210 = arith.constant 1 : index
    %c0_211 = arith.constant 0 : index
    %359 = vector.load %arg8[%c1_210, %c0_211] : memref<9x256xbf16, #tpu.memory_space<vmem>>, vector<1x256xbf16>
    %360 = arith.extf %359 : vector<1x256xbf16> to vector<1x256xf32>
    %361 = vector.broadcast %360 : vector<1x256xf32> to vector<8x256xf32>
    %362 = arith.mulf %358, %361 : vector<8x256xf32>
    %c15_i32_212 = arith.constant 15 : i32
    %363 = tpu.dynamic_rotate %351 by %c15_i32_212 dim 1 : vector<8x256xf32>, i32 -> vector<8x256xf32>
    %c2_213 = arith.constant 2 : index
    %c0_214 = arith.constant 0 : index
    %364 = vector.load %arg8[%c2_213, %c0_214] : memref<9x256xbf16, #tpu.memory_space<vmem>>, vector<1x256xbf16>
    %365 = arith.extf %364 : vector<1x256xbf16> to vector<1x256xf32>
    %366 = vector.broadcast %365 : vector<1x256xf32> to vector<8x256xf32>
    %367 = arith.mulf %363, %366 : vector<8x256xf32>
    %c1_i32_215 = arith.constant 1 : i32
    %368 = tpu.dynamic_rotate %351 by %c1_i32_215 dim 1 : vector<8x256xf32>, i32 -> vector<8x256xf32>
    %c3_216 = arith.constant 3 : index
    %c0_217 = arith.constant 0 : index
    %369 = vector.load %arg8[%c3_216, %c0_217] : memref<9x256xbf16, #tpu.memory_space<vmem>>, vector<1x256xbf16>
    %370 = arith.extf %369 : vector<1x256xbf16> to vector<1x256xf32>
    %371 = vector.broadcast %370 : vector<1x256xf32> to vector<8x256xf32>
    %372 = arith.mulf %368, %371 : vector<8x256xf32>
    %c255_i32_218 = arith.constant 255 : i32
    %373 = tpu.dynamic_rotate %351 by %c255_i32_218 dim 1 : vector<8x256xf32>, i32 -> vector<8x256xf32>
    %c5_219 = arith.constant 5 : index
    %c0_220 = arith.constant 0 : index
    %374 = vector.load %arg8[%c5_219, %c0_220] : memref<9x256xbf16, #tpu.memory_space<vmem>>, vector<1x256xbf16>
    %375 = arith.extf %374 : vector<1x256xbf16> to vector<1x256xf32>
    %376 = vector.broadcast %375 : vector<1x256xf32> to vector<8x256xf32>
    %377 = arith.mulf %373, %376 : vector<8x256xf32>
    %c241_i32_221 = arith.constant 241 : i32
    %378 = tpu.dynamic_rotate %351 by %c241_i32_221 dim 1 : vector<8x256xf32>, i32 -> vector<8x256xf32>
    %c6_222 = arith.constant 6 : index
    %c0_223 = arith.constant 0 : index
    %379 = vector.load %arg8[%c6_222, %c0_223] : memref<9x256xbf16, #tpu.memory_space<vmem>>, vector<1x256xbf16>
    %380 = arith.extf %379 : vector<1x256xbf16> to vector<1x256xf32>
    %381 = vector.broadcast %380 : vector<1x256xf32> to vector<8x256xf32>
    %382 = arith.mulf %378, %381 : vector<8x256xf32>
    %c240_i32_224 = arith.constant 240 : i32
    %383 = tpu.dynamic_rotate %351 by %c240_i32_224 dim 1 : vector<8x256xf32>, i32 -> vector<8x256xf32>
    %c7_225 = arith.constant 7 : index
    %c0_226 = arith.constant 0 : index
    %384 = vector.load %arg8[%c7_225, %c0_226] : memref<9x256xbf16, #tpu.memory_space<vmem>>, vector<1x256xbf16>
    %385 = arith.extf %384 : vector<1x256xbf16> to vector<1x256xf32>
    %386 = vector.broadcast %385 : vector<1x256xf32> to vector<8x256xf32>
    %387 = arith.mulf %383, %386 : vector<8x256xf32>
    %c239_i32_227 = arith.constant 239 : i32
    %388 = tpu.dynamic_rotate %351 by %c239_i32_227 dim 1 : vector<8x256xf32>, i32 -> vector<8x256xf32>
    %c8_228 = arith.constant 8 : index
    %c0_229 = arith.constant 0 : index
    %389 = vector.load %arg8[%c8_228, %c0_229] : memref<9x256xbf16, #tpu.memory_space<vmem>>, vector<1x256xbf16>
    %390 = arith.extf %389 : vector<1x256xbf16> to vector<1x256xf32>
    %391 = vector.broadcast %390 : vector<1x256xf32> to vector<8x256xf32>
    %392 = arith.mulf %388, %391 : vector<8x256xf32>
    %393 = tpu.concatenate %357, %362, %367, %372, %351, %377, %382, %387, %392 in 0 : vector<8x256xf32>, vector<8x256xf32>, vector<8x256xf32>, vector<8x256xf32>, vector<8x256xf32>, vector<8x256xf32>, vector<8x256xf32>, vector<8x256xf32>, vector<8x256xf32> -> vector<72x256xf32>
    %394 = arith.truncf %393 : vector<72x256xf32> to vector<72x256xbf16>
    %c6_230 = arith.constant 6 : index
    %c0_231 = arith.constant 0 : index
    %c0_232 = arith.constant 0 : index
    %395 = vector.load %arg4[%c6_230, %c0_231, %c0_232] : memref<7x8x72xbf16, #tpu.memory_space<vmem>>, vector<1x8x72xbf16>
    %396 = vector.shape_cast %395 : vector<1x8x72xbf16> to vector<8x72xbf16>
    %cst_233 = arith.constant dense<0.000000e+00> : vector<8x256xf32>
    %397 = tpu.matmul %396, %394, %cst_233 {dimension_numbers = #tpu.dot_dimension_numbers<[1], [0], [0], [1], [0, 0, 1, 1], [], []>} : vector<8x72xbf16>, vector<72x256xbf16>, vector<8x256xf32> -> vector<8x256xf32>
    %c6_234 = arith.constant 6 : index
    %c0_235 = arith.constant 0 : index
    %c0_236 = arith.constant 0 : index
    %398 = vector.load %arg5[%c6_234, %c0_235, %c0_236] : memref<7x8x1xf32, #tpu.memory_space<vmem>>, vector<1x8x1xf32>
    %399 = vector.shape_cast %398 : vector<1x8x1xf32> to vector<8x1xf32>
    %400 = vector.broadcast %399 : vector<8x1xf32> to vector<8x256xf32>
    %401 = arith.addf %397, %400 : vector<8x256xf32>
    %cst_237 = arith.constant 0.000000e+00 : f32
    %402 = vector.broadcast %cst_237 : f32 to vector<8x256xf32>
    %403 = arith.maximumf %401, %402 : vector<8x256xf32>
    %404 = arith.truncf %403 : vector<8x256xf32> to vector<8x256xbf16>
    %405 = tpu.concatenate %92, %144, %196, %248, %300, %352, %404 in 0 : vector<8x256xbf16>, vector<8x256xbf16>, vector<8x256xbf16>, vector<8x256xbf16>, vector<8x256xbf16>, vector<8x256xbf16>, vector<8x256xbf16> -> vector<56x256xbf16>
    %c0_238 = arith.constant 0 : index
    %c0_239 = arith.constant 0 : index
    %406 = vector.load %arg6[%c0_238, %c0_239] : memref<9x56xbf16, #tpu.memory_space<vmem>>, vector<9x56xbf16>
    %cst_240 = arith.constant dense<0.000000e+00> : vector<9x256xf32>
    %407 = tpu.matmul %406, %405, %cst_240 {dimension_numbers = #tpu.dot_dimension_numbers<[1], [0], [0], [1], [0, 0, 1, 1], [], []>} : vector<9x56xbf16>, vector<56x256xbf16>, vector<9x256xf32> -> vector<9x256xf32>
    %408 = arith.truncf %407 : vector<9x256xf32> to vector<9x256xbf16>
    %c0_241 = arith.constant 0 : index
    %c0_242 = arith.constant 0 : index
    %409 = vector.load %arg10[%c0_241, %c0_242] : memref<256x1024xbf16, #tpu.memory_space<vmem>>, vector<256x1024xbf16>
    %cst_243 = arith.constant dense<0.000000e+00> : vector<9x1024xf32>
    %410 = tpu.matmul %408, %409, %cst_243 {dimension_numbers = #tpu.dot_dimension_numbers<[1], [0], [0], [1], [0, 0, 1, 1], [], []>} : vector<9x256xbf16>, vector<256x1024xbf16>, vector<9x1024xf32> -> vector<9x1024xf32>
    %411 = arith.truncf %1 : vector<1x256xf32> to vector<1x256xbf16>
    %c0_244 = arith.constant 0 : index
    %c0_245 = arith.constant 0 : index
    %412 = vector.load %arg11[%c0_244, %c0_245] : memref<256x1024xbf16, #tpu.memory_space<vmem>>, vector<256x1024xbf16>
    %cst_246 = arith.constant dense<0.000000e+00> : vector<1x1024xf32>
    %413 = tpu.matmul %411, %412, %cst_246 {dimension_numbers = #tpu.dot_dimension_numbers<[1], [0], [0], [1], [0, 0, 1, 1], [], []>} : vector<1x256xbf16>, vector<256x1024xbf16>, vector<1x1024xf32> -> vector<1x1024xf32>
    %c0_247 = arith.constant 0 : index
    %c0_248 = arith.constant 0 : index
    %414 = vector.load %arg7[%c0_247, %c0_248] : memref<1x1xf32, #tpu.memory_space<vmem>>, vector<1x1xf32>
    %415 = vector.broadcast %414 : vector<1x1xf32> to vector<1x1024xf32>
    %416 = arith.addf %413, %415 : vector<1x1024xf32>
    %417 = vector.extract_strided_slice %410 {offsets = [0, 0], sizes = [1, 1024], strides = [1, 1]} : vector<9x1024xf32> to vector<1x1024xf32>
    %c33_i32 = arith.constant 33 : i32
    %418 = tpu.dynamic_rotate %417 by %c33_i32 dim 1 : vector<1x1024xf32>, i32 -> vector<1x1024xf32>
    %c0_249 = arith.constant 0 : index
    %c0_250 = arith.constant 0 : index
    %419 = vector.load %arg9[%c0_249, %c0_250] : memref<9x1024xbf16, #tpu.memory_space<vmem>>, vector<1x1024xbf16>
    %420 = arith.extf %419 : vector<1x1024xbf16> to vector<1x1024xf32>
    %421 = arith.mulf %418, %420 : vector<1x1024xf32>
    %422 = arith.addf %416, %421 : vector<1x1024xf32>
    %423 = vector.extract_strided_slice %410 {offsets = [1, 0], sizes = [1, 1024], strides = [1, 1]} : vector<9x1024xf32> to vector<1x1024xf32>
    %c32_i32 = arith.constant 32 : i32
    %424 = tpu.dynamic_rotate %423 by %c32_i32 dim 1 : vector<1x1024xf32>, i32 -> vector<1x1024xf32>
    %c1_251 = arith.constant 1 : index
    %c0_252 = arith.constant 0 : index
    %425 = vector.load %arg9[%c1_251, %c0_252] : memref<9x1024xbf16, #tpu.memory_space<vmem>>, vector<1x1024xbf16>
    %426 = arith.extf %425 : vector<1x1024xbf16> to vector<1x1024xf32>
    %427 = arith.mulf %424, %426 : vector<1x1024xf32>
    %428 = arith.addf %422, %427 : vector<1x1024xf32>
    %429 = vector.extract_strided_slice %410 {offsets = [2, 0], sizes = [1, 1024], strides = [1, 1]} : vector<9x1024xf32> to vector<1x1024xf32>
    %c31_i32 = arith.constant 31 : i32
    %430 = tpu.dynamic_rotate %429 by %c31_i32 dim 1 : vector<1x1024xf32>, i32 -> vector<1x1024xf32>
    %c2_253 = arith.constant 2 : index
    %c0_254 = arith.constant 0 : index
    %431 = vector.load %arg9[%c2_253, %c0_254] : memref<9x1024xbf16, #tpu.memory_space<vmem>>, vector<1x1024xbf16>
    %432 = arith.extf %431 : vector<1x1024xbf16> to vector<1x1024xf32>
    %433 = arith.mulf %430, %432 : vector<1x1024xf32>
    %434 = arith.addf %428, %433 : vector<1x1024xf32>
    %435 = vector.extract_strided_slice %410 {offsets = [3, 0], sizes = [1, 1024], strides = [1, 1]} : vector<9x1024xf32> to vector<1x1024xf32>
    %c1_i32_255 = arith.constant 1 : i32
    %436 = tpu.dynamic_rotate %435 by %c1_i32_255 dim 1 : vector<1x1024xf32>, i32 -> vector<1x1024xf32>
    %c3_256 = arith.constant 3 : index
    %c0_257 = arith.constant 0 : index
    %437 = vector.load %arg9[%c3_256, %c0_257] : memref<9x1024xbf16, #tpu.memory_space<vmem>>, vector<1x1024xbf16>
    %438 = arith.extf %437 : vector<1x1024xbf16> to vector<1x1024xf32>
    %439 = arith.mulf %436, %438 : vector<1x1024xf32>
    %440 = arith.addf %434, %439 : vector<1x1024xf32>
    %441 = vector.extract_strided_slice %410 {offsets = [4, 0], sizes = [1, 1024], strides = [1, 1]} : vector<9x1024xf32> to vector<1x1024xf32>
    %442 = arith.addf %440, %441 : vector<1x1024xf32>
    %443 = vector.extract_strided_slice %410 {offsets = [5, 0], sizes = [1, 1024], strides = [1, 1]} : vector<9x1024xf32> to vector<1x1024xf32>
    %c1023_i32 = arith.constant 1023 : i32
    %444 = tpu.dynamic_rotate %443 by %c1023_i32 dim 1 : vector<1x1024xf32>, i32 -> vector<1x1024xf32>
    %c5_258 = arith.constant 5 : index
    %c0_259 = arith.constant 0 : index
    %445 = vector.load %arg9[%c5_258, %c0_259] : memref<9x1024xbf16, #tpu.memory_space<vmem>>, vector<1x1024xbf16>
    %446 = arith.extf %445 : vector<1x1024xbf16> to vector<1x1024xf32>
    %447 = arith.mulf %444, %446 : vector<1x1024xf32>
    %448 = arith.addf %442, %447 : vector<1x1024xf32>
    %449 = vector.extract_strided_slice %410 {offsets = [6, 0], sizes = [1, 1024], strides = [1, 1]} : vector<9x1024xf32> to vector<1x1024xf32>
    %c993_i32 = arith.constant 993 : i32
    %450 = tpu.dynamic_rotate %449 by %c993_i32 dim 1 : vector<1x1024xf32>, i32 -> vector<1x1024xf32>
    %c6_260 = arith.constant 6 : index
    %c0_261 = arith.constant 0 : index
    %451 = vector.load %arg9[%c6_260, %c0_261] : memref<9x1024xbf16, #tpu.memory_space<vmem>>, vector<1x1024xbf16>
    %452 = arith.extf %451 : vector<1x1024xbf16> to vector<1x1024xf32>
    %453 = arith.mulf %450, %452 : vector<1x1024xf32>
    %454 = arith.addf %448, %453 : vector<1x1024xf32>
    %455 = vector.extract_strided_slice %410 {offsets = [7, 0], sizes = [1, 1024], strides = [1, 1]} : vector<9x1024xf32> to vector<1x1024xf32>
    %c992_i32 = arith.constant 992 : i32
    %456 = tpu.dynamic_rotate %455 by %c992_i32 dim 1 : vector<1x1024xf32>, i32 -> vector<1x1024xf32>
    %c7_262 = arith.constant 7 : index
    %c0_263 = arith.constant 0 : index
    %457 = vector.load %arg9[%c7_262, %c0_263] : memref<9x1024xbf16, #tpu.memory_space<vmem>>, vector<1x1024xbf16>
    %458 = arith.extf %457 : vector<1x1024xbf16> to vector<1x1024xf32>
    %459 = arith.mulf %456, %458 : vector<1x1024xf32>
    %460 = arith.addf %454, %459 : vector<1x1024xf32>
    %461 = vector.extract_strided_slice %410 {offsets = [8, 0], sizes = [1, 1024], strides = [1, 1]} : vector<9x1024xf32> to vector<1x1024xf32>
    %c991_i32 = arith.constant 991 : i32
    %462 = tpu.dynamic_rotate %461 by %c991_i32 dim 1 : vector<1x1024xf32>, i32 -> vector<1x1024xf32>
    %c8_264 = arith.constant 8 : index
    %c0_265 = arith.constant 0 : index
    %463 = vector.load %arg9[%c8_264, %c0_265] : memref<9x1024xbf16, #tpu.memory_space<vmem>>, vector<1x1024xbf16>
    %464 = arith.extf %463 : vector<1x1024xbf16> to vector<1x1024xf32>
    %465 = arith.mulf %462, %464 : vector<1x1024xf32>
    %466 = arith.addf %460, %465 : vector<1x1024xf32>
    %c0_266 = arith.constant 0 : index
    %c0_267 = arith.constant 0 : index
    %c0_268 = arith.constant 0 : index
    %467 = vector.load %arg12[%c0_266, %c0_267, %c0_268] : memref<1x1x1024xf32, #tpu.memory_space<vmem>>, vector<1x1x1024xf32>
    %468 = vector.shape_cast %467 : vector<1x1x1024xf32> to vector<1x1024xf32>
    %469 = vector.shape_cast %466 : vector<1x1024xf32> to vector<1x1x1024xf32>
    tpu.vector_store %arg12[%c0_266, %c0_267, %c0_268], %469 {strides = array<i32>} : memref<1x1x1024xf32, #tpu.memory_space<vmem>>, vector<1x1x1024xf32>,
    return
  }
  func.func @transform_0(%arg0: i32) -> (i32, i32, i32) {
    %c0_i32 = arith.constant 0 : i32
    %c0_i32_0 = arith.constant 0 : i32
    %c0_i32_1 = arith.constant 0 : i32
    return %arg0, %c0_i32, %c0_i32_0 : i32, i32, i32
  }
  func.func @transform_1(%arg0: i32) -> (i32, i32) {
    %c0_i32 = arith.constant 0 : i32
    %c0_i32_0 = arith.constant 0 : i32
    %c0_i32_1 = arith.constant 0 : i32
    return %c0_i32, %c0_i32_0 : i32, i32
  }
  func.func @transform_2(%arg0: i32) -> (i32, i32) {
    %c0_i32 = arith.constant 0 : i32
    %c0_i32_0 = arith.constant 0 : i32
    %c0_i32_1 = arith.constant 0 : i32
    return %c0_i32, %c0_i32_0 : i32, i32
  }
  func.func @transform_3(%arg0: i32) -> (i32, i32, i32) {
    %c0_i32 = arith.constant 0 : i32
    %c0_i32_0 = arith.constant 0 : i32
    %c0_i32_1 = arith.constant 0 : i32
    %c0_i32_2 = arith.constant 0 : i32
    return %c0_i32, %c0_i32_0, %c0_i32_1 : i32, i32, i32
  }
  func.func @transform_4(%arg0: i32) -> (i32, i32, i32) {
    %c0_i32 = arith.constant 0 : i32
    %c0_i32_0 = arith.constant 0 : i32
    %c0_i32_1 = arith.constant 0 : i32
    %c0_i32_2 = arith.constant 0 : i32
    return %c0_i32, %c0_i32_0, %c0_i32_1 : i32, i32, i32
  }
  func.func @transform_5(%arg0: i32) -> (i32, i32) {
    %c0_i32 = arith.constant 0 : i32
    %c0_i32_0 = arith.constant 0 : i32
    %c0_i32_1 = arith.constant 0 : i32
    return %c0_i32, %c0_i32_0 : i32, i32
  }
  func.func @transform_6(%arg0: i32) -> (i32, i32) {
    %c0_i32 = arith.constant 0 : i32
    %c0_i32_0 = arith.constant 0 : i32
    %c0_i32_1 = arith.constant 0 : i32
    return %c0_i32, %c0_i32_0 : i32, i32
  }
  func.func @transform_7(%arg0: i32) -> (i32, i32) {
    %c0_i32 = arith.constant 0 : i32
    %c0_i32_0 = arith.constant 0 : i32
    %c0_i32_1 = arith.constant 0 : i32
    return %c0_i32, %c0_i32_0 : i32, i32
  }
  func.func @transform_8(%arg0: i32) -> (i32, i32) {
    %c0_i32 = arith.constant 0 : i32
    %c0_i32_0 = arith.constant 0 : i32
    %c0_i32_1 = arith.constant 0 : i32
    return %c0_i32, %c0_i32_0 : i32, i32
  }
  func.func @transform_9(%arg0: i32) -> (i32, i32) {
    %c0_i32 = arith.constant 0 : i32
    %c0_i32_0 = arith.constant 0 : i32
    %c0_i32_1 = arith.constant 0 : i32
    return %c0_i32, %c0_i32_0 : i32, i32
  }
  func.func @transform_10(%arg0: i32) -> (i32, i32) {
    %c0_i32 = arith.constant 0 : i32
    %c0_i32_0 = arith.constant 0 : i32
    %c0_i32_1 = arith.constant 0 : i32
    return %c0_i32, %c0_i32_0 : i32, i32
  }
  func.func @transform_11(%arg0: i32) -> (i32, i32, i32) {
    %c0_i32 = arith.constant 0 : i32
    %c0_i32_0 = arith.constant 0 : i32
    %c0_i32_1 = arith.constant 0 : i32
    return %arg0, %c0_i32, %c0_i32_0 : i32, i32, i32
  }
}

</mosaic_0001>

<bundles_post_ra>
// kernel: neg.9
= control target key start
LH: loop header
LB: loop body
LE: loop exit
PB: predicated region body
PF: predicated region fallthrough
CT: control target
= control target key end

     0   :  { %s120_s0 = inlined_call_operand.vmem [shape: f32[7,4,1], index: 0, kind: input, shape index: {}]   ;;  %s121_s1 = inlined_call_operand.vmem [shape: f32[7,4,1], index: 1, kind: output, shape index: {}]  }
   0x1   :  { %v2_v0 = vld [vmem:[%s120_s0] sm:$0xf]  ;;  %v56_v1 = vld [vmem:[%s120_s0 + $0x4] sm:$0xf]  ;;  %v58_v2 = vld [vmem:[%s120_s0 + $0x8] sm:$0xf] }
   0x2   :  { %v5_v3 = vxor.u32 2147483648, %v2_v0  ;;  %v12_v4 = vxor.u32 2147483648, %v56_v1  ;;  %v20_v5 = vxor.u32 2147483648, %v58_v2  ;;  %v60_v6 = vld [vmem:[%s120_s0 + $0xc] sm:$0xf] }
   0x3   :  { %v28_v7 = vxor.u32 2147483648, %v60_v6  ;;  %v62_v8 = vld [vmem:[%s120_s0 + $0x10] sm:$0xf]  ;;  %v64_v9 = vld [vmem:[%s120_s0 + $0x14] sm:$0xf] }
   0x4   :  { %7 = vst [vmem:[%s121_s1] sm:$0xf] %v5_v3  ;;  %57 = vst [vmem:[%s121_s1 + $0x4] sm:$0xf] %v12_v4  ;;  %v36_v10 = vxor.u32 2147483648, %v62_v8  ;;  %v44_v11 = vxor.u32 2147483648, %v64_v9 }
   0x5   :  { %59 = vst [vmem:[%s121_s1 + $0x8] sm:$0xf] %v20_v5  ;;  %v66_v12 = vld [vmem:[%s120_s0 + $0x18] sm:$0xf]  ;;  %61 = vst [vmem:[%s121_s1 + $0xc] sm:$0xf] %v28_v7 }
   0x6   :  { %v52_v13 = vxor.u32 2147483648, %v66_v12  ;;  %63 = vst [vmem:[%s121_s1 + $0x10] sm:$0xf] %v36_v10  ;;  %65 = vst [vmem:[%s121_s1 + $0x14] sm:$0xf] %v44_v11 }
   0x8   :  { %67 = vst [vmem:[%s121_s1 + $0x18] sm:$0xf] %v52_v13 }

// kernel: cnn_forward.1
= control target key start
LH: loop header
LB: loop body
LE: loop exit
PB: predicated region body
PF: predicated region fallthrough
CT: control target
= control target key end

     0   :  { %s4806_s19 = smov 0   ;;  %s7132_s0 = inlined_call_operand.vmem [shape: f32[2,1,256], index: 0, kind: input, shape index: {}]   ;;  %s7133_s1 = inlined_call_operand.vmem [shape: bf16[8,9], index: 1, kind: input, shape index: {}]   ;;  %s7134_s2 = inlined_call_operand.vmem [shape: f32[8,1], index: 2, kind: input, shape index: {}]   ;;  %s7135_s3 = inlined_call_operand.vmem [shape: bf16[7,8,72], index: 3, kind: input, shape index: {}]   ;;  %s7136_s4 = inlined_call_operand.vmem [shape: f32[7,8,1], index: 4, kind: input, shape index: {}]   ;;  %s7137_s5 = inlined_call_operand.vmem [shape: bf16[9,56], index: 5, kind: input, shape index: {}]   ;;  %s7138_s6 = inlined_call_operand.<no memory space> [shape: f32[1,1], index: 6, kind: input, shape index: {}]   ;;  %s7139_s7 = inlined_call_operand.vmem [shape: bf16[9,256], index: 7, kind: input, shape index: {}]   ;;  %s7140_s8 = inlined_call_operand.vmem [shape: bf16[9,1024], index: 8, kind: input, shape index: {}]   ;;  %s7141_s9 = inlined_call_operand.vmem [shape: bf16[256,1024], index: 9, kind: input, shape index: {}]   ;;  %s7142_s10 = inlined_call_operand.vmem [shape: bf16[256,1024], index: 10, kind: input, shape index: {}]   ;;  %s7143_s11 = inlined_call_operand.vmem [shape: f32[2,1,1024], index: 11, kind: output, shape index: {}]  }
   0x1   :  { %v16_v0 = vstv %s7138_s6 }
   0x2   :  { %17 = vst [vmem:[#allocation2] sm:$0x1] %v16_v0 }
   0x3 LB: > { %s4395_s20 = sadd.s32 4294967295, %s4724_s19   ;;  %p4399_p0 = scmp.ge.s32.totalorder %s4724_s19, 1  ;;  %s4724_s19 = sphi %s4806_s19, %s23_s19  }
   0x4   : > { %p338_p1 = scmp.lt.s32.totalorder %s4724_s19, 3 }
   0x6   : > { %p339_p2 = pnand %p4399_p0, %p338_p1 }
   0x8   : > { %342 = sbr.rel (%p339_p2) target bundleno = 3671 (0xe57), region = 64 }
   0xf   : > { %p376_p3 = scmp.lt.s32.totalorder %s4395_s20, 1  ;;  %v387_v1 = vlaneseq  ;;  %s4726_s24 = smov 15   ;;  %v4733_v8 = vmov 0   ;;  %v578_v9 = vld [vmem:[%s7134_s2] sm:$0xff]  ;;  %vm554_vm3 = vcmask 1040384   ;;  %vm557_vm5 = vcmask 1041408  }
  0x10   : > { %s4727_s25 = smov 16   ;;  %s4728_s26 = smov 17   ;;  %628 = vmatprep.mubr.bf16.mxu0 %v4733_v8  ;;  %4715 = vset.pattern.permute.xlu0 %v4733_v8  ;;  %v433_v12 = vld [vmem:[%s7139_s7] sm:$0x22]  ;;  %v406_v13 = vld [vmem:[%s7139_s7] sm:$0x11] }
  0x11   : > { %s7215_s20 = smov (!%p376_p3, %s4395_s20), 1  ;;  %v4816_v2 = vshrl.u32 %v387_v1, 7  ;;  %s4729_s27 = smov 1   ;;  %824 = vmatprep.mubr.bf16.mxu1 %v4733_v8  ;;  %4716 = vset.pattern.permute.xlu1 %v4733_v8  ;;  %v4879_v14 = vand.u32 127, %v387_v1  ;;  %v4881_v15 = vunpack.c.l.bf16 %v433_v12  ;;  %v4883_v16 = vunpack.c.h.bf16 %v433_v12  ;;  %v4895_v25 = vld [vmem:[%s7139_s7] sm:$0x44] }
  0x12   : > { %s4400_s6 = sshll.u32 %s7215_s20, 1  ;;  %s4730_s28 = smov 127   ;;  %v4885_v19 = vunpack.c.l.bf16 %v406_v13  ;;  %v4887_v20 = vunpack.c.h.bf16 %v406_v13  ;;  %v465_v32 = vunpack.c.l.bf16 %v4895_v25  ;;  %v466_v33 = vunpack.c.h.bf16 %v4895_v25  ;;  %v482_v34 = vld [vmem:[%s7139_s7] sm:$0x88] }
  0x13   : > { %7162 = vst [vmem:[#allocation3_spill] sm:$0xff] %v4816_v2  ;;  %v4820_v3 = vsub.s32 0, %v4816_v2  ;;  %s379_s23 = scalar_lea.vmem %s7132_s0, %s4400_s6  ;;  %v4826_v4 = vsub.s32 1, %v4816_v2  ;;  %s4731_s29 = smov 113   ;;  %vm415_vm0 = vcmp.lt.s32.totalorder %v4879_v14, 16  ;;  %v438_v21 = vrot.slane %v4881_v15, 2 }
  0x14   : > { %v385_v5 = vld [vmem:[%s379_s23] sm:$0x3]  ;;  %s4732_s30 = smov 112   ;;  %s4734_s12 = smov 111   ;;  %v439_v22 = vrot.slane %v4883_v16, 2  ;;  %vm430_vm1 = vcmp.lt.s32.totalorder %v4879_v14, 15  ;;  %v4926_v45 = vunpack.c.l.bf16 %v482_v34  ;;  %v4928_v46 = vunpack.c.h.bf16 %v482_v34 }
  0x15   : > { %v4829_v6 = vrot.slane %v385_v5, %v4820_v3  ;;  %v4836_v7 = vrot.slane %v385_v5, %v4826_v4  ;;  %v420_v26 = vrot.slane %v4885_v19, 1  ;;  %v421_v27 = vrot.slane %v4887_v20, 1  ;;  %s4736_s22 = smov 33   ;;  %s4737_s23 = smov 32  }
  0x16   : > { %vm403_vm2 = vcmp.lt.s32.totalorder %v4879_v14, 17  ;;  %vm448_vm4 = vcmp.lt.s32.totalorder %v4879_v14, 1  ;;  %v451_v30 = vrot.slane %v4881_v15, 3  ;;  %v452_v31 = vrot.slane %v4883_v16, 3  ;;  %s4738_s13 = smov 31   ;;  %s4739_s14 = smov 97  }
  0x17   : > { %426 = vrot.lane.b32.xlu1 %v4829_v6, %s4726_s24  ;;  %411 = vrot.lane.b32.xlu0 %v4829_v6, %s4727_s25  ;;  %vm560_vm6 = vcmask 1042432   ;;  %vm461_vm7 = vcmp.lt.s32.totalorder %v4879_v14, 127  ;;  %v469_v49 = vrot.slane %v465_v32, 5  ;;  %v470_v50 = vrot.slane %v466_v33, 5  ;;  %s4740_s15 = smov 96   ;;  %s4741_s16 = smov 95  }
  0x18   : > { %vm563_vm8 = vcmask 1043456   ;;  %vm479_vm9 = vcmp.lt.s32.totalorder %v4879_v14, 113  ;;  %v487_v61 = vrot.slane %v4926_v45, 6  ;;  %v488_v62 = vrot.slane %v4928_v46, 6  ;;  %s4401_s6 = sshll.u32 %s7215_s20, 3 }
  0x19   : > { %vm566_vm10 = vcmask 1044480   ;;  %vm497_vm11 = vcmp.lt.s32.totalorder %v4879_v14, 112  ;;  %v500_v1 = vrot.slane %v4926_v45, 7  ;;  %vm569_vm12 = vcmask 1045504  }
  0x1a   : > { %vm510_vm13 = vcmp.lt.s32.totalorder %v4879_v14, 111  ;;  %vm572_vm14 = vcmask 1046528   ;;  %vm584_vm15 = vcmask 72704  }
  0x1b   : > { %428 = vrot.lane.b32.xlu1 %v4836_v7, %s4726_s24  ;;  %413 = vrot.lane.b32.xlu0 %v4836_v7, %s4727_s25 }
  0x1f   : > { %399 = vrot.lane.b32.xlu1 %v4836_v7, %s4728_s26  ;;  %397 = vrot.lane.b32.xlu0 %v4829_v6, %s4728_s26 }
  0x23   : > { %446 = vrot.lane.b32.xlu1 %v4836_v7, %s4729_s27  ;;  %444 = vrot.lane.b32.xlu0 %v4829_v6, %s4729_s27 }
  0x27   : > { %459 = vrot.lane.b32.xlu1 %v4836_v7, %s4730_s28  ;;  %457 = vrot.lane.b32.xlu0 %v4829_v6, %s4730_s28 }
  0x2b   : > { %477 = vrot.lane.b32.xlu1 %v4836_v7, %s4731_s29  ;;  %475 = vrot.lane.b32.xlu0 %v4829_v6, %s4731_s29 }
  0x2f   : > { %495 = vrot.lane.b32.xlu1 %v4836_v7, %s4732_s30  ;;  %493 = vrot.lane.b32.xlu0 %v4829_v6, %s4732_s30 }
  0x33   : > { %508 = vrot.lane.b32.xlu1 %v4836_v7, %s4734_s12  ;;  %506 = vrot.lane.b32.xlu0 %v4829_v6, %s4734_s12 }
  0x37   : > { %581 = vperm.xlu0 %4715, %v578_v9  }
  0x89   : > { %v427_v10 = vpop.permute.xlu1 %426  ;;  %v412_v11 = vpop.permute.xlu0 %411 }
  0x8d   : > { %v429_v17 = vpop.permute.xlu1 %428  ;;  %v414_v18 = vpop.permute.xlu0 %413 }
  0x8e   : > { %v416_v28 = vsel %vm415_vm0, %v412_v11, %v414_v18  ;;  %v417_v29 = vsel %vm415_vm0, %v414_v18, %v412_v11  ;;  %v431_v35 = vsel %vm430_vm1, %v427_v10, %v429_v17  ;;  %v432_v36 = vsel %vm430_vm1, %v429_v17, %v427_v10 }
  0x8f   : > { %v424_v41 = vmul.f32 %v420_v26, %v417_v29  ;;  %v425_v42 = vmul.f32 %v421_v27, %v416_v28  ;;  %v442_v51 = vmul.f32 %v438_v21, %v432_v36  ;;  %v443_v52 = vmul.f32 %v439_v22, %v431_v35  ;;  %v4958_v29 = vld [vmem:[%s7139_s7 + $0x8] sm:$0x11] }
  0x90   : > { %v501_v26 = vrot.slane %v4928_v46, 7 }
  0x91   : > { %v400_v23 = vpop.permute.xlu1 %399  ;;  %v398_v24 = vpop.permute.xlu0 %397  ;;  %v520_v57 = vrot.slane %v424_v41, 7  ;;  %v521_v58 = vrot.slane %v425_v42, 7  ;;  %v526_v17 = vrot.slane %v442_v51, 6  ;;  %v527_v18 = vrot.slane %v443_v52, 6 }
  0x92   : > { %v404_v37 = vsel %vm403_vm2, %v398_v24, %v400_v23  ;;  %v405_v38 = vsel %vm403_vm2, %v400_v23, %v398_v24 }
  0x93   : > { %v409_v47 = vmul.f32 %v4885_v19, %v405_v38  ;;  %v410_v48 = vmul.f32 %v4887_v20, %v404_v37 }
  0x95   : > { %v447_v39 = vpop.permute.xlu1 %446  ;;  %v445_v40 = vpop.permute.xlu0 %444  ;;  %v555_v63 = vsel %vm554_vm3, %v409_v47, %v520_v57  ;;  %v556_v0 = vsel %vm554_vm3, %v410_v48, %v521_v58  ;;  %v515_v47 = vunpack.c.h.bf16 %v4958_v29  ;;  %vm782_vm3 = vcmask 588800  }
  0x96   : > { %v449_v43 = vsel %vm448_vm4, %v445_v40, %v447_v39  ;;  %v450_v44 = vsel %vm448_vm4, %v447_v39, %v445_v40  ;;  %v558_v27 = vsel %vm557_vm5, %v555_v63, %v526_v17  ;;  %v559_v28 = vsel %vm557_vm5, %v556_v0, %v527_v18 }
  0x97   : > { %v455_v53 = vmul.f32 %v451_v30, %v450_v44  ;;  %v456_v54 = vmul.f32 %v452_v31, %v449_v43  ;;  %v514_v44 = vunpack.c.l.bf16 %v4958_v29  ;;  %vm3815_vm5 = vcmp.lt.s32.totalorder %v4879_v14, 31 }
  0x99   : > { %v460_v55 = vpop.permute.xlu1 %459  ;;  %v458_v56 = vpop.permute.xlu0 %457  ;;  %v532_v5 = vrot.slane %v455_v53, 5  ;;  %v533_v9 = vrot.slane %v456_v54, 5 }
  0x9a   : > { %v462_v59 = vsel %vm461_vm7, %v458_v56, %v460_v55  ;;  %v463_v60 = vsel %vm461_vm7, %v460_v55, %v458_v56 }
  0x9b   : > { %v473_v10 = vmul.f32 %v469_v49, %v462_v59  ;;  %v474_v11 = vmul.f32 %v470_v50, %v463_v60  ;;  %v561_v30 = vsel %vm560_vm6, %v558_v27, %v532_v5  ;;  %v562_v31 = vsel %vm560_vm6, %v559_v28, %v533_v9  ;;  %v776_v27 = vld [vmem:[%s7136_s4] sm:$0xff] }
  0x9c   : > { %v564_v48 = vsel %vm563_vm8, %v561_v30, %v4829_v6  ;;  %v565_v49 = vsel %vm563_vm8, %v562_v31, %v4836_v7  ;;  %v4735_v50 = vmov 65535   ;;  %vm4096_vm6 = vcmp.lt.s32.totalorder %v4879_v14, 97 }
  0x9d   : > { %v478_v12 = vpop.permute.xlu1 %477  ;;  %v476_v13 = vpop.permute.xlu0 %475  ;;  %v538_v34 = vrot.slane %v473_v10, 3  ;;  %v539_v35 = vrot.slane %v474_v11, 3  ;;  %v588_v51 = vsel %vm563_vm8, 4294967295, %v4735_v50 }
  0x9e   : > { %v480_v21 = vsel %vm479_vm9, %v476_v13, %v478_v12  ;;  %v481_v22 = vsel %vm479_vm9, %v478_v12, %v476_v13  ;;  %v589_v5 = vsel %vm566_vm10, %v588_v51, 0  ;;  %v577_v13 = vld [vmem:[%s7133_s1] sm:$0xf] }
  0x9f   : > { %v491_v23 = vmul.f32 %v487_v61, %v480_v21  ;;  %v492_v24 = vmul.f32 %v488_v62, %v481_v22  ;;  %v567_v56 = vsel %vm566_vm10, %v564_v48, %v538_v34  ;;  %v568_v57 = vsel %vm566_vm10, %v565_v49, %v539_v35 }
  0xa0   : > { %v5033_v35 = vrot.slane %v4885_v19, %v4820_v3  ;;  %v693_v48 = vsub.s32 3, %v4816_v2 }
  0xa1   : > { %v496_v36 = vpop.permute.xlu1 %495  ;;  %v494_v37 = vpop.permute.xlu0 %493  ;;  %v544_v38 = vrot.slane %v491_v23, 2  ;;  %v545_v39 = vrot.slane %v492_v24, 2 }
  0xa2   : > { %v498_v40 = vsel %vm497_vm11, %v494_v37, %v496_v36  ;;  %v499_v41 = vsel %vm497_vm11, %v496_v36, %v494_v37  ;;  %v5037_v36 = vrot.slane %v4887_v20, %v4820_v3  ;;  %v5041_v37 = vrot.slane %v4885_v19, %v4826_v4 }
  0xa3   : > { %v504_v42 = vmul.f32 %v500_v1, %v498_v40  ;;  %v505_v43 = vmul.f32 %v501_v26, %v499_v41  ;;  %v571_v60 = vsel %vm569_vm12, %v568_v57, %v545_v39  ;;  %v570_v61 = vsel %vm569_vm12, %v567_v56, %v544_v38 }
  0xa4   : > { %v5045_v38 = vrot.slane %v4887_v20, %v4826_v4 }
  0xa5   : > { %v550_v52 = vrot.slane %v504_v42, 1  ;;  %v551_v53 = vrot.slane %v505_v43, 1  ;;  %v509_v54 = vpop.permute.xlu1 %508  ;;  %v507_v55 = vpop.permute.xlu0 %506  ;;  %v677_v43 = vsub.s32 2, %v4816_v2 }
  0xa6   : > { %v511_v58 = vsel %vm510_vm13, %v507_v55, %v509_v54  ;;  %v512_v59 = vsel %vm510_vm13, %v509_v54, %v507_v55  ;;  %v709_v55 = vsub.s32 5, %v4816_v2 }
  0xa7   : > { %v516_v62 = vmul.f32 %v514_v44, %v511_v58  ;;  %v517_v63 = vmul.f32 %v515_v47, %v512_v59  ;;  %v574_v0 = vsel %vm572_vm14, %v571_v60, %v551_v53  ;;  %v573_v1 = vsel %vm572_vm14, %v570_v61, %v550_v52 }
  0xa8   : > { %v5063_v56 = vrot.slane %v4881_v15, %v677_v43  ;;  %v5066_v57 = vrot.slane %v4883_v16, %v677_v43  ;;  %v5069_v58 = vrot.slane %v4881_v15, %v693_v48  ;;  %v5072_v59 = vrot.slane %v4883_v16, %v693_v48 }
  0xa9   : > { %v576_v9 = vpack.c.bf16 %v517_v63, %v574_v0  ;;  %v575_v10 = vpack.c.bf16 %v516_v62, %v573_v1  ;;  %v5080_v0 = vrot.slane %v465_v32, %v709_v55  ;;  %v5084_v15 = vrot.slane %v466_v33, %v709_v55 }
  0xaa   : > { %v5123_v43 = vrot.slane %v514_v44, %v4820_v3 }
  0xab   : > { %v594_v11 = vand.u32 %v589_v5, %v576_v9  ;;  %v591_v12 = vand.u32 %v589_v5, %v575_v10 }
  0xad   : > { %596 = vmatprep.subr.bf16.mxu0 %v594_v11 }
  0xae   : > { %597 = vmatpush1.bf16.msra.mxu0 %v591_v12 }
  0xb1   : > { %4402 = vmatmul.mubr.msk.bf16.vlgmr.msra.gmra.mrb[0].mxu0 %vm584_vm15, %v577_v13 }
  0xb2   : > { %961 = vmatprep.mubr.bf16.mxu0 %v4733_v8 }
  0xb6   : > { %v582_v17 = vpop.permute.xlu0 %581 }
 0x184   : > { %v630_v18 = vpop.f32.mrb[0].mxu0 }
 0x185   : > { %v4992_v21 = vadd.f32 %v630_v18, %v582_v17  ;;  %v632_v22 = vpop.f32.mrb[1].mxu0  ;;  %v725_v18 = vsub.s32 6, %v4816_v2 }
 0x186   : > { %v634_v23 = vpop.f32.mrb[2].mxu0  ;;  %v4998_v26 = vadd.f32 %v632_v22, %v582_v17  ;;  %v741_v22 = vsub.s32 7, %v4816_v2 }
 0x187   : > { %v635_v24 = vpop.f32.mrb[3].mxu0  ;;  %653 = vrot.lane.b32.xlu0 %v4992_v21, %s4727_s25  ;;  %637 = vrot.lane.b32.xlu1 %v4992_v21, %s4728_s26 }
 0x18b   : > { %669 = vrot.lane.b32.xlu0 %v4992_v21, %s4726_s24  ;;  %639 = vrot.lane.b32.xlu1 %v4998_v26, %s4728_s26 }
 0x18f   : > { %685 = vrot.lane.b32.xlu0 %v4992_v21, %s4729_s27  ;;  %655 = vrot.lane.b32.xlu1 %v4998_v26, %s4727_s25 }
 0x193   : > { %701 = vrot.lane.b32.xlu0 %v4992_v21, %s4730_s28  ;;  %671 = vrot.lane.b32.xlu1 %v4998_v26, %s4726_s24 }
 0x197   : > { %717 = vrot.lane.b32.xlu0 %v4992_v21, %s4731_s29  ;;  %687 = vrot.lane.b32.xlu1 %v4998_v26, %s4729_s27 }
 0x19b   : > { %733 = vrot.lane.b32.xlu0 %v4992_v21, %s4732_s30  ;;  %703 = vrot.lane.b32.xlu1 %v4998_v26, %s4730_s28 }
 0x19f   : > { %749 = vrot.lane.b32.xlu0 %v4992_v21, %s4734_s12  ;;  %719 = vrot.lane.b32.xlu1 %v4998_v26, %s4731_s29 }
 0x1a3   : > { %779 = vperm.xlu0 %4715, %v776_v27   ;;  %735 = vrot.lane.b32.xlu1 %v4998_v26, %s4732_s30 }
 0x1a7   : > { %751 = vrot.lane.b32.xlu1 %v4998_v26, %s4734_s12 }
 0x1f9   : > { %v654_v28 = vpop.permute.xlu0 %653  ;;  %v638_v30 = vpop.permute.xlu1 %637 }
 0x1fd   : > { %v670_v31 = vpop.permute.xlu0 %669  ;;  %v640_v34 = vpop.permute.xlu1 %639 }
 0x1fe   : > { %v642_v39 = vsel %vm403_vm2, %v640_v34, %v638_v30  ;;  %v641_v40 = vsel %vm403_vm2, %v638_v30, %v640_v34  ;;  %v5108_v34 = vrot.slane %v4928_v46, %v725_v18 }
 0x1ff   : > { %v652_v4 = vmul.f32 %v5037_v36, %v641_v40  ;;  %v651_v50 = vmul.f32 %v5033_v35, %v642_v39  ;;  %v5111_v39 = vrot.slane %v4926_v45, %v741_v22  ;;  %v5114_v40 = vrot.slane %v4928_v46, %v741_v22 }
 0x201   : > { %v686_v41 = vpop.permute.xlu0 %685  ;;  %v656_v42 = vpop.permute.xlu1 %655 }
 0x202   : > { %v658_v19 = vsel %vm415_vm0, %v656_v42, %v654_v28  ;;  %v657_v49 = vsel %vm415_vm0, %v654_v28, %v656_v42 }
 0x203   : > { %v668_v20 = vmul.f32 %v5045_v38, %v657_v49  ;;  %v667_v51 = vmul.f32 %v5041_v37, %v658_v19 }
 0x205   : > { %v672_v52 = vpop.permute.xlu1 %671  ;;  %v766_v53 = vpack.c.bf16 %v668_v20, %v652_v4  ;;  %v765_v54 = vpack.c.bf16 %v667_v51, %v651_v50  ;;  %v702_v60 = vpop.permute.xlu0 %701 }
 0x206   : > { %v673_v61 = vsel %vm430_vm1, %v670_v31, %v672_v52  ;;  %v674_v62 = vsel %vm430_vm1, %v672_v52, %v670_v31  ;;  %v5105_v31 = vrot.slane %v4926_v45, %v725_v18  ;;  %v5128_v45 = vrot.slane %v515_v47, %v4820_v3 }
 0x207   : > { %792 = vmatprep.subr.bf16.mxu1 %v766_v53  ;;  %v683_v5 = vmul.f32 %v5063_v56, %v674_v62  ;;  %v684_v9 = vmul.f32 %v5066_v57, %v673_v61  ;;  %v775_v62 = vld [vmem:[%s7135_s3] sm:$0xf] }
 0x208   : > { %793 = vmatpush1.bf16.msra.mxu1 %v765_v54 }
 0x209   : > { %v688_v63 = vpop.permute.xlu1 %687  ;;  %v718_v32 = vpop.permute.xlu0 %717 }
 0x20a   : > { %v689_v16 = vsel %vm448_vm4, %v686_v41, %v688_v63  ;;  %v690_v1 = vsel %vm448_vm4, %v688_v63, %v686_v41 }
 0x20b   : > { %v699_v10 = vmul.f32 %v5069_v58, %v690_v1  ;;  %v700_v11 = vmul.f32 %v5072_v59, %v689_v16 }
 0x20d   : > { %v704_v12 = vpop.permute.xlu1 %703  ;;  %v768_v13 = vpack.c.bf16 %v700_v11, %v684_v9  ;;  %v767_v25 = vpack.c.bf16 %v699_v10, %v683_v5  ;;  %v734_v41 = vpop.permute.xlu0 %733 }
 0x20e   : > { %v705_v33 = vsel %vm461_vm7, %v702_v60, %v704_v12  ;;  %v706_v17 = vsel %vm461_vm7, %v704_v12, %v702_v60 }
 0x20f   : > { %v715_v23 = vmul.f32 %v5080_v0, %v705_v33  ;;  %v716_v24 = vmul.f32 %v5084_v15, %v706_v17  ;;  %794 = vmatprep.subr.bf16.mxu1 %v768_v13  ;;  %v4406_v13 = vld [vmem:[%s7136_s4 + $0x8] sm:$0xff] }
 0x210   : > { %795 = vmatpush1.bf16.msra.mxu1 %v767_v25 }
 0x211   : > { %v720_v27 = vpop.permute.xlu1 %719  ;;  %v770_v28 = vpack.c.bf16 %v716_v24, %v4998_v26  ;;  %v769_v30 = vpack.c.bf16 %v715_v23, %v4992_v21  ;;  %v750_v20 = vpop.permute.xlu0 %749 }
 0x212   : > { %v721_v42 = vsel %vm479_vm9, %v718_v32, %v720_v27  ;;  %v722_v21 = vsel %vm479_vm9, %v720_v27, %v718_v32 }
 0x213   : > { %796 = vmatprep.subr.bf16.mxu1 %v770_v28  ;;  %v731_v19 = vmul.f32 %v5105_v31, %v721_v42  ;;  %v732_v49 = vmul.f32 %v5108_v34, %v722_v21 }
 0x214   : > { %797 = vmatpush1.bf16.msra.mxu1 %v769_v30 }
 0x215   : > { %v736_v26 = vpop.permute.xlu1 %735 }
 0x216   : > { %v737_v46 = vsel %vm497_vm11, %v734_v41, %v736_v26  ;;  %v738_v48 = vsel %vm497_vm11, %v736_v26, %v734_v41 }
 0x217   : > { %v747_v4 = vmul.f32 %v5111_v39, %v737_v46  ;;  %v748_v44 = vmul.f32 %v5114_v40, %v738_v48 }
 0x219   : > { %v752_v50 = vpop.permute.xlu1 %751  ;;  %v772_v51 = vpack.c.bf16 %v748_v44, %v732_v49  ;;  %v771_v29 = vpack.c.bf16 %v747_v4, %v731_v19 }
 0x21a   : > { %v753_v47 = vsel %vm510_vm13, %v750_v20, %v752_v50  ;;  %v754_v52 = vsel %vm510_vm13, %v752_v50, %v750_v20 }
 0x21b   : > { %v764_v53 = vmul.f32 %v5128_v45, %v754_v52  ;;  %798 = vmatprep.subr.bf16.mxu1 %v772_v51  ;;  %v763_v54 = vmul.f32 %v5123_v43, %v753_v47 }
 0x21c   : > { %799 = vmatpush1.bf16.msra.mxu1 %v771_v29 }
 0x21d   : > { %v774_v55 = vpack.c.bf16 %v764_v53, %v764_v53  ;;  %v773_v60 = vpack.c.bf16 %v763_v54, %v763_v54 }
 0x21f   : > { %4403 = vmatprep.subr.msk.bf16.mxu1 %vm563_vm8, %v774_v55  ;;  %v787_v61 = vsel %vm563_vm8, %v773_v60, 0 }
 0x220   : > { %801 = vmatpush1.bf16.msra.mxu1 %v787_v61 }
 0x222   : > { %v780_v63 = vpop.permute.xlu0 %779 }
 0x223   : > { %4404 = vmatmul.mubr.msk.bf16.vlgmr.msra.gmra.mrb[0].mxu1 %vm782_vm3, %v775_v62 }
 0x224   : > { %1098 = vmatprep.mubr.bf16.mxu1 %v4733_v8 }
 0x2f6   : > { %v826_v16 = vpop.f32.mrb[0].mxu1 }
 0x2f7   : > { %v827_v1 = vadd.f32 %v826_v16, %v780_v63  ;;  %v828_v5 = vpop.f32.mrb[1].mxu1 }
 0x2f8   : > { %v829_v9 = vadd.f32 %v828_v5, %v780_v63  ;;  %v830_v10 = vpop.f32.mrb[2].mxu1 }
 0x2f9   : > { %v5151_v11 = vmax.f32 %v827_v1, 0.0  ;;  %v831_v32 = vpop.f32.mrb[3].mxu1 }
 0x2fa   : > { %v5153_v12 = vmax.f32 %v829_v9, 0.0 }
 0x2fb   : > { %837 = vrot.lane.b32.xlu1 %v5151_v11, %s4728_s26 }
 0x2fc   : > { %839 = vrot.lane.b32.xlu0 %v5153_v12, %s4728_s26 }
 0x2ff   : > { %845 = vrot.lane.b32.xlu1 %v5151_v11, %s4727_s25 }
 0x300   : > { %847 = vrot.lane.b32.xlu0 %v5153_v12, %s4727_s25 }
 0x303   : > { %853 = vrot.lane.b32.xlu1 %v5151_v11, %s4726_s24 }
 0x304   : > { %855 = vrot.lane.b32.xlu0 %v5153_v12, %s4726_s24 }
 0x307   : > { %861 = vrot.lane.b32.xlu1 %v5151_v11, %s4729_s27 }
 0x308   : > { %863 = vrot.lane.b32.xlu0 %v5153_v12, %s4729_s27 }
 0x30b   : > { %869 = vrot.lane.b32.xlu1 %v5151_v11, %s4730_s28 }
 0x30c   : > { %871 = vrot.lane.b32.xlu0 %v5153_v12, %s4730_s28 }
 0x30f   : > { %877 = vrot.lane.b32.xlu1 %v5151_v11, %s4731_s29 }
 0x310   : > { %879 = vrot.lane.b32.xlu0 %v5153_v12, %s4731_s29 }
 0x313   : > { %885 = vrot.lane.b32.xlu1 %v5151_v11, %s4732_s30 }
 0x314   : > { %887 = vrot.lane.b32.xlu0 %v5153_v12, %s4732_s30 }
 0x317   : > { %893 = vrot.lane.b32.xlu1 %v5151_v11, %s4734_s12 }
 0x318   : > { %895 = vrot.lane.b32.xlu0 %v5153_v12, %s4734_s12 }
 0x31b   : > { %917 = vperm.xlu1 %4716, %v4406_v13  }
 0x36d   : > { %v838_v25 = vpop.permute.xlu1 %837 }
 0x36e   : > { %v840_v33 = vpop.permute.xlu0 %839 }
 0x36f   : > { %v841_v17 = vsel %vm403_vm2, %v838_v25, %v840_v33  ;;  %v842_v18 = vsel %vm403_vm2, %v840_v33, %v838_v25 }
 0x370   : > { %v843_v28 = vmul.f32 %v842_v18, %v5033_v35  ;;  %v844_v30 = vmul.f32 %v841_v17, %v5037_v36 }
 0x371   : > { %v846_v22 = vpop.permute.xlu1 %845 }
 0x372   : > { %v848_v23 = vpop.permute.xlu0 %847 }
 0x373   : > { %v849_v24 = vsel %vm415_vm0, %v846_v22, %v848_v23  ;;  %v850_v27 = vsel %vm415_vm0, %v848_v23, %v846_v22 }
 0x374   : > { %v851_v41 = vmul.f32 %v850_v27, %v5041_v37  ;;  %v852_v42 = vmul.f32 %v849_v24, %v5045_v38 }
 0x375   : > { %v854_v21 = vpop.permute.xlu1 %853 }
 0x376   : > { %v901_v26 = vpack.c.bf16 %v851_v41, %v843_v28  ;;  %v856_v46 = vpop.permute.xlu0 %855  ;;  %v902_v48 = vpack.c.bf16 %v852_v42, %v844_v30 }
 0x377   : > { %v857_v19 = vsel %vm430_vm1, %v854_v21, %v856_v46  ;;  %v858_v49 = vsel %vm430_vm1, %v856_v46, %v854_v21 }
 0x378   : > { %929 = vmatprep.subr.bf16.mxu0 %v902_v48  ;;  %v859_v51 = vmul.f32 %v858_v49, %v5063_v56  ;;  %v860_v29 = vmul.f32 %v857_v19, %v5066_v57 }
 0x379   : > { %930 = vmatpush1.bf16.msra.mxu0 %v901_v26  ;;  %v862_v4 = vpop.permute.xlu1 %861 }
 0x37a   : > { %v864_v44 = vpop.permute.xlu0 %863 }
 0x37b   : > { %v865_v20 = vsel %vm448_vm4, %v862_v4, %v864_v44  ;;  %v866_v50 = vsel %vm448_vm4, %v864_v44, %v862_v4  ;;  %v4405_v44 = vld [vmem:[%s7135_s3 + $0x4] sm:$0xf] }
 0x37c   : > { %v867_v47 = vmul.f32 %v866_v50, %v5069_v58  ;;  %v868_v52 = vmul.f32 %v865_v20, %v5072_v59 }
 0x37d   : > { %v870_v53 = vpop.permute.xlu1 %869 }
 0x37e   : > { %v903_v54 = vpack.c.bf16 %v867_v47, %v859_v51  ;;  %v872_v55 = vpop.permute.xlu0 %871  ;;  %v904_v60 = vpack.c.bf16 %v868_v52, %v860_v29 }
 0x37f   : > { %v873_v61 = vsel %vm461_vm7, %v870_v53, %v872_v55  ;;  %v874_v62 = vsel %vm461_vm7, %v872_v55, %v870_v53 }
 0x380   : > { %v875_v63 = vmul.f32 %v873_v61, %v5080_v0  ;;  %v876_v16 = vmul.f32 %v874_v62, %v5084_v15  ;;  %931 = vmatprep.subr.bf16.mxu0 %v904_v60  ;;  %v4410_v60 = vld [vmem:[%s7136_s4 + $0x10] sm:$0xff] }
 0x381   : > { %932 = vmatpush1.bf16.msra.mxu0 %v903_v54  ;;  %v878_v1 = vpop.permute.xlu1 %877 }
 0x382   : > { %v905_v5 = vpack.c.bf16 %v875_v63, %v5151_v11  ;;  %v880_v9 = vpop.permute.xlu0 %879  ;;  %v906_v10 = vpack.c.bf16 %v876_v16, %v5153_v12 }
 0x383   : > { %v881_v32 = vsel %vm479_vm9, %v878_v1, %v880_v9  ;;  %v882_v13 = vsel %vm479_vm9, %v880_v9, %v878_v1 }
 0x384   : > { %933 = vmatprep.subr.bf16.mxu0 %v906_v10  ;;  %v883_v22 = vmul.f32 %v881_v32, %v5105_v31  ;;  %v884_v23 = vmul.f32 %v882_v13, %v5108_v34 }
 0x385   : > { %934 = vmatpush1.bf16.msra.mxu0 %v905_v5  ;;  %v886_v25 = vpop.permute.xlu1 %885 }
 0x386   : > { %v888_v33 = vpop.permute.xlu0 %887 }
 0x387   : > { %v889_v17 = vsel %vm497_vm11, %v886_v25, %v888_v33  ;;  %v890_v18 = vsel %vm497_vm11, %v888_v33, %v886_v25 }
 0x388   : > { %v891_v24 = vmul.f32 %v889_v17, %v5111_v39  ;;  %v892_v27 = vmul.f32 %v890_v18, %v5114_v40 }
 0x389   : > { %v894_v28 = vpop.permute.xlu1 %893 }
 0x38a   : > { %v907_v30 = vpack.c.bf16 %v891_v24, %v883_v22  ;;  %v896_v41 = vpop.permute.xlu0 %895  ;;  %v908_v42 = vpack.c.bf16 %v892_v27, %v884_v23 }
 0x38b   : > { %v897_v21 = vsel %vm510_vm13, %v894_v28, %v896_v41  ;;  %v898_v26 = vsel %vm510_vm13, %v896_v41, %v894_v28 }
 0x38c   : > { %v899_v46 = vmul.f32 %v897_v21, %v5123_v43  ;;  %v900_v48 = vmul.f32 %v898_v26, %v5128_v45  ;;  %935 = vmatprep.subr.bf16.mxu0 %v908_v42 }
 0x38d   : > { %936 = vmatpush1.bf16.msra.mxu0 %v907_v30 }
 0x38e   : > { %v909_v19 = vpack.c.bf16 %v899_v46, %v899_v46  ;;  %v910_v49 = vpack.c.bf16 %v900_v48, %v900_v48 }
 0x390   : > { %4407 = vmatprep.subr.msk.bf16.mxu0 %vm563_vm8, %v910_v49  ;;  %v924_v4 = vsel %vm563_vm8, %v909_v19, 0 }
 0x391   : > { %938 = vmatpush1.bf16.msra.mxu0 %v924_v4 }
 0x394   : > { %4408 = vmatmul.mubr.msk.bf16.vlgmr.msra.gmra.mrb[4].mxu0 %vm782_vm3, %v4405_v44 }
 0x395   : > { %1235 = vmatprep.mubr.bf16.mxu0 %v4733_v8 }
 0x39a   : > { %v918_v20 = vpop.permute.xlu1 %917 }
 0x467   : > { %v963_v50 = vpop.f32.mrb[4].mxu0 }
 0x468   : > { %v964_v51 = vadd.f32 %v963_v50, %v918_v20  ;;  %v965_v29 = vpop.f32.mrb[5].mxu0 }
 0x469   : > { %v966_v47 = vadd.f32 %v965_v29, %v918_v20  ;;  %v967_v52 = vpop.f32.mrb[6].mxu0 }
 0x46a   : > { %v5247_v53 = vmax.f32 %v964_v51, 0.0  ;;  %v968_v54 = vpop.f32.mrb[7].mxu0 }
 0x46b   : > { %v5249_v55 = vmax.f32 %v966_v47, 0.0 }
 0x46c   : > { %974 = vrot.lane.b32.xlu0 %v5247_v53, %s4728_s26 }
 0x46d   : > { %976 = vrot.lane.b32.xlu1 %v5249_v55, %s4728_s26 }
 0x470   : > { %982 = vrot.lane.b32.xlu0 %v5247_v53, %s4727_s25 }
 0x471   : > { %984 = vrot.lane.b32.xlu1 %v5249_v55, %s4727_s25 }
 0x474   : > { %990 = vrot.lane.b32.xlu0 %v5247_v53, %s4726_s24 }
 0x475   : > { %992 = vrot.lane.b32.xlu1 %v5249_v55, %s4726_s24 }
 0x478   : > { %998 = vrot.lane.b32.xlu0 %v5247_v53, %s4729_s27 }
 0x479   : > { %1000 = vrot.lane.b32.xlu1 %v5249_v55, %s4729_s27 }
 0x47c   : > { %1006 = vrot.lane.b32.xlu0 %v5247_v53, %s4730_s28 }
 0x47d   : > { %1008 = vrot.lane.b32.xlu1 %v5249_v55, %s4730_s28 }
 0x480   : > { %1014 = vrot.lane.b32.xlu0 %v5247_v53, %s4731_s29 }
 0x481   : > { %1016 = vrot.lane.b32.xlu1 %v5249_v55, %s4731_s29 }
 0x484   : > { %1022 = vrot.lane.b32.xlu0 %v5247_v53, %s4732_s30 }
 0x485   : > { %1024 = vrot.lane.b32.xlu1 %v5249_v55, %s4732_s30 }
 0x488   : > { %1030 = vrot.lane.b32.xlu0 %v5247_v53, %s4734_s12 }
 0x489   : > { %1032 = vrot.lane.b32.xlu1 %v5249_v55, %s4734_s12 }
 0x48c   : > { %1054 = vperm.xlu0 %4715, %v4410_v60  }
 0x4de   : > { %v975_v61 = vpop.permute.xlu0 %974 }
 0x4df   : > { %v977_v62 = vpop.permute.xlu1 %976 }
 0x4e0   : > { %v978_v63 = vsel %vm403_vm2, %v975_v61, %v977_v62  ;;  %v979_v16 = vsel %vm403_vm2, %v977_v62, %v975_v61 }
 0x4e1   : > { %v980_v32 = vmul.f32 %v979_v16, %v5033_v35  ;;  %v981_v13 = vmul.f32 %v978_v63, %v5037_v36 }
 0x4e2   : > { %v983_v1 = vpop.permute.xlu0 %982 }
 0x4e3   : > { %v985_v5 = vpop.permute.xlu1 %984 }
 0x4e4   : > { %v986_v9 = vsel %vm415_vm0, %v983_v1, %v985_v5  ;;  %v987_v10 = vsel %vm415_vm0, %v985_v5, %v983_v1 }
 0x4e5   : > { %v988_v25 = vmul.f32 %v987_v10, %v5041_v37  ;;  %v989_v33 = vmul.f32 %v986_v9, %v5045_v38 }
 0x4e6   : > { %v991_v17 = vpop.permute.xlu0 %990 }
 0x4e7   : > { %v1038_v18 = vpack.c.bf16 %v988_v25, %v980_v32  ;;  %v993_v22 = vpop.permute.xlu1 %992  ;;  %v1039_v23 = vpack.c.bf16 %v989_v33, %v981_v13 }
 0x4e8   : > { %v994_v24 = vsel %vm430_vm1, %v991_v17, %v993_v22  ;;  %v995_v27 = vsel %vm430_vm1, %v993_v22, %v991_v17 }
 0x4e9   : > { %1066 = vmatprep.subr.bf16.mxu1 %v1039_v23  ;;  %v996_v21 = vmul.f32 %v995_v27, %v5063_v56  ;;  %v997_v26 = vmul.f32 %v994_v24, %v5066_v57 }
 0x4ea   : > { %1067 = vmatpush1.bf16.msra.mxu1 %v1038_v18  ;;  %v999_v28 = vpop.permute.xlu0 %998 }
 0x4eb   : > { %v1001_v30 = vpop.permute.xlu1 %1000 }
 0x4ec   : > { %v1002_v41 = vsel %vm448_vm4, %v999_v28, %v1001_v30  ;;  %v1003_v42 = vsel %vm448_vm4, %v1001_v30, %v999_v28 }
 0x4ed   : > { %v1004_v46 = vmul.f32 %v1003_v42, %v5069_v58  ;;  %v1005_v48 = vmul.f32 %v1002_v41, %v5072_v59  ;;  %v4409_v42 = vld [vmem:[%s7135_s3 + $0x8] sm:$0xf] }
 0x4ee   : > { %v1007_v19 = vpop.permute.xlu0 %1006 }
 0x4ef   : > { %v1040_v49 = vpack.c.bf16 %v1004_v46, %v996_v21  ;;  %v1009_v4 = vpop.permute.xlu1 %1008  ;;  %v1041_v44 = vpack.c.bf16 %v1005_v48, %v997_v26 }
 0x4f0   : > { %v1010_v20 = vsel %vm461_vm7, %v1007_v19, %v1009_v4  ;;  %v1011_v50 = vsel %vm461_vm7, %v1009_v4, %v1007_v19 }
 0x4f1   : > { %v1012_v51 = vmul.f32 %v1010_v20, %v5080_v0  ;;  %v1013_v29 = vmul.f32 %v1011_v50, %v5084_v15  ;;  %1068 = vmatprep.subr.bf16.mxu1 %v1041_v44  ;;  %v4414_v50 = vld [vmem:[%s7136_s4 + $0x18] sm:$0xff] }
 0x4f2   : > { %1069 = vmatpush1.bf16.msra.mxu1 %v1040_v49  ;;  %v1015_v47 = vpop.permute.xlu0 %1014 }
 0x4f3   : > { %v1042_v52 = vpack.c.bf16 %v1012_v51, %v5247_v53  ;;  %v1017_v54 = vpop.permute.xlu1 %1016  ;;  %v1043_v60 = vpack.c.bf16 %v1013_v29, %v5249_v55 }
 0x4f4   : > { %v1018_v61 = vsel %vm479_vm9, %v1015_v47, %v1017_v54  ;;  %v1019_v62 = vsel %vm479_vm9, %v1017_v54, %v1015_v47 }
 0x4f5   : > { %1070 = vmatprep.subr.bf16.mxu1 %v1043_v60  ;;  %v1020_v9 = vmul.f32 %v1018_v61, %v5105_v31  ;;  %v1021_v10 = vmul.f32 %v1019_v62, %v5108_v34 }
 0x4f6   : > { %1071 = vmatpush1.bf16.msra.mxu1 %v1042_v52  ;;  %v1023_v63 = vpop.permute.xlu0 %1022 }
 0x4f7   : > { %v1025_v16 = vpop.permute.xlu1 %1024 }
 0x4f8   : > { %v1026_v1 = vsel %vm497_vm11, %v1023_v63, %v1025_v16  ;;  %v1027_v5 = vsel %vm497_vm11, %v1025_v16, %v1023_v63 }
 0x4f9   : > { %v1028_v32 = vmul.f32 %v1026_v1, %v5111_v39  ;;  %v1029_v13 = vmul.f32 %v1027_v5, %v5114_v40 }
 0x4fa   : > { %v1031_v25 = vpop.permute.xlu0 %1030 }
 0x4fb   : > { %v1044_v33 = vpack.c.bf16 %v1028_v32, %v1020_v9  ;;  %v1033_v17 = vpop.permute.xlu1 %1032  ;;  %v1045_v18 = vpack.c.bf16 %v1029_v13, %v1021_v10 }
 0x4fc   : > { %v1034_v22 = vsel %vm510_vm13, %v1031_v25, %v1033_v17  ;;  %v1035_v23 = vsel %vm510_vm13, %v1033_v17, %v1031_v25 }
 0x4fd   : > { %v1036_v24 = vmul.f32 %v1034_v22, %v5123_v43  ;;  %v1037_v27 = vmul.f32 %v1035_v23, %v5128_v45  ;;  %1072 = vmatprep.subr.bf16.mxu1 %v1045_v18 }
 0x4fe   : > { %1073 = vmatpush1.bf16.msra.mxu1 %v1044_v33 }
 0x4ff   : > { %v1046_v28 = vpack.c.bf16 %v1036_v24, %v1036_v24  ;;  %v1047_v30 = vpack.c.bf16 %v1037_v27, %v1037_v27 }
 0x501   : > { %4411 = vmatprep.subr.msk.bf16.mxu1 %vm563_vm8, %v1047_v30  ;;  %v1061_v41 = vsel %vm563_vm8, %v1046_v28, 0 }
 0x502   : > { %1075 = vmatpush1.bf16.msra.mxu1 %v1061_v41 }
 0x505   : > { %4412 = vmatmul.mubr.msk.bf16.vlgmr.msra.gmra.mrb[4].mxu1 %vm782_vm3, %v4409_v42 }
 0x506   : > { %1372 = vmatprep.mubr.bf16.mxu1 %v4733_v8 }
 0x50b   : > { %v1055_v21 = vpop.permute.xlu0 %1054 }
 0x5d8   : > { %v1100_v26 = vpop.f32.mrb[4].mxu1 }
 0x5d9   : > { %v1101_v46 = vadd.f32 %v1100_v26, %v1055_v21  ;;  %v1102_v48 = vpop.f32.mrb[5].mxu1 }
 0x5da   : > { %v1103_v19 = vadd.f32 %v1102_v48, %v1055_v21  ;;  %v1104_v49 = vpop.f32.mrb[6].mxu1 }
 0x5db   : > { %v5343_v4 = vmax.f32 %v1101_v46, 0.0  ;;  %v1105_v44 = vpop.f32.mrb[7].mxu1 }
 0x5dc   : > { %v5345_v20 = vmax.f32 %v1103_v19, 0.0 }
 0x5dd   : > { %1111 = vrot.lane.b32.xlu1 %v5343_v4, %s4728_s26 }
 0x5de   : > { %1113 = vrot.lane.b32.xlu0 %v5345_v20, %s4728_s26 }
 0x5e1   : > { %1119 = vrot.lane.b32.xlu1 %v5343_v4, %s4727_s25 }
 0x5e2   : > { %1121 = vrot.lane.b32.xlu0 %v5345_v20, %s4727_s25 }
 0x5e5   : > { %1127 = vrot.lane.b32.xlu1 %v5343_v4, %s4726_s24 }
 0x5e6   : > { %1129 = vrot.lane.b32.xlu0 %v5345_v20, %s4726_s24 }
 0x5e9   : > { %1135 = vrot.lane.b32.xlu1 %v5343_v4, %s4729_s27 }
 0x5ea   : > { %1137 = vrot.lane.b32.xlu0 %v5345_v20, %s4729_s27 }
 0x5ed   : > { %1143 = vrot.lane.b32.xlu1 %v5343_v4, %s4730_s28 }
 0x5ee   : > { %1145 = vrot.lane.b32.xlu0 %v5345_v20, %s4730_s28 }
 0x5f1   : > { %1151 = vrot.lane.b32.xlu1 %v5343_v4, %s4731_s29 }
 0x5f2   : > { %1153 = vrot.lane.b32.xlu0 %v5345_v20, %s4731_s29 }
 0x5f5   : > { %1159 = vrot.lane.b32.xlu1 %v5343_v4, %s4732_s30 }
 0x5f6   : > { %1161 = vrot.lane.b32.xlu0 %v5345_v20, %s4732_s30 }
 0x5f9   : > { %1167 = vrot.lane.b32.xlu1 %v5343_v4, %s4734_s12 }
 0x5fa   : > { %1169 = vrot.lane.b32.xlu0 %v5345_v20, %s4734_s12 }
 0x5fd   : > { %1191 = vperm.xlu1 %4716, %v4414_v50  }
 0x64f   : > { %v1112_v51 = vpop.permute.xlu1 %1111 }
 0x650   : > { %v1114_v29 = vpop.permute.xlu0 %1113 }
 0x651   : > { %v1115_v47 = vsel %vm403_vm2, %v1112_v51, %v1114_v29  ;;  %v1116_v52 = vsel %vm403_vm2, %v1114_v29, %v1112_v51 }
 0x652   : > { %v1117_v63 = vmul.f32 %v1116_v52, %v5033_v35  ;;  %v1118_v16 = vmul.f32 %v1115_v47, %v5037_v36 }
 0x653   : > { %v1120_v54 = vpop.permute.xlu1 %1119 }
 0x654   : > { %v1122_v60 = vpop.permute.xlu0 %1121 }
 0x655   : > { %v1123_v61 = vsel %vm415_vm0, %v1120_v54, %v1122_v60  ;;  %v1124_v62 = vsel %vm415_vm0, %v1122_v60, %v1120_v54 }
 0x656   : > { %v1125_v1 = vmul.f32 %v1124_v62, %v5041_v37  ;;  %v1126_v5 = vmul.f32 %v1123_v61, %v5045_v38 }
 0x657   : > { %v1128_v9 = vpop.permute.xlu1 %1127 }
 0x658   : > { %v1175_v10 = vpack.c.bf16 %v1125_v1, %v1117_v63  ;;  %v1130_v32 = vpop.permute.xlu0 %1129  ;;  %v1176_v13 = vpack.c.bf16 %v1126_v5, %v1118_v16 }
 0x659   : > { %v1131_v25 = vsel %vm430_vm1, %v1128_v9, %v1130_v32  ;;  %v1132_v33 = vsel %vm430_vm1, %v1130_v32, %v1128_v9 }
 0x65a   : > { %1203 = vmatprep.subr.bf16.mxu0 %v1176_v13  ;;  %v1133_v24 = vmul.f32 %v1132_v33, %v5063_v56  ;;  %v1134_v27 = vmul.f32 %v1131_v25, %v5066_v57 }
 0x65b   : > { %1204 = vmatpush1.bf16.msra.mxu0 %v1175_v10  ;;  %v1136_v17 = vpop.permute.xlu1 %1135 }
 0x65c   : > { %v1138_v18 = vpop.permute.xlu0 %1137 }
 0x65d   : > { %v1139_v22 = vsel %vm448_vm4, %v1136_v17, %v1138_v18  ;;  %v1140_v23 = vsel %vm448_vm4, %v1138_v18, %v1136_v17 }
 0x65e   : > { %v1141_v28 = vmul.f32 %v1140_v23, %v5069_v58  ;;  %v1142_v30 = vmul.f32 %v1139_v22, %v5072_v59 }
 0x65f   : > { %v1144_v41 = vpop.permute.xlu1 %1143 }
 0x660   : > { %v1177_v42 = vpack.c.bf16 %v1141_v28, %v1133_v24  ;;  %v1146_v21 = vpop.permute.xlu0 %1145  ;;  %v1178_v26 = vpack.c.bf16 %v1142_v30, %v1134_v27  ;;  %v4413_v27 = vld [vmem:[%s7135_s3 + $0xc] sm:$0xf] }
 0x661   : > { %v1147_v46 = vsel %vm461_vm7, %v1144_v41, %v1146_v21  ;;  %v1148_v48 = vsel %vm461_vm7, %v1146_v21, %v1144_v41 }
 0x662   : > { %v1149_v19 = vmul.f32 %v1147_v46, %v5080_v0  ;;  %v1150_v49 = vmul.f32 %v1148_v48, %v5084_v15  ;;  %1205 = vmatprep.subr.bf16.mxu0 %v1178_v26 }
 0x663   : > { %1206 = vmatpush1.bf16.msra.mxu0 %v1177_v42  ;;  %v1152_v44 = vpop.permute.xlu1 %1151 }
 0x664   : > { %v1179_v50 = vpack.c.bf16 %v1149_v19, %v5343_v4  ;;  %v1154_v51 = vpop.permute.xlu0 %1153  ;;  %v1180_v29 = vpack.c.bf16 %v1150_v49, %v5345_v20  ;;  %v4418_v49 = vld [vmem:[%s7136_s4 + $0x20] sm:$0xff] }
 0x665   : > { %v1155_v47 = vsel %vm479_vm9, %v1152_v44, %v1154_v51  ;;  %v1156_v52 = vsel %vm479_vm9, %v1154_v51, %v1152_v44 }
 0x666   : > { %1207 = vmatprep.subr.bf16.mxu0 %v1180_v29  ;;  %v1157_v63 = vmul.f32 %v1155_v47, %v5105_v31  ;;  %v1158_v16 = vmul.f32 %v1156_v52, %v5108_v34 }
 0x667   : > { %1208 = vmatpush1.bf16.msra.mxu0 %v1179_v50  ;;  %v1160_v54 = vpop.permute.xlu1 %1159 }
 0x668   : > { %v1162_v60 = vpop.permute.xlu0 %1161 }
 0x669   : > { %v1163_v61 = vsel %vm497_vm11, %v1160_v54, %v1162_v60  ;;  %v1164_v62 = vsel %vm497_vm11, %v1162_v60, %v1160_v54 }
 0x66a   : > { %v1165_v1 = vmul.f32 %v1163_v61, %v5111_v39  ;;  %v1166_v5 = vmul.f32 %v1164_v62, %v5114_v40 }
 0x66b   : > { %v1168_v9 = vpop.permute.xlu1 %1167 }
 0x66c   : > { %v1181_v10 = vpack.c.bf16 %v1165_v1, %v1157_v63  ;;  %v1170_v32 = vpop.permute.xlu0 %1169  ;;  %v1182_v13 = vpack.c.bf16 %v1166_v5, %v1158_v16 }
 0x66d   : > { %v1171_v25 = vsel %vm510_vm13, %v1168_v9, %v1170_v32  ;;  %v1172_v33 = vsel %vm510_vm13, %v1170_v32, %v1168_v9 }
 0x66e   : > { %v1173_v17 = vmul.f32 %v1171_v25, %v5123_v43  ;;  %v1174_v18 = vmul.f32 %v1172_v33, %v5128_v45  ;;  %1209 = vmatprep.subr.bf16.mxu0 %v1182_v13 }
 0x66f   : > { %1210 = vmatpush1.bf16.msra.mxu0 %v1181_v10 }
 0x670   : > { %v1183_v22 = vpack.c.bf16 %v1173_v17, %v1173_v17  ;;  %v1184_v23 = vpack.c.bf16 %v1174_v18, %v1174_v18 }
 0x672   : > { %4415 = vmatprep.subr.msk.bf16.mxu0 %vm563_vm8, %v1184_v23  ;;  %v1198_v24 = vsel %vm563_vm8, %v1183_v22, 0 }
 0x673   : > { %1212 = vmatpush1.bf16.msra.mxu0 %v1198_v24 }
 0x676   : > { %4416 = vmatmul.mubr.msk.bf16.vlgmr.msra.gmra.mrb[8].mxu0 %vm782_vm3, %v4413_v27 }
 0x677   : > { %1509 = vmatprep.mubr.bf16.mxu0 %v4733_v8 }
 0x67c   : > { %v1192_v28 = vpop.permute.xlu1 %1191 }
 0x749   : > { %v1237_v30 = vpop.f32.mrb[8].mxu0 }
 0x74a   : > { %v1238_v41 = vadd.f32 %v1237_v30, %v1192_v28  ;;  %v1239_v42 = vpop.f32.mrb[9].mxu0 }
 0x74b   : > { %v1240_v21 = vadd.f32 %v1239_v42, %v1192_v28  ;;  %v1241_v26 = vpop.f32.mrb[10].mxu0 }
 0x74c   : > { %v5439_v46 = vmax.f32 %v1238_v41, 0.0  ;;  %v1242_v48 = vpop.f32.mrb[11].mxu0 }
 0x74d   : > { %v5441_v19 = vmax.f32 %v1240_v21, 0.0 }
 0x74e   : > { %1248 = vrot.lane.b32.xlu0 %v5439_v46, %s4728_s26 }
 0x74f   : > { %1250 = vrot.lane.b32.xlu1 %v5441_v19, %s4728_s26 }
 0x752   : > { %1256 = vrot.lane.b32.xlu0 %v5439_v46, %s4727_s25 }
 0x753   : > { %1258 = vrot.lane.b32.xlu1 %v5441_v19, %s4727_s25 }
 0x756   : > { %1264 = vrot.lane.b32.xlu0 %v5439_v46, %s4726_s24 }
 0x757   : > { %1266 = vrot.lane.b32.xlu1 %v5441_v19, %s4726_s24 }
 0x75a   : > { %1272 = vrot.lane.b32.xlu0 %v5439_v46, %s4729_s27 }
 0x75b   : > { %1274 = vrot.lane.b32.xlu1 %v5441_v19, %s4729_s27 }
 0x75e   : > { %1280 = vrot.lane.b32.xlu0 %v5439_v46, %s4730_s28 }
 0x75f   : > { %1282 = vrot.lane.b32.xlu1 %v5441_v19, %s4730_s28 }
 0x762   : > { %1288 = vrot.lane.b32.xlu0 %v5439_v46, %s4731_s29 }
 0x763   : > { %1290 = vrot.lane.b32.xlu1 %v5441_v19, %s4731_s29 }
 0x766   : > { %1296 = vrot.lane.b32.xlu0 %v5439_v46, %s4732_s30 }
 0x767   : > { %1298 = vrot.lane.b32.xlu1 %v5441_v19, %s4732_s30 }
 0x76a   : > { %1304 = vrot.lane.b32.xlu0 %v5439_v46, %s4734_s12 }
 0x76b   : > { %1306 = vrot.lane.b32.xlu1 %v5441_v19, %s4734_s12 }
 0x76e   : > { %1328 = vperm.xlu0 %4715, %v4418_v49  }
 0x7c0   : > { %v1249_v44 = vpop.permute.xlu0 %1248 }
 0x7c1   : > { %v1251_v50 = vpop.permute.xlu1 %1250 }
 0x7c2   : > { %v1252_v51 = vsel %vm403_vm2, %v1249_v44, %v1251_v50  ;;  %v1253_v29 = vsel %vm403_vm2, %v1251_v50, %v1249_v44 }
 0x7c3   : > { %v1254_v61 = vmul.f32 %v1253_v29, %v5033_v35  ;;  %v1255_v62 = vmul.f32 %v1252_v51, %v5037_v36 }
 0x7c4   : > { %v1257_v47 = vpop.permute.xlu0 %1256 }
 0x7c5   : > { %v1259_v52 = vpop.permute.xlu1 %1258 }
 0x7c6   : > { %v1260_v54 = vsel %vm415_vm0, %v1257_v47, %v1259_v52  ;;  %v1261_v60 = vsel %vm415_vm0, %v1259_v52, %v1257_v47 }
 0x7c7   : > { %v1262_v63 = vmul.f32 %v1261_v60, %v5041_v37  ;;  %v1263_v16 = vmul.f32 %v1260_v54, %v5045_v38 }
 0x7c8   : > { %v1265_v1 = vpop.permute.xlu0 %1264 }
 0x7c9   : > { %v1312_v5 = vpack.c.bf16 %v1262_v63, %v1254_v61  ;;  %v1267_v9 = vpop.permute.xlu1 %1266  ;;  %v1313_v10 = vpack.c.bf16 %v1263_v16, %v1255_v62 }
 0x7ca   : > { %v1268_v32 = vsel %vm430_vm1, %v1265_v1, %v1267_v9  ;;  %v1269_v13 = vsel %vm430_vm1, %v1267_v9, %v1265_v1 }
 0x7cb   : > { %1340 = vmatprep.subr.bf16.mxu1 %v1313_v10  ;;  %v1270_v22 = vmul.f32 %v1269_v13, %v5063_v56  ;;  %v1271_v23 = vmul.f32 %v1268_v32, %v5066_v57 }
 0x7cc   : > { %1341 = vmatpush1.bf16.msra.mxu1 %v1312_v5  ;;  %v1273_v25 = vpop.permute.xlu0 %1272 }
 0x7cd   : > { %v1275_v33 = vpop.permute.xlu1 %1274 }
 0x7ce   : > { %v1276_v17 = vsel %vm448_vm4, %v1273_v25, %v1275_v33  ;;  %v1277_v18 = vsel %vm448_vm4, %v1275_v33, %v1273_v25 }
 0x7cf   : > { %v1278_v24 = vmul.f32 %v1277_v18, %v5069_v58  ;;  %v1279_v27 = vmul.f32 %v1276_v17, %v5072_v59 }
 0x7d0   : > { %v1281_v28 = vpop.permute.xlu0 %1280 }
 0x7d1   : > { %v1314_v30 = vpack.c.bf16 %v1278_v24, %v1270_v22  ;;  %v1283_v41 = vpop.permute.xlu1 %1282  ;;  %v1315_v42 = vpack.c.bf16 %v1279_v27, %v1271_v23  ;;  %v4417_v27 = vld [vmem:[%s7135_s3 + $0x10] sm:$0xf] }
 0x7d2   : > { %v1284_v21 = vsel %vm461_vm7, %v1281_v28, %v1283_v41  ;;  %v1285_v26 = vsel %vm461_vm7, %v1283_v41, %v1281_v28 }
 0x7d3   : > { %v1286_v48 = vmul.f32 %v1284_v21, %v5080_v0  ;;  %v1287_v49 = vmul.f32 %v1285_v26, %v5084_v15  ;;  %1342 = vmatprep.subr.bf16.mxu1 %v1315_v42 }
 0x7d4   : > { %1343 = vmatpush1.bf16.msra.mxu1 %v1314_v30  ;;  %v1289_v44 = vpop.permute.xlu0 %1288 }
 0x7d5   : > { %v1316_v50 = vpack.c.bf16 %v1286_v48, %v5439_v46  ;;  %v1291_v51 = vpop.permute.xlu1 %1290  ;;  %v1317_v29 = vpack.c.bf16 %v1287_v49, %v5441_v19 }
 0x7d6   : > { %v1292_v47 = vsel %vm479_vm9, %v1289_v44, %v1291_v51  ;;  %v1293_v52 = vsel %vm479_vm9, %v1291_v51, %v1289_v44 }
 0x7d7   : > { %1344 = vmatprep.subr.bf16.mxu1 %v1317_v29  ;;  %v1294_v63 = vmul.f32 %v1292_v47, %v5105_v31  ;;  %v1295_v16 = vmul.f32 %v1293_v52, %v5108_v34 }
 0x7d8   : > { %1345 = vmatpush1.bf16.msra.mxu1 %v1316_v50  ;;  %v1297_v54 = vpop.permute.xlu0 %1296  ;;  %v4422_v50 = vld [vmem:[%s7136_s4 + $0x28] sm:$0xff] }
 0x7d9   : > { %v1299_v60 = vpop.permute.xlu1 %1298 }
 0x7da   : > { %v1300_v61 = vsel %vm497_vm11, %v1297_v54, %v1299_v60  ;;  %v1301_v62 = vsel %vm497_vm11, %v1299_v60, %v1297_v54 }
 0x7db   : > { %v1302_v1 = vmul.f32 %v1300_v61, %v5111_v39  ;;  %v1303_v5 = vmul.f32 %v1301_v62, %v5114_v40 }
 0x7dc   : > { %v1305_v9 = vpop.permute.xlu0 %1304 }
 0x7dd   : > { %v1318_v10 = vpack.c.bf16 %v1302_v1, %v1294_v63  ;;  %v1307_v32 = vpop.permute.xlu1 %1306  ;;  %v1319_v13 = vpack.c.bf16 %v1303_v5, %v1295_v16 }
 0x7de   : > { %v1308_v25 = vsel %vm510_vm13, %v1305_v9, %v1307_v32  ;;  %v1309_v33 = vsel %vm510_vm13, %v1307_v32, %v1305_v9 }
 0x7df   : > { %v1310_v17 = vmul.f32 %v1308_v25, %v5123_v43  ;;  %v1311_v18 = vmul.f32 %v1309_v33, %v5128_v45  ;;  %1346 = vmatprep.subr.bf16.mxu1 %v1319_v13 }
 0x7e0   : > { %1347 = vmatpush1.bf16.msra.mxu1 %v1318_v10 }
 0x7e1   : > { %v1320_v22 = vpack.c.bf16 %v1310_v17, %v1310_v17  ;;  %v1321_v23 = vpack.c.bf16 %v1311_v18, %v1311_v18 }
 0x7e3   : > { %4419 = vmatprep.subr.msk.bf16.mxu1 %vm563_vm8, %v1321_v23  ;;  %v1335_v24 = vsel %vm563_vm8, %v1320_v22, 0 }
 0x7e4   : > { %1349 = vmatpush1.bf16.msra.mxu1 %v1335_v24 }
 0x7e7   : > { %4420 = vmatmul.mubr.msk.bf16.vlgmr.msra.gmra.mrb[8].mxu1 %vm782_vm3, %v4417_v27 }
 0x7e8   : > { %1646 = vmatprep.mubr.bf16.mxu1 %v4733_v8 }
 0x7ed   : > { %v1329_v28 = vpop.permute.xlu0 %1328 }
 0x8ba   : > { %v1374_v30 = vpop.f32.mrb[8].mxu1 }
 0x8bb   : > { %v1375_v41 = vadd.f32 %v1374_v30, %v1329_v28  ;;  %v1376_v42 = vpop.f32.mrb[9].mxu1 }
 0x8bc   : > { %v1377_v21 = vadd.f32 %v1376_v42, %v1329_v28  ;;  %v1378_v26 = vpop.f32.mrb[10].mxu1 }
 0x8bd   : > { %v5535_v48 = vmax.f32 %v1375_v41, 0.0  ;;  %v1379_v49 = vpop.f32.mrb[11].mxu1 }
 0x8be   : > { %v5537_v44 = vmax.f32 %v1377_v21, 0.0 }
 0x8bf   : > { %1385 = vrot.lane.b32.xlu1 %v5535_v48, %s4728_s26 }
 0x8c0   : > { %1387 = vrot.lane.b32.xlu0 %v5537_v44, %s4728_s26 }
 0x8c3   : > { %1393 = vrot.lane.b32.xlu1 %v5535_v48, %s4727_s25 }
 0x8c4   : > { %1395 = vrot.lane.b32.xlu0 %v5537_v44, %s4727_s25 }
 0x8c7   : > { %1401 = vrot.lane.b32.xlu1 %v5535_v48, %s4726_s24 }
 0x8c8   : > { %1403 = vrot.lane.b32.xlu0 %v5537_v44, %s4726_s24 }
 0x8cb   : > { %1409 = vrot.lane.b32.xlu1 %v5535_v48, %s4729_s27 }
 0x8cc   : > { %1411 = vrot.lane.b32.xlu0 %v5537_v44, %s4729_s27 }
 0x8cf   : > { %1417 = vrot.lane.b32.xlu1 %v5535_v48, %s4730_s28 }
 0x8d0   : > { %1419 = vrot.lane.b32.xlu0 %v5537_v44, %s4730_s28 }
 0x8d3   : > { %1425 = vrot.lane.b32.xlu1 %v5535_v48, %s4731_s29 }
 0x8d4   : > { %1427 = vrot.lane.b32.xlu0 %v5537_v44, %s4731_s29 }
 0x8d7   : > { %1433 = vrot.lane.b32.xlu1 %v5535_v48, %s4732_s30 }
 0x8d8   : > { %1435 = vrot.lane.b32.xlu0 %v5537_v44, %s4732_s30 }
 0x8db   : > { %1441 = vrot.lane.b32.xlu1 %v5535_v48, %s4734_s12 }
 0x8dc   : > { %1443 = vrot.lane.b32.xlu0 %v5537_v44, %s4734_s12 }
 0x8df   : > { %1465 = vperm.xlu1 %4716, %v4422_v50  }
 0x931   : > { %v1386_v51 = vpop.permute.xlu1 %1385 }
 0x932   : > { %v1388_v29 = vpop.permute.xlu0 %1387 }
 0x933   : > { %v1389_v47 = vsel %vm403_vm2, %v1386_v51, %v1388_v29  ;;  %v1390_v52 = vsel %vm403_vm2, %v1388_v29, %v1386_v51 }
 0x934   : > { %v1391_v63 = vmul.f32 %v1390_v52, %v5033_v35  ;;  %v1392_v16 = vmul.f32 %v1389_v47, %v5037_v36 }
 0x935   : > { %v1394_v54 = vpop.permute.xlu1 %1393 }
 0x936   : > { %v1396_v60 = vpop.permute.xlu0 %1395 }
 0x937   : > { %v1397_v61 = vsel %vm415_vm0, %v1394_v54, %v1396_v60  ;;  %v1398_v62 = vsel %vm415_vm0, %v1396_v60, %v1394_v54 }
 0x938   : > { %v1399_v1 = vmul.f32 %v1398_v62, %v5041_v37  ;;  %v1400_v5 = vmul.f32 %v1397_v61, %v5045_v38 }
 0x939   : > { %v1402_v9 = vpop.permute.xlu1 %1401 }
 0x93a   : > { %v1449_v10 = vpack.c.bf16 %v1399_v1, %v1391_v63  ;;  %v1404_v32 = vpop.permute.xlu0 %1403  ;;  %v1450_v13 = vpack.c.bf16 %v1400_v5, %v1392_v16 }
 0x93b   : > { %v1405_v25 = vsel %vm430_vm1, %v1402_v9, %v1404_v32  ;;  %v1406_v33 = vsel %vm430_vm1, %v1404_v32, %v1402_v9 }
 0x93c   : > { %1477 = vmatprep.subr.bf16.mxu0 %v1450_v13  ;;  %v1407_v24 = vmul.f32 %v1406_v33, %v5063_v56  ;;  %v1408_v27 = vmul.f32 %v1405_v25, %v5066_v57  ;;  %v973_v33 = vpack.c.bf16 %v5249_v55, %v5249_v55  ;;  %v1247_v55 = vpack.c.bf16 %v5441_v19, %v5441_v19  ;;  %v4421_v19 = vld [vmem:[%s7135_s3 + $0x14] sm:$0xf] }
 0x93d   : > { %1478 = vmatpush1.bf16.msra.mxu0 %v1449_v10  ;;  %v1410_v17 = vpop.permute.xlu1 %1409 }
 0x93e   : > { %v1412_v18 = vpop.permute.xlu0 %1411 }
 0x93f   : > { %v1413_v22 = vsel %vm448_vm4, %v1410_v17, %v1412_v18  ;;  %v1414_v23 = vsel %vm448_vm4, %v1412_v18, %v1410_v17 }
 0x940   : > { %v1415_v28 = vmul.f32 %v1414_v23, %v5069_v58  ;;  %v1416_v30 = vmul.f32 %v1413_v22, %v5072_v59 }
 0x941   : > { %v1418_v41 = vpop.permute.xlu1 %1417 }
 0x942   : > { %v1451_v42 = vpack.c.bf16 %v1415_v28, %v1407_v24  ;;  %v1420_v21 = vpop.permute.xlu0 %1419  ;;  %v1452_v26 = vpack.c.bf16 %v1416_v30, %v1408_v27  ;;  %v972_v30 = vpack.c.bf16 %v5247_v53, %v5247_v53 }
 0x943   : > { %v1421_v49 = vsel %vm461_vm7, %v1418_v41, %v1420_v21  ;;  %v1422_v50 = vsel %vm461_vm7, %v1420_v21, %v1418_v41  ;;  %v1662_v41 = vrot.slane %v973_v33, 4  ;;  %v1383_v33 = vpack.c.bf16 %v5535_v48, %v5535_v48 }
 0x944   : > { %v1423_v51 = vmul.f32 %v1421_v49, %v5080_v0  ;;  %v1424_v29 = vmul.f32 %v1422_v50, %v5084_v15  ;;  %1479 = vmatprep.subr.bf16.mxu0 %v1452_v26  ;;  %v836_v26 = vpack.c.bf16 %v5153_v12, %v5153_v12  ;;  %v1661_v50 = vrot.slane %v972_v30, 4 }
 0x945   : > { %1480 = vmatpush1.bf16.msra.mxu0 %v1451_v42  ;;  %v1426_v47 = vpop.permute.xlu1 %1425  ;;  %v835_v12 = vpack.c.bf16 %v5151_v11, %v5151_v11 }
 0x946   : > { %v1453_v52 = vpack.c.bf16 %v1423_v51, %v5535_v48  ;;  %v1428_v54 = vpop.permute.xlu0 %1427  ;;  %v1454_v60 = vpack.c.bf16 %v1424_v29, %v5537_v44  ;;  %v1246_v51 = vpack.c.bf16 %v5439_v46, %v5439_v46  ;;  %v1677_v53 = vsel %vm563_vm8, %v836_v26, %v1662_v41  ;;  %v4426_v48 = vld [vmem:[%s7136_s4 + $0x30] sm:$0xff] }
 0x947   : > { %v1429_v61 = vsel %vm479_vm9, %v1426_v47, %v1428_v54  ;;  %v1430_v62 = vsel %vm479_vm9, %v1428_v54, %v1426_v47  ;;  %v1666_v29 = vrot.slane %v1247_v55, 4  ;;  %v1110_v47 = vpack.c.bf16 %v5345_v20, %v5345_v20 }
 0x948   : > { %1481 = vmatprep.subr.bf16.mxu0 %v1454_v60  ;;  %v1431_v9 = vmul.f32 %v1429_v61, %v5105_v31  ;;  %v1432_v10 = vmul.f32 %v1430_v62, %v5108_v34  ;;  %v1665_v46 = vrot.slane %v1246_v51, 4  ;;  %v1109_v60 = vpack.c.bf16 %v5343_v4, %v5343_v4 }
 0x949   : > { %1482 = vmatpush1.bf16.msra.mxu0 %v1453_v52  ;;  %v1434_v63 = vpop.permute.xlu1 %1433  ;;  %v1673_v52 = vsel %vm563_vm8, %v835_v12, %v1661_v50  ;;  %v1685_v54 = vsel %vm563_vm8, %v1110_v47, %v1666_v29 }
 0x94a   : > { %v1436_v16 = vpop.permute.xlu0 %1435  ;;  %v1681_v61 = vsel %vm563_vm8, %v1109_v60, %v1665_v46 }
 0x94b   : > { %v1437_v1 = vsel %vm497_vm11, %v1434_v63, %v1436_v16  ;;  %v1438_v5 = vsel %vm497_vm11, %v1436_v16, %v1434_v63 }
 0x94c   : > { %v1439_v32 = vmul.f32 %v1437_v1, %v5111_v39  ;;  %v1440_v13 = vmul.f32 %v1438_v5, %v5114_v40 }
 0x94d   : > { %v1442_v25 = vpop.permute.xlu1 %1441 }
 0x94e   : > { %v1455_v17 = vpack.c.bf16 %v1439_v32, %v1431_v9  ;;  %v1444_v18 = vpop.permute.xlu0 %1443  ;;  %v1456_v22 = vpack.c.bf16 %v1440_v13, %v1432_v10  ;;  %v1384_v13 = vpack.c.bf16 %v5537_v44, %v5537_v44  ;;  %v2827_v44 = vld [vmem:[#allocation2] sm:$0x1] }
 0x94f   : > { %v1445_v23 = vsel %vm510_vm13, %v1442_v25, %v1444_v18  ;;  %v1446_v24 = vsel %vm510_vm13, %v1444_v18, %v1442_v25 }
 0x950   : > { %v1447_v27 = vmul.f32 %v1445_v23, %v5123_v43  ;;  %v1448_v28 = vmul.f32 %v1446_v24, %v5128_v45  ;;  %1483 = vmatprep.subr.bf16.mxu0 %v1456_v22 }
 0x951   : > { %1484 = vmatpush1.bf16.msra.mxu0 %v1455_v17 }
 0x952   : > { %v1457_v42 = vpack.c.bf16 %v1447_v27, %v1447_v27  ;;  %v1458_v21 = vpack.c.bf16 %v1448_v28, %v1448_v28 }
 0x954   : > { %4423 = vmatprep.subr.msk.bf16.mxu0 %vm563_vm8, %v1458_v21  ;;  %v1472_v49 = vsel %vm563_vm8, %v1457_v42, 0 }
 0x955   : > { %1486 = vmatpush1.bf16.msra.mxu0 %v1472_v49 }
 0x956   : > { %1712 = vmatprep.subr.bf16.mxu0 %v1677_v53 }
 0x958   : > { %4424 = vmatmul.mubr.msk.bf16.vlgmr.msra.gmra.mrb[12].mxu0 %vm782_vm3, %v4421_v19 }
 0x959   : > { %1713 = vmatpush1.bf16.msra.mxu0 %v1673_v52  ;;  %1744 = vmatprep.mubr.bf16.mxu0 %v4733_v8 }
 0x95a   : > { %1714 = vmatprep.subr.bf16.mxu0 %v1685_v54 }
 0x95d   : > { %1715 = vmatpush1.bf16.msra.mxu0 %v1681_v61 }
 0x95e   : > { %v1466_v11 = vpop.permute.xlu1 %1465 }
 0xa2b   : > { %v1511_v62 = vpop.f32.mrb[12].mxu0 }
 0xa2c   : > { %v1512_v20 = vadd.f32 %v1511_v62, %v1466_v11  ;;  %v1513_v63 = vpop.f32.mrb[13].mxu0 }
 0xa2d   : > { %v1514_v16 = vadd.f32 %v1513_v63, %v1466_v11  ;;  %v1515_v1 = vpop.f32.mrb[14].mxu0 }
 0xa2e   : > { %v5651_v5 = vmax.f32 %v1512_v20, 0.0  ;;  %v1516_v9 = vpop.f32.mrb[15].mxu0 }
 0xa2f   : > { %v5653_v10 = vmax.f32 %v1514_v16, 0.0 }
 0xa30   : > { %1522 = vrot.lane.b32.xlu0 %v5651_v5, %s4728_s26  ;;  %v1520_v8 = vpack.c.bf16 %v5651_v5, %v5651_v5 }
 0xa31   : > { %1524 = vrot.lane.b32.xlu1 %v5653_v10, %s4728_s26  ;;  %v1521_v4 = vpack.c.bf16 %v5653_v10, %v5653_v10 }
 0xa32   : > { %v1669_v32 = vrot.slane %v1520_v8, 4 }
 0xa33   : > { %v1670_v25 = vrot.slane %v1521_v4, 4 }
 0xa34   : > { %1530 = vrot.lane.b32.xlu0 %v5651_v5, %s4727_s25  ;;  %v1689_v18 = vsel %vm563_vm8, %v1383_v33, %v1669_v32 }
 0xa35   : > { %1532 = vrot.lane.b32.xlu1 %v5653_v10, %s4727_s25  ;;  %v1693_v17 = vsel %vm563_vm8, %v1384_v13, %v1670_v25  ;;  %s383_s25 = scalar_lea.vmem %s7143_s11, %s4401_s6 }
 0xa36   : > { %1716 = vmatprep.subr.bf16.mxu0 %v1693_v17 }
 0xa37   : > { %1717 = vmatpush1.bf16.msra.mxu0 %v1689_v18 }
 0xa38   : > { %1538 = vrot.lane.b32.xlu0 %v5651_v5, %s4726_s24 }
 0xa39   : > { %1540 = vrot.lane.b32.xlu1 %v5653_v10, %s4726_s24 }
 0xa3c   : > { %1546 = vrot.lane.b32.xlu0 %v5651_v5, %s4729_s27 }
 0xa3d   : > { %1548 = vrot.lane.b32.xlu1 %v5653_v10, %s4729_s27 }
 0xa40   : > { %1554 = vrot.lane.b32.xlu0 %v5651_v5, %s4730_s28 }
 0xa41   : > { %1556 = vrot.lane.b32.xlu1 %v5653_v10, %s4730_s28 }
 0xa44   : > { %1562 = vrot.lane.b32.xlu0 %v5651_v5, %s4731_s29 }
 0xa45   : > { %1564 = vrot.lane.b32.xlu1 %v5653_v10, %s4731_s29 }
 0xa48   : > { %1570 = vrot.lane.b32.xlu0 %v5651_v5, %s4732_s30 }
 0xa49   : > { %1572 = vrot.lane.b32.xlu1 %v5653_v10, %s4732_s30 }
 0xa4c   : > { %1578 = vrot.lane.b32.xlu0 %v5651_v5, %s4734_s12 }
 0xa4d   : > { %1580 = vrot.lane.b32.xlu1 %v5653_v10, %s4734_s12 }
 0xa50   : > { %1602 = vperm.xlu0 %4715, %v4426_v48  }
 0xa51   : > { %2830 = vperm.xlu1 %4716, %v2827_v44  }
 0xaa2   : > { %v1523_v22 = vpop.permute.xlu0 %1522 }
 0xaa3   : > { %v1525_v23 = vpop.permute.xlu1 %1524 }
 0xaa4   : > { %v1526_v24 = vsel %vm403_vm2, %v1523_v22, %v1525_v23  ;;  %v1527_v27 = vsel %vm403_vm2, %v1525_v23, %v1523_v22  ;;  %vm3734_vm2 = vcmp.lt.s32.totalorder %v4879_v14, 32 }
 0xaa5   : > { %v1528_v42 = vmul.f32 %v1527_v27, %v5033_v35  ;;  %v1529_v21 = vmul.f32 %v1526_v24, %v5037_v36  ;;  %v4425_v24 = vld [vmem:[%s7135_s3 + $0x18] sm:$0xf] }
 0xaa6   : > { %v1531_v28 = vpop.permute.xlu0 %1530 }
 0xaa7   : > { %v1533_v30 = vpop.permute.xlu1 %1532 }
 0xaa8   : > { %v1534_v41 = vsel %vm415_vm0, %v1531_v28, %v1533_v30  ;;  %v1535_v55 = vsel %vm415_vm0, %v1533_v30, %v1531_v28  ;;  %v1766_v30 = vld [vmem:[%s7141_s9 + $0x48] sm:$0xff]  ;;  %vm1702_vm0 = vcmask 457728  }
 0xaa9   : > { %v1536_v26 = vmul.f32 %v1535_v55, %v5041_v37  ;;  %v1537_v49 = vmul.f32 %v1534_v41, %v5045_v38  ;;  %v1770_v41 = vld [vmem:[%s7141_s9 + $0x68] sm:$0xff] }
 0xaaa   : > { %v1539_v50 = vpop.permute.xlu0 %1538  ;;  %v4443_v55 = vcombine.high %v1766_v30, %v1770_v41 }
 0xaab   : > { %v1586_v51 = vpack.c.bf16 %v1536_v26, %v1528_v42  ;;  %v1541_v53 = vpop.permute.xlu1 %1540  ;;  %v1587_v19 = vpack.c.bf16 %v1537_v49, %v1529_v21  ;;  %v4442_v42 = vcombine.low %v1766_v30, %v1770_v41  ;;  %v1774_v21 = vld [vmem:[%s7141_s9 + $0x88] sm:$0xff] }
 0xaac   : > { %v1542_v29 = vsel %vm430_vm1, %v1539_v50, %v1541_v53  ;;  %v1543_v12 = vsel %vm430_vm1, %v1541_v53, %v1539_v50  ;;  %v1778_v26 = vld [vmem:[%s7141_s9 + $0xa8] sm:$0xff]  ;;  %vm3657_vm1 = vcmp.lt.s32.totalorder %v4879_v14, 33 }
 0xaad   : > { %1614 = vmatprep.subr.bf16.mxu1 %v1587_v19  ;;  %v1544_v38 = vmul.f32 %v1543_v12, %v5063_v56  ;;  %v1545_v52 = vmul.f32 %v1542_v29, %v5066_v57  ;;  %v4451_v49 = vcombine.high %v1774_v21, %v1778_v26  ;;  %v4450_v50 = vcombine.low %v1774_v21, %v1778_v26  ;;  %v1786_v53 = vld [vmem:[%s7141_s9 + $0xe8] sm:$0xff]  ;;  %v1757_v26 = vld [vmem:[%s7141_s9] sm:$0xff] }
 0xaae   : > { %1615 = vmatpush1.bf16.msra.mxu1 %v1586_v51  ;;  %v1547_v47 = vpop.permute.xlu0 %1546  ;;  %v1782_v51 = vld [vmem:[%s7141_s9 + $0xc8] sm:$0xff] }
 0xaaf   : > { %v1549_v35 = vpop.permute.xlu1 %1548  ;;  %v4459_v19 = vcombine.high %v1782_v51, %v1786_v53  ;;  %v4458_v29 = vcombine.low %v1782_v51, %v1786_v53  ;;  %v1790_v12 = vld [vmem:[%s7141_s9 + $0x108] sm:$0xff] }
 0xab0   : > { %v1550_v36 = vsel %vm448_vm4, %v1547_v47, %v1549_v35  ;;  %v1551_v37 = vsel %vm448_vm4, %v1549_v35, %v1547_v47  ;;  %v1794_v47 = vld [vmem:[%s7141_s9 + $0x128] sm:$0xff] }
 0xab1   : > { %v1552_v46 = vmul.f32 %v1551_v37, %v5069_v58  ;;  %v1553_v54 = vmul.f32 %v1550_v36, %v5072_v59  ;;  %v4467_v35 = vcombine.high %v1790_v12, %v1794_v47  ;;  %v4466_v36 = vcombine.low %v1790_v12, %v1794_v47  ;;  %v1798_v37 = vld [vmem:[%s7141_s9 + $0x148] sm:$0xff]  ;;  %v1765_v12 = vld [vmem:[%s7141_s9 + $0x40] sm:$0xff] }
 0xab2   : > { %v1555_v60 = vpop.permute.xlu0 %1554  ;;  %v1769_v47 = vld [vmem:[%s7141_s9 + $0x60] sm:$0xff] }
 0xab3   : > { %v1588_v61 = vpack.c.bf16 %v1552_v46, %v1544_v38  ;;  %v1557_v11 = vpop.permute.xlu1 %1556  ;;  %v1589_v62 = vpack.c.bf16 %v1553_v54, %v1545_v52  ;;  %v1802_v38 = vld [vmem:[%s7141_s9 + $0x168] sm:$0xff] }
 0xab4   : > { %v1558_v20 = vsel %vm461_vm7, %v1555_v60, %v1557_v11  ;;  %v1559_v63 = vsel %vm461_vm7, %v1557_v11, %v1555_v60  ;;  %v4475_v52 = vcombine.high %v1798_v37, %v1802_v38  ;;  %v4474_v46 = vcombine.low %v1798_v37, %v1802_v38  ;;  %v1806_v54 = vld [vmem:[%s7141_s9 + $0x188] sm:$0xff]  ;;  %v1773_v38 = vld [vmem:[%s7141_s9 + $0x80] sm:$0xff] }
 0xab5   : > { %v1560_v16 = vmul.f32 %v1558_v20, %v5080_v0  ;;  %v1561_v56 = vmul.f32 %v1559_v63, %v5084_v15  ;;  %1616 = vmatprep.subr.bf16.mxu1 %v1589_v62  ;;  %v1810_v60 = vld [vmem:[%s7141_s9 + $0x1a8] sm:$0xff]  ;;  %v4441_v37 = vcombine.high %v1765_v12, %v1769_v47 }
 0xab6   : > { %1617 = vmatpush1.bf16.msra.mxu1 %v1588_v61  ;;  %v1563_v57 = vpop.permute.xlu0 %1562  ;;  %v4483_v61 = vcombine.high %v1806_v54, %v1810_v60  ;;  %v4482_v11 = vcombine.low %v1806_v54, %v1810_v60  ;;  %v1814_v62 = vld [vmem:[%s7141_s9 + $0x1c8] sm:$0xff]  ;;  %v1781_v60 = vld [vmem:[%s7141_s9 + $0xc0] sm:$0xff] }
 0xab7   : > { %v1590_v58 = vpack.c.bf16 %v1560_v16, %v5651_v5  ;;  %v1565_v59 = vpop.permute.xlu1 %1564  ;;  %v1591_v1 = vpack.c.bf16 %v1561_v56, %v5653_v10  ;;  %v1818_v20 = vld [vmem:[%s7141_s9 + $0x1e8] sm:$0xff] }
 0xab8   : > { %v1566_v9 = vsel %vm479_vm9, %v1563_v57, %v1565_v59  ;;  %v1567_v8 = vsel %vm479_vm9, %v1565_v59, %v1563_v57  ;;  %v4491_v63 = vcombine.high %v1814_v62, %v1818_v20  ;;  %v4490_v16 = vcombine.low %v1814_v62, %v1818_v20  ;;  %v1822_v56 = vld [vmem:[%s7141_s9 + $0x208] sm:$0xff]  ;;  %v1789_v20 = vld [vmem:[%s7141_s9 + $0x100] sm:$0xff] }
 0xab9   : > { %1618 = vmatprep.subr.bf16.mxu1 %v1591_v1  ;;  %v1568_v5 = vmul.f32 %v1566_v9, %v5105_v31  ;;  %v1569_v10 = vmul.f32 %v1567_v8, %v5108_v34  ;;  %v1826_v57 = vld [vmem:[%s7141_s9 + $0x228] sm:$0xff]  ;;  %vm4246_vm9 = vcmp.lt.s32.totalorder %v4879_v14, 95 }
 0xaba   : > { %1619 = vmatpush1.bf16.msra.mxu1 %v1590_v58  ;;  %v1571_v4 = vpop.permute.xlu0 %1570  ;;  %v4499_v58 = vcombine.high %v1822_v56, %v1826_v57  ;;  %v4498_v59 = vcombine.low %v1822_v56, %v1826_v57  ;;  %v1830_v1 = vld [vmem:[%s7141_s9 + $0x248] sm:$0xff]  ;;  %v1797_v57 = vld [vmem:[%s7141_s9 + $0x140] sm:$0xff] }
 0xabb   : > { %v1573_v0 = vpop.permute.xlu1 %1572  ;;  %v1834_v9 = vld [vmem:[%s7141_s9 + $0x268] sm:$0xff] }
 0xabc   : > { %v1574_v15 = vsel %vm497_vm11, %v1571_v4, %v1573_v0  ;;  %v1575_v32 = vsel %vm497_vm11, %v1573_v0, %v1571_v4  ;;  %v4507_v8 = vcombine.high %v1830_v1, %v1834_v9  ;;  %v4506_v4 = vcombine.low %v1830_v1, %v1834_v9  ;;  %v1838_v0 = vld [vmem:[%s7141_s9 + $0x288] sm:$0xff]  ;;  %v1805_v9 = vld [vmem:[%s7141_s9 + $0x180] sm:$0xff] }
 0xabd   : > { %v1576_v13 = vmul.f32 %v1574_v15, %v5111_v39  ;;  %v1577_v25 = vmul.f32 %v1575_v32, %v5114_v40  ;;  %v1842_v15 = vld [vmem:[%s7141_s9 + $0x2a8] sm:$0xff] }
 0xabe   : > { %v1579_v33 = vpop.permute.xlu0 %1578  ;;  %v4515_v32 = vcombine.high %v1838_v0, %v1842_v15 }
 0xabf   : > { %v1592_v17 = vpack.c.bf16 %v1576_v13, %v1568_v5  ;;  %v1581_v18 = vpop.permute.xlu1 %1580  ;;  %v1593_v48 = vpack.c.bf16 %v1577_v25, %v1569_v10  ;;  %v4514_v5 = vcombine.low %v1838_v0, %v1842_v15  ;;  %v1846_v10 = vld [vmem:[%s7141_s9 + $0x2c8] sm:$0xff]  ;;  %v1813_v15 = vld [vmem:[%s7141_s9 + $0x1c0] sm:$0xff] }
 0xac0   : > { %v1582_v44 = vsel %vm510_vm13, %v1579_v33, %v1581_v18  ;;  %v1583_v22 = vsel %vm510_vm13, %v1581_v18, %v1579_v33  ;;  %v1850_v13 = vld [vmem:[%s7141_s9 + $0x2e8] sm:$0xff] }
 0xac1   : > { %v1584_v23 = vmul.f32 %v1582_v44, %v5123_v43  ;;  %v1585_v31 = vmul.f32 %v1583_v22, %v5128_v45  ;;  %1620 = vmatprep.subr.bf16.mxu1 %v1593_v48  ;;  %v1758_v43 = vld [vmem:[%s7141_s9 + $0x8] sm:$0xff]  ;;  %v4523_v25 = vcombine.high %v1846_v10, %v1850_v13  ;;  %v4522_v33 = vcombine.low %v1846_v10, %v1850_v13  ;;  %v1821_v13 = vld [vmem:[%s7141_s9 + $0x200] sm:$0xff] }
 0xac2   : > { %1621 = vmatpush1.bf16.msra.mxu1 %v1592_v17  ;;  %v1762_v45 = vld [vmem:[%s7141_s9 + $0x28] sm:$0xff] }
 0xac3   : > { %v1594_v34 = vpack.c.bf16 %v1584_v23, %v1584_v23  ;;  %v1595_v39 = vpack.c.bf16 %v1585_v31, %v1585_v31  ;;  %v4434_v27 = vcombine.low %v1758_v43, %v1762_v45  ;;  %v4435_v28 = vcombine.high %v1758_v43, %v1762_v45  ;;  %v1854_v17 = vld [vmem:[%s7141_s9 + $0x308] sm:$0xff] }
 0xac4   : > { %v1858_v18 = vld [vmem:[%s7141_s9 + $0x328] sm:$0xff] }
 0xac5   : > { %4427 = vmatprep.subr.msk.bf16.mxu1 %vm563_vm8, %v1595_v39  ;;  %v1609_v40 = vsel %vm563_vm8, %v1594_v34, 0  ;;  %v4531_v48 = vcombine.high %v1854_v17, %v1858_v18  ;;  %v4530_v44 = vcombine.low %v1854_v17, %v1858_v18  ;;  %v1862_v22 = vld [vmem:[%s7141_s9 + $0x348] sm:$0xff]  ;;  %v1829_v18 = vld [vmem:[%s7141_s9 + $0x240] sm:$0xff] }
 0xac6   : > { %1623 = vmatpush1.bf16.msra.mxu1 %v1609_v40  ;;  %v1866_v23 = vld [vmem:[%s7141_s9 + $0x368] sm:$0xff] }
 0xac7   : > { %2568 = vmatprep.subr.bf16.mxu1 %v4435_v28  ;;  %v4539_v31 = vcombine.high %v1862_v22, %v1866_v23  ;;  %v4538_v34 = vcombine.low %v1862_v22, %v1866_v23  ;;  %v1870_v39 = vld [vmem:[%s7141_s9 + $0x388] sm:$0xff]  ;;  %v1837_v23 = vld [vmem:[%s7141_s9 + $0x280] sm:$0xff] }
 0xac8   : > { %v1874_v40 = vld [vmem:[%s7141_s9 + $0x3a8] sm:$0xff] }
 0xac9   : > { %4428 = vmatmul.mubr.msk.bf16.vlgmr.msra.gmra.mrb[12].mxu1 %vm782_vm3, %v4425_v24  ;;  %v4547_v24 = vcombine.high %v1870_v39, %v1874_v40  ;;  %v4546_v43 = vcombine.low %v1870_v39, %v1874_v40  ;;  %v1845_v40 = vld [vmem:[%s7141_s9 + $0x2c0] sm:$0xff] }
 0xaca   : > { %2569 = vmatpush1.bf16.msra.mxu1 %v4434_v27 }
 0xacb   : > { %2570 = vmatprep.subr.bf16.mxu1 %v4443_v55 }
 0xace   : > { %2571 = vmatpush1.bf16.msra.mxu1 %v4442_v42 }
 0xacf   : > { %2572 = vmatprep.subr.bf16.mxu1 %v4451_v49  ;;  %v1603_v45 = vpop.permute.xlu0 %1602  ;;  %v1761_v49 = vld [vmem:[%s7141_s9 + $0x20] sm:$0xff] }
 0xad2   : > { %2573 = vmatpush1.bf16.msra.mxu1 %v4450_v50 }
 0xad3   : > { %2574 = vmatprep.subr.bf16.mxu1 %v4459_v19  ;;  %v4433_v19 = vcombine.high %v1757_v26, %v1761_v49 }
 0xad6   : > { %2575 = vmatpush1.bf16.msra.mxu1 %v4458_v29 }
 0xad7   : > { %2576 = vmatprep.subr.bf16.mxu1 %v4467_v35  ;;  %v4717_v35 = vld [vmem:[%s7137_s5] sm:$0x1f]  }
 0xada   : > { %2577 = vmatpush1.bf16.msra.mxu1 %v4466_v36  ;;  %v4432_v36 = vcombine.low %v1757_v26, %v1761_v49  ;;  %v1869_v49 = vld [vmem:[%s7141_s9 + $0x380] sm:$0xff] }
 0xadb   : > { %2578 = vmatprep.subr.bf16.mxu1 %v4475_v52  ;;  %v1777_v52 = vld [vmem:[%s7141_s9 + $0xa0] sm:$0xff] }
 0xadc   : > { %v4449_v54 = vcombine.high %v1773_v38, %v1777_v52 }
 0xade   : > { %2579 = vmatpush1.bf16.msra.mxu1 %v4474_v46  ;;  %v4440_v46 = vcombine.low %v1765_v12, %v1769_v47  ;;  %v1881_v12 = vld [vmem:[%s7141_s9 + $0x3e0] sm:$0xff]  ;;  %v1878_v47 = vld [vmem:[%s7141_s9 + $0x3c8] sm:$0xff] }
 0xadf   : > { %2580 = vmatprep.subr.bf16.mxu1 %v4483_v61  ;;  %v1785_v61 = vld [vmem:[%s7141_s9 + $0xe0] sm:$0xff] }
 0xae0   : > { %v4457_v62 = vcombine.high %v1781_v60, %v1785_v61 }
 0xae2   : > { %2581 = vmatpush1.bf16.msra.mxu1 %v4482_v11  ;;  %v4448_v11 = vcombine.low %v1773_v38, %v1777_v52 }
 0xae3   : > { %2582 = vmatprep.subr.bf16.mxu1 %v4491_v63  ;;  %v1793_v63 = vld [vmem:[%s7141_s9 + $0x120] sm:$0xff] }
 0xae4   : > { %v4465_v56 = vcombine.high %v1789_v20, %v1793_v63 }
 0xae6   : > { %2583 = vmatpush1.bf16.msra.mxu1 %v4490_v16  ;;  %v4456_v16 = vcombine.low %v1781_v60, %v1785_v61  ;;  %v1760_v60 = vld [vmem:[%s7141_s9 + $0x18] sm:$0xff] }
 0xae7   : > { %2584 = vmatprep.subr.bf16.mxu1 %v4499_v58  ;;  %v1801_v58 = vld [vmem:[%s7141_s9 + $0x160] sm:$0xff] }
 0xae8   : > { %v4473_v1 = vcombine.high %v1797_v57, %v1801_v58 }
 0xaea   : > { %2585 = vmatpush1.bf16.msra.mxu1 %v4498_v59  ;;  %v4464_v59 = vcombine.low %v1789_v20, %v1793_v63 }
 0xaeb   : > { %2586 = vmatprep.subr.bf16.mxu1 %v4507_v8  ;;  %v1809_v8 = vld [vmem:[%s7141_s9 + $0x1a0] sm:$0xff] }
 0xaec   : > { %v4481_v0 = vcombine.high %v1805_v9, %v1809_v8 }
 0xaee   : > { %2587 = vmatpush1.bf16.msra.mxu1 %v4506_v4  ;;  %v4472_v4 = vcombine.low %v1797_v57, %v1801_v58  ;;  %v1767_v58 = vld [vmem:[%s7141_s9 + $0x50] sm:$0xff] }
 0xaef   : > { %2588 = vmatprep.subr.bf16.mxu1 %v4515_v32  ;;  %v1817_v32 = vld [vmem:[%s7141_s9 + $0x1e0] sm:$0xff] }
 0xaf0   : > { %v4489_v10 = vcombine.high %v1813_v15, %v1817_v32 }
 0xaf2   : > { %2589 = vmatpush1.bf16.msra.mxu1 %v4514_v5  ;;  %v4480_v5 = vcombine.low %v1805_v9, %v1809_v8  ;;  %v1771_v9 = vld [vmem:[%s7141_s9 + $0x70] sm:$0xff]  ;;  %v1768_v8 = vld [vmem:[%s7141_s9 + $0x58] sm:$0xff] }
 0xaf3   : > { %2590 = vmatprep.subr.bf16.mxu1 %v4523_v25  ;;  %v1825_v25 = vld [vmem:[%s7141_s9 + $0x220] sm:$0xff] }
 0xaf4   : > { %v4497_v17 = vcombine.high %v1821_v13, %v1825_v25 }
 0xaf6   : > { %2591 = vmatpush1.bf16.msra.mxu1 %v4522_v33  ;;  %v4488_v33 = vcombine.low %v1813_v15, %v1817_v32  ;;  %v1775_v15 = vld [vmem:[%s7141_s9 + $0x90] sm:$0xff]  ;;  %v4445_v32 = vcombine.high %v1767_v58, %v1771_v9 }
 0xaf7   : > { %2592 = vmatprep.subr.bf16.mxu1 %v4531_v48  ;;  %v1833_v48 = vld [vmem:[%s7141_s9 + $0x260] sm:$0xff] }
 0xaf8   : > { %v4505_v22 = vcombine.high %v1829_v18, %v1833_v48 }
 0xafa   : > { %2593 = vmatpush1.bf16.msra.mxu1 %v4530_v44  ;;  %v4496_v44 = vcombine.low %v1821_v13, %v1825_v25  ;;  %v1776_v13 = vld [vmem:[%s7141_s9 + $0x98] sm:$0xff] }
 0xafb   : > { %2594 = vmatprep.subr.bf16.mxu1 %v4539_v31  ;;  %v1841_v31 = vld [vmem:[%s7141_s9 + $0x2a0] sm:$0xff]  ;;  %v1780_v25 = vld [vmem:[%s7141_s9 + $0xb8] sm:$0xff] }
 0xafc   : > { %v4513_v39 = vcombine.high %v1837_v23, %v1841_v31 }
 0xafe   : > { %2595 = vmatpush1.bf16.msra.mxu1 %v4538_v34  ;;  %v4504_v34 = vcombine.low %v1829_v18, %v1833_v48  ;;  %v4455_v48 = vcombine.high %v1776_v13, %v1780_v25 }
 0xaff   : > { %2596 = vmatprep.subr.bf16.mxu1 %v4547_v24  ;;  %v1849_v24 = vld [vmem:[%s7141_s9 + $0x2e0] sm:$0xff] }
 0xb02   : > { %2597 = vmatpush1.bf16.msra.mxu1 %v4546_v43  ;;  %v4512_v43 = vcombine.low %v1837_v23, %v1841_v31  ;;  %v1784_v23 = vld [vmem:[%s7141_s9 + $0xd8] sm:$0xff] }
 0xb03   : > { %v1788_v31 = vld [vmem:[%s7141_s9 + $0xf8] sm:$0xff] }
 0xb9c   : > { %v1648_v27 = vpop.f32.mrb[12].mxu1 }
 0xb9d   : > { %v1649_v28 = vadd.f32 %v1648_v27, %v1603_v45  ;;  %v1650_v30 = vpop.f32.mrb[13].mxu1  ;;  %v1853_v27 = vld [vmem:[%s7141_s9 + $0x300] sm:$0xff] }
 0xb9e   : > { %v1651_v41 = vadd.f32 %v1650_v30, %v1603_v45  ;;  %v1652_v55 = vpop.f32.mrb[14].mxu1  ;;  %v4521_v45 = vcombine.high %v1845_v40, %v1849_v24  ;;  %v4520_v30 = vcombine.low %v1845_v40, %v1849_v24  ;;  %v4463_v24 = vcombine.high %v1784_v23, %v1788_v31 }
 0xb9f   : > { %v1655_v42 = vmax.f32 %v1649_v28, 0.0  ;;  %v1653_v21 = vpop.f32.mrb[15].mxu1  ;;  %v1857_v28 = vld [vmem:[%s7141_s9 + $0x320] sm:$0xff] }
 0xba0   : > { %v1656_v50 = vmax.f32 %v1651_v41, 0.0  ;;  %v4529_v41 = vcombine.high %v1853_v27, %v1857_v28  ;;  %v1861_v55 = vld [vmem:[%s7141_s9 + $0x340] sm:$0xff]  ;;  %v4528_v21 = vcombine.low %v1853_v27, %v1857_v28  ;;  %v1792_v27 = vld [vmem:[%s7141_s9 + $0x118] sm:$0xff] }
 0xba1   : > { %v1657_v51 = vpack.c.bf16 %v1655_v42, %v1655_v42  ;;  %v1865_v42 = vld [vmem:[%s7141_s9 + $0x360] sm:$0xff]  ;;  %v1796_v28 = vld [vmem:[%s7141_s9 + $0x138] sm:$0xff] }
 0xba2   : > { %v1658_v53 = vpack.c.bf16 %v1656_v50, %v1656_v50  ;;  %v4537_v26 = vcombine.high %v1861_v55, %v1865_v42  ;;  %v1873_v50 = vld [vmem:[%s7141_s9 + $0x3a0] sm:$0xff] }
 0xba3   : > { %v1707_v29 = vsel %vm563_vm8, %v1657_v51, 0  ;;  %v4536_v51 = vcombine.low %v1861_v55, %v1865_v42  ;;  %v4471_v42 = vcombine.high %v1792_v27, %v1796_v28 }
 0xba4   : > { %4430 = vmatprep.subr.msk.bf16.mxu0 %vm563_vm8, %v1658_v53  ;;  %v4545_v53 = vcombine.high %v1869_v49, %v1873_v50  ;;  %vm4189_vm8 = vcmp.lt.s32.totalorder %v4879_v14, 96 }
 0xba5   : > { %1719 = vmatpush1.bf16.msra.mxu0 %v1707_v29  ;;  %v1877_v29 = vld [vmem:[%s7141_s9 + $0x3c0] sm:$0xff] }
 0xba6   : > { %2525 = vmatprep.subr.bf16.mxu0 %v4433_v19  ;;  %v4544_v19 = vcombine.low %v1869_v49, %v1873_v50  ;;  %v1800_v49 = vld [vmem:[%s7141_s9 + $0x158] sm:$0xff] }
 0xba7   : > { %v1804_v50 = vld [vmem:[%s7141_s9 + $0x178] sm:$0xff] }
 0xba8   : > { %4431 = vmatmul.mubr.msk.bf16.vlgmr.msra.gmra.mrb[16].mxu0 %vm1702_vm0, %v4717_v35  ;;  %v4553_v35 = vcombine.high %v1877_v29, %v1881_v12 }
 0xba9   : > { %2526 = vmatpush1.bf16.msra.mxu0 %v4432_v36  ;;  %v1882_v36 = vld [vmem:[%s7141_s9 + $0x3e8] sm:$0xff] }
 0xbaa   : > { %2527 = vmatprep.subr.bf16.mxu0 %v4441_v37  ;;  %v4552_v37 = vcombine.low %v1877_v29, %v1881_v12  ;;  %v4554_v38 = vcombine.low %v1878_v47, %v1882_v36  ;;  %v4555_v52 = vcombine.high %v1878_v47, %v1882_v36  ;;  %v4479_v29 = vcombine.high %v1800_v49, %v1804_v50  ;;  %v1807_v12 = vld [vmem:[%s7141_s9 + $0x190] sm:$0xff]  ;;  %v1812_v36 = vld [vmem:[%s7141_s9 + $0x1b8] sm:$0xff] }
 0xbab   : > { %v1811_v47 = vld [vmem:[%s7141_s9 + $0x1b0] sm:$0xff] }
 0xbac   : > { %2598 = vmatprep.subr.bf16.mxu1 %v4555_v52  ;;  %v4485_v52 = vcombine.high %v1807_v12, %v1811_v47 }
 0xbad   : > { %2528 = vmatpush1.bf16.msra.mxu0 %v4440_v46  ;;  %v1759_v46 = vld [vmem:[%s7141_s9 + $0x10] sm:$0xff]  ;;  %2599 = vmatpush1.bf16.msra.mxu1 %v4554_v38  ;;  %v4478_v38 = vcombine.low %v1800_v49, %v1804_v50 }
 0xbae   : > { %2529 = vmatprep.subr.bf16.mxu0 %v4449_v54  ;;  %v1763_v54 = vld [vmem:[%s7141_s9 + $0x30] sm:$0xff] }
 0xbaf   : > { %v4437_v61 = vcombine.high %v1759_v46, %v1763_v54 }
 0xbb1   : > { %2530 = vmatpush1.bf16.msra.mxu0 %v4448_v11  ;;  %v1764_v11 = vld [vmem:[%s7141_s9 + $0x38] sm:$0xff] }
 0xbb2   : > { %2531 = vmatprep.subr.bf16.mxu0 %v4457_v62  ;;  %v4436_v62 = vcombine.low %v1759_v46, %v1763_v54  ;;  %v4438_v20 = vcombine.low %v1760_v60, %v1764_v11  ;;  %v4439_v63 = vcombine.high %v1760_v60, %v1764_v11  ;;  %v1815_v54 = vld [vmem:[%s7141_s9 + $0x1d0] sm:$0xff]  ;;  %v1820_v11 = vld [vmem:[%s7141_s9 + $0x1f8] sm:$0xff] }
 0xbb3   : > { %v1819_v60 = vld [vmem:[%s7141_s9 + $0x1f0] sm:$0xff] }
 0xbb4   : > { %2654 = vmatprep.subr.bf16.mxu1 %v4439_v63  ;;  %v4493_v63 = vcombine.high %v1815_v54, %v1819_v60 }
 0xbb5   : > { %2532 = vmatpush1.bf16.msra.mxu0 %v4456_v16 }
 0xbb6   : > { %2533 = vmatprep.subr.bf16.mxu0 %v4465_v56 }
 0xbb9   : > { %2534 = vmatpush1.bf16.msra.mxu0 %v4464_v59 }
 0xbba   : > { %2535 = vmatprep.subr.bf16.mxu0 %v4473_v1 }
 0xbbd   : > { %2536 = vmatpush1.bf16.msra.mxu0 %v4472_v4  ;;  %v1772_v4 = vld [vmem:[%s7141_s9 + $0x78] sm:$0xff] }
 0xbbe   : > { %2537 = vmatprep.subr.bf16.mxu0 %v4481_v0 }
 0xbc1   : > { %2538 = vmatpush1.bf16.msra.mxu0 %v4480_v5  ;;  %v4447_v5 = vcombine.high %v1768_v8, %v1772_v4 }
 0xbc2   : > { %2539 = vmatprep.subr.bf16.mxu0 %v4489_v10  ;;  %v1779_v10 = vld [vmem:[%s7141_s9 + $0xb0] sm:$0xff] }
 0xbc3   : > { %v4453_v18 = vcombine.high %v1775_v15, %v1779_v10 }
 0xbc5   : > { %2540 = vmatpush1.bf16.msra.mxu0 %v4488_v33  ;;  %v4444_v33 = vcombine.low %v1767_v58, %v1771_v9  ;;  %v1824_v58 = vld [vmem:[%s7141_s9 + $0x218] sm:$0xff]  ;;  %v4492_v9 = vcombine.low %v1815_v54, %v1819_v60 }
 0xbc6   : > { %2541 = vmatprep.subr.bf16.mxu0 %v4497_v17  ;;  %v4446_v17 = vcombine.low %v1768_v8, %v1772_v4  ;;  %v1872_v54 = vld [vmem:[%s7141_s9 + $0x398] sm:$0xff] }
 0xbc7   : > { %v1876_v60 = vld [vmem:[%s7141_s9 + $0x3b8] sm:$0xff] }
 0xbc9   : > { %2542 = vmatpush1.bf16.msra.mxu0 %v4496_v44  ;;  %v1783_v44 = vld [vmem:[%s7141_s9 + $0xd0] sm:$0xff] }
 0xbca   : > { %2543 = vmatprep.subr.bf16.mxu0 %v4505_v22  ;;  %v1787_v22 = vld [vmem:[%s7141_s9 + $0xf0] sm:$0xff] }
 0xbcb   : > { %v4461_v40 = vcombine.high %v1783_v44, %v1787_v22 }
 0xbcd   : > { %2544 = vmatpush1.bf16.msra.mxu0 %v4504_v34  ;;  %v4452_v34 = vcombine.low %v1775_v15, %v1779_v10  ;;  %v1831_v15 = vld [vmem:[%s7141_s9 + $0x250] sm:$0xff]  ;;  %v1836_v10 = vld [vmem:[%s7141_s9 + $0x278] sm:$0xff] }
 0xbce   : > { %2545 = vmatprep.subr.bf16.mxu0 %v4513_v39  ;;  %v4454_v39 = vcombine.low %v1776_v13, %v1780_v25 }
 0xbd1   : > { %2546 = vmatpush1.bf16.msra.mxu0 %v4512_v43  ;;  %v1791_v43 = vld [vmem:[%s7141_s9 + $0x110] sm:$0xff] }
 0xbd2   : > { %2547 = vmatprep.subr.bf16.mxu0 %v4521_v45  ;;  %v1795_v45 = vld [vmem:[%s7141_s9 + $0x130] sm:$0xff] }
 0xbd3   : > { %v4469_v55 = vcombine.high %v1791_v43, %v1795_v45 }
 0xbd5   : > { %2548 = vmatpush1.bf16.msra.mxu0 %v4520_v30  ;;  %v4460_v30 = vcombine.low %v1783_v44, %v1787_v22  ;;  %v1840_v44 = vld [vmem:[%s7141_s9 + $0x298] sm:$0xff] }
 0xbd6   : > { %2549 = vmatprep.subr.bf16.mxu0 %v4529_v41  ;;  %v4462_v41 = vcombine.low %v1784_v23, %v1788_v31  ;;  %v1844_v22 = vld [vmem:[%s7141_s9 + $0x2b8] sm:$0xff] }
 0xbd9   : > { %2550 = vmatpush1.bf16.msra.mxu0 %v4528_v21  ;;  %v1799_v21 = vld [vmem:[%s7141_s9 + $0x150] sm:$0xff] }
 0xbda   : > { %2551 = vmatprep.subr.bf16.mxu0 %v4537_v26  ;;  %v1803_v26 = vld [vmem:[%s7141_s9 + $0x170] sm:$0xff] }
 0xbdd   : > { %2552 = vmatpush1.bf16.msra.mxu0 %v4536_v51  ;;  %v4468_v51 = vcombine.low %v1791_v43, %v1795_v45  ;;  %v1848_v43 = vld [vmem:[%s7141_s9 + $0x2d8] sm:$0xff] }
 0xbde   : > { %2553 = vmatprep.subr.bf16.mxu0 %v4545_v53  ;;  %v4470_v53 = vcombine.low %v1792_v27, %v1796_v28  ;;  %v1852_v45 = vld [vmem:[%s7141_s9 + $0x2f8] sm:$0xff]  ;;  %v4518_v28 = vcombine.low %v1840_v44, %v1844_v22 }
 0xbdf   : > { %v4526_v50 = vcombine.low %v1848_v43, %v1852_v45 }
 0xbe1   : > { %2554 = vmatpush1.bf16.msra.mxu0 %v4544_v19  ;;  %v4477_v19 = vcombine.high %v1799_v21, %v1803_v26 }
 0xbe2   : > { %2555 = vmatprep.subr.bf16.mxu0 %v4553_v35  ;;  %v1808_v35 = vld [vmem:[%s7141_s9 + $0x198] sm:$0xff] }
 0xbe3   : > { %v4487_v46 = vcombine.high %v1808_v35, %v1812_v36 }
 0xbe5   : > { %2556 = vmatpush1.bf16.msra.mxu0 %v4552_v37  ;;  %v4476_v37 = vcombine.low %v1799_v21, %v1803_v26  ;;  %v1856_v21 = vld [vmem:[%s7141_s9 + $0x318] sm:$0xff] }
 0xbe6   : > { %2611 = vmatprep.subr.bf16.mxu0 %v4437_v61  ;;  %v1816_v61 = vld [vmem:[%s7141_s9 + $0x1d8] sm:$0xff] }
 0xbe7   : > { %v4494_v8 = vcombine.low %v1816_v61, %v1820_v11  ;;  %v1860_v26 = vld [vmem:[%s7141_s9 + $0x338] sm:$0xff] }
 0xc7b   : > { %v1746_v16 = vpop.f32.mrb[16].mxu0 }
 0xc7c   : > { %v1748_v56 = vpop.f32.mrb[17].mxu0 }
 0xc7d   : > { %v1750_v57 = vpop.f32.mrb[18].mxu0 }
 0xc7e   : > { %v5968_v59 = vpack.c.bf16 %v1750_v57, %v1746_v16  ;;  %v1752_v1 = vpop.f32.mrb[19].mxu0  ;;  %v4495_v16 = vcombine.high %v1816_v61, %v1820_v11  ;;  %v1827_v57 = vld [vmem:[%s7141_s9 + $0x230] sm:$0xff] }
 0xc7f   : > { %v1756_v0 = vpack.c.bf16 %v1752_v1, %v1748_v56  ;;  %v1823_v56 = vld [vmem:[%s7141_s9 + $0x210] sm:$0xff]  ;;  %v1828_v1 = vld [vmem:[%s7141_s9 + $0x238] sm:$0xff] }
 0xc80   : > { %v4501_v4 = vcombine.high %v1823_v56, %v1827_v57  ;;  %v4500_v13 = vcombine.low %v1823_v56, %v1827_v57  ;;  %v4502_v25 = vcombine.low %v1824_v58, %v1828_v1  ;;  %v1880_v56 = vld [vmem:[%s7141_s9 + $0x3d8] sm:$0xff] }
 0xc81   : > { %2557 = vmatprep.mubr.bf16.mxu0 %v1756_v0  ;;  %2600 = vmatprep.mubr.bf16.mxu1 %v1756_v0  ;;  %v1884_v57 = vld [vmem:[%s7141_s9 + $0x3f8] sm:$0xff] }
 0xc82   : > { %2558 = vmatmul.mubr.bf16.vlgmr.msra.gmra.mrb[20].mxu0 %v5968_v59  ;;  %2601 = vmatmul.mubr.bf16.vlgmr.msra.gmra.mrb[16].mxu1 %v5968_v59 }
 0xc83   : > { %2612 = vmatpush1.bf16.msra.mxu0 %v4436_v62  ;;  %2655 = vmatpush1.bf16.msra.mxu1 %v4438_v20  ;;  %v4484_v62 = vcombine.low %v1807_v12, %v1811_v47  ;;  %v4486_v20 = vcombine.low %v1808_v35, %v1812_v36  ;;  %v1864_v12 = vld [vmem:[%s7141_s9 + $0x358] sm:$0xff]  ;;  %v4534_v36 = vcombine.low %v1856_v21, %v1860_v26 }
 0xc84   : > { %2643 = vmatprep.mubr.bf16.mxu0 %v1756_v0  ;;  %2686 = vmatprep.mubr.bf16.mxu1 %v1756_v0  ;;  %v4503_v0 = vcombine.high %v1824_v58, %v1828_v1  ;;  %v1868_v47 = vld [vmem:[%s7141_s9 + $0x378] sm:$0xff]  ;;  %v4550_v1 = vcombine.low %v1872_v54, %v1876_v60 }
 0xc85   : > { %2613 = vmatprep.subr.bf16.mxu0 %v4445_v32  ;;  %2656 = vmatprep.subr.bf16.mxu1 %v4447_v5  ;;  %v1835_v32 = vld [vmem:[%s7141_s9 + $0x270] sm:$0xff]  ;;  %v1832_v5 = vld [vmem:[%s7141_s9 + $0x258] sm:$0xff]  ;;  %v4542_v11 = vcombine.low %v1864_v12, %v1868_v47 }
 0xc86   : > { %v4508_v23 = vcombine.low %v1831_v15, %v1835_v32  ;;  %v4510_v31 = vcombine.low %v1832_v5, %v1836_v10 }
 0xc87   : > { %2614 = vmatpush1.bf16.msra.mxu0 %v4444_v33  ;;  %2657 = vmatpush1.bf16.msra.mxu1 %v4446_v17  ;;  %v4509_v33 = vcombine.high %v1831_v15, %v1835_v32  ;;  %v4511_v17 = vcombine.high %v1832_v5, %v1836_v10  ;;  %v2700_v15 = vld [vmem:[%s7142_s10 + $0x8] sm:$0xff]  ;;  %v4558_v10 = vcombine.low %v1880_v56, %v1884_v57 }
 0xc88   : > { %2615 = vmatprep.subr.bf16.mxu0 %v4453_v18  ;;  %2658 = vmatprep.subr.bf16.mxu1 %v4455_v48  ;;  %v1839_v18 = vld [vmem:[%s7141_s9 + $0x290] sm:$0xff]  ;;  %v2704_v32 = vld [vmem:[%s7142_s10 + $0x28] sm:$0xff] }
 0xc89   : > { %v1843_v48 = vld [vmem:[%s7141_s9 + $0x2b0] sm:$0xff] }
 0xc8a   : > { %v4516_v27 = vcombine.low %v1839_v18, %v1843_v48 }
 0xc8b   : > { %2616 = vmatpush1.bf16.msra.mxu0 %v4452_v34  ;;  %2659 = vmatpush1.bf16.msra.mxu1 %v4454_v39  ;;  %v4517_v34 = vcombine.high %v1839_v18, %v1843_v48  ;;  %v4519_v39 = vcombine.high %v1840_v44, %v1844_v22  ;;  %v2708_v18 = vld [vmem:[%s7142_s10 + $0x48] sm:$0xff]  ;;  %v4562_v22 = vcombine.low %v2700_v15, %v2704_v32 }
 0xc8c   : > { %2617 = vmatprep.subr.bf16.mxu0 %v4461_v40  ;;  %2660 = vmatprep.subr.bf16.mxu1 %v4463_v24  ;;  %v1847_v40 = vld [vmem:[%s7141_s9 + $0x2d0] sm:$0xff]  ;;  %v2712_v48 = vld [vmem:[%s7142_s10 + $0x68] sm:$0xff] }
 0xc8d   : > { %v1851_v24 = vld [vmem:[%s7141_s9 + $0x2f0] sm:$0xff] }
 0xc8e   : > { %v4524_v49 = vcombine.low %v1847_v40, %v1851_v24 }
 0xc8f   : > { %2618 = vmatpush1.bf16.msra.mxu0 %v4460_v30  ;;  %2661 = vmatpush1.bf16.msra.mxu1 %v4462_v41  ;;  %v4525_v30 = vcombine.high %v1847_v40, %v1851_v24  ;;  %v4527_v41 = vcombine.high %v1848_v43, %v1852_v45  ;;  %v2716_v40 = vld [vmem:[%s7142_s10 + $0x88] sm:$0xff]  ;;  %v6187_v43 = vpack.c.bf16 %v4836_v7, %v4836_v7  ;;  %v2727_v7 = vld [vmem:[%s7142_s10 + $0xe0] sm:$0xff] }
 0xc90   : > { %2619 = vmatprep.subr.bf16.mxu0 %v4469_v55  ;;  %2662 = vmatprep.subr.bf16.mxu1 %v4471_v42  ;;  %v1855_v55 = vld [vmem:[%s7141_s9 + $0x310] sm:$0xff]  ;;  %v2720_v24 = vld [vmem:[%s7142_s10 + $0xa8] sm:$0xff] }
 0xc91   : > { %v1859_v42 = vld [vmem:[%s7141_s9 + $0x330] sm:$0xff] }
 0xc92   : > { %v4532_v35 = vcombine.low %v1855_v55, %v1859_v42 }
 0xc93   : > { %2620 = vmatpush1.bf16.msra.mxu0 %v4468_v51  ;;  %2663 = vmatpush1.bf16.msra.mxu1 %v4470_v53  ;;  %v4533_v51 = vcombine.high %v1855_v55, %v1859_v42  ;;  %v4535_v53 = vcombine.high %v1856_v21, %v1860_v26  ;;  %v2728_v55 = vld [vmem:[%s7142_s10 + $0xe8] sm:$0xff]  ;;  %v4578_v21 = vcombine.low %v2716_v40, %v2720_v24 }
 0xc94   : > { %2621 = vmatprep.subr.bf16.mxu0 %v4477_v19  ;;  %2664 = vmatprep.subr.bf16.mxu1 %v4479_v29  ;;  %v1863_v19 = vld [vmem:[%s7141_s9 + $0x350] sm:$0xff] }
 0xc95   : > { %v1867_v29 = vld [vmem:[%s7141_s9 + $0x370] sm:$0xff] }
 0xc96   : > { %v4540_v61 = vcombine.low %v1863_v19, %v1867_v29 }
 0xc97   : > { %2622 = vmatpush1.bf16.msra.mxu0 %v4476_v37  ;;  %2665 = vmatpush1.bf16.msra.mxu1 %v4478_v38  ;;  %v4541_v37 = vcombine.high %v1863_v19, %v1867_v29  ;;  %v4543_v38 = vcombine.high %v1864_v12, %v1868_v47  ;;  %v2736_v19 = vld [vmem:[%s7142_s10 + $0x128] sm:$0xff] }
 0xc98   : > { %2623 = vmatprep.subr.bf16.mxu0 %v4485_v52  ;;  %2666 = vmatprep.subr.bf16.mxu1 %v4487_v46  ;;  %v1871_v52 = vld [vmem:[%s7141_s9 + $0x390] sm:$0xff] }
 0xc99   : > { %v1875_v46 = vld [vmem:[%s7141_s9 + $0x3b0] sm:$0xff] }
 0xc9a   : > { %v4548_v58 = vcombine.low %v1871_v52, %v1875_v46 }
 0xc9b   : > { %2624 = vmatpush1.bf16.msra.mxu0 %v4484_v62  ;;  %2667 = vmatpush1.bf16.msra.mxu1 %v4486_v20  ;;  %v4549_v62 = vcombine.high %v1871_v52, %v1875_v46  ;;  %v4551_v20 = vcombine.high %v1872_v54, %v1876_v60  ;;  %v2744_v52 = vld [vmem:[%s7142_s10 + $0x168] sm:$0xff] }
 0xc9c   : > { %2625 = vmatprep.subr.bf16.mxu0 %v4493_v63  ;;  %2668 = vmatprep.subr.bf16.mxu1 %v4495_v16  ;;  %v1879_v63 = vld [vmem:[%s7141_s9 + $0x3d0] sm:$0xff] }
 0xc9d   : > { %v1883_v16 = vld [vmem:[%s7141_s9 + $0x3f0] sm:$0xff] }
 0xc9e   : > { %v4556_v5 = vcombine.low %v1879_v63, %v1883_v16 }
 0xc9f   : > { %2626 = vmatpush1.bf16.msra.mxu0 %v4492_v9  ;;  %2669 = vmatpush1.bf16.msra.mxu1 %v4494_v8  ;;  %v4557_v9 = vcombine.high %v1879_v63, %v1883_v16  ;;  %v4559_v8 = vcombine.high %v1880_v56, %v1884_v57  ;;  %v2752_v63 = vld [vmem:[%s7142_s10 + $0x1a8] sm:$0xff] }
 0xca0   : > { %2627 = vmatprep.subr.bf16.mxu0 %v4501_v4  ;;  %2670 = vmatprep.subr.bf16.mxu1 %v4503_v0  ;;  %v2699_v4 = vld [vmem:[%s7142_s10] sm:$0xff] }
 0xca1   : > { %v2703_v0 = vld [vmem:[%s7142_s10 + $0x20] sm:$0xff] }
 0xca2   : > { %v4560_v44 = vcombine.low %v2699_v4, %v2703_v0 }
 0xca3   : > { %2628 = vmatpush1.bf16.msra.mxu0 %v4500_v13  ;;  %2671 = vmatpush1.bf16.msra.mxu1 %v4502_v25  ;;  %v4561_v13 = vcombine.high %v2699_v4, %v2703_v0  ;;  %v4563_v25 = vcombine.high %v2700_v15, %v2704_v32  ;;  %v2760_v4 = vld [vmem:[%s7142_s10 + $0x1e8] sm:$0xff] }
 0xca4   : > { %2629 = vmatprep.subr.bf16.mxu0 %v4509_v33  ;;  %2672 = vmatprep.subr.bf16.mxu1 %v4511_v17  ;;  %v2707_v33 = vld [vmem:[%s7142_s10 + $0x40] sm:$0xff] }
 0xca5   : > { %v2711_v17 = vld [vmem:[%s7142_s10 + $0x60] sm:$0xff] }
 0xca6   : > { %v4568_v45 = vcombine.low %v2707_v33, %v2711_v17 }
 0xca7   : > { %2630 = vmatpush1.bf16.msra.mxu0 %v4508_v23  ;;  %2673 = vmatpush1.bf16.msra.mxu1 %v4510_v31  ;;  %v4569_v23 = vcombine.high %v2707_v33, %v2711_v17  ;;  %v4571_v31 = vcombine.high %v2708_v18, %v2712_v48  ;;  %v2768_v33 = vld [vmem:[%s7142_s10 + $0x228] sm:$0xff] }
 0xca8   : > { %2631 = vmatprep.subr.bf16.mxu0 %v4517_v34  ;;  %2674 = vmatprep.subr.bf16.mxu1 %v4519_v39  ;;  %v2715_v34 = vld [vmem:[%s7142_s10 + $0x80] sm:$0xff] }
 0xca9   : > { %v2719_v39 = vld [vmem:[%s7142_s10 + $0xa0] sm:$0xff] }
 0xcaa   : > { %v4576_v42 = vcombine.low %v2715_v34, %v2719_v39 }
 0xcab   : > { %2632 = vmatpush1.bf16.msra.mxu0 %v4516_v27  ;;  %2675 = vmatpush1.bf16.msra.mxu1 %v4518_v28  ;;  %v4570_v27 = vcombine.low %v2708_v18, %v2712_v48  ;;  %v4577_v28 = vcombine.high %v2715_v34, %v2719_v39  ;;  %v2776_v34 = vld [vmem:[%s7142_s10 + $0x268] sm:$0xff] }
 0xcac   : > { %2633 = vmatprep.subr.bf16.mxu0 %v4525_v30  ;;  %2676 = vmatprep.subr.bf16.mxu1 %v4527_v41  ;;  %v4579_v30 = vcombine.high %v2716_v40, %v2720_v24  ;;  %v2723_v41 = vld [vmem:[%s7142_s10 + $0xc0] sm:$0xff] }
 0xcad   : > { %v4585_v26 = vcombine.high %v2723_v41, %v2727_v7  ;;  %v4584_v29 = vcombine.low %v2723_v41, %v2727_v7  ;;  %v2784_v41 = vld [vmem:[%s7142_s10 + $0x2a8] sm:$0xff] }
 0xcaf   : > { %2634 = vmatpush1.bf16.msra.mxu0 %v4524_v49  ;;  %2677 = vmatpush1.bf16.msra.mxu1 %v4526_v50  ;;  %v2731_v50 = vld [vmem:[%s7142_s10 + $0x100] sm:$0xff] }
 0xcb0   : > { %2635 = vmatprep.subr.bf16.mxu0 %v4533_v51  ;;  %2678 = vmatprep.subr.bf16.mxu1 %v4535_v53  ;;  %v2735_v51 = vld [vmem:[%s7142_s10 + $0x120] sm:$0xff]  ;;  %v2732_v53 = vld [vmem:[%s7142_s10 + $0x108] sm:$0xff] }
 0xcb1   : > { %v4593_v47 = vcombine.high %v2731_v50, %v2735_v51  ;;  %v4592_v46 = vcombine.low %v2731_v50, %v2735_v51  ;;  %v4594_v54 = vcombine.low %v2732_v53, %v2736_v19  ;;  %v2792_v50 = vld [vmem:[%s7142_s10 + $0x2e8] sm:$0xff] }
 0xcb3   : > { %2636 = vmatpush1.bf16.msra.mxu0 %v4532_v35  ;;  %2679 = vmatpush1.bf16.msra.mxu1 %v4534_v36  ;;  %v4595_v35 = vcombine.high %v2732_v53, %v2736_v19  ;;  %v2739_v36 = vld [vmem:[%s7142_s10 + $0x140] sm:$0xff] }
 0xcb4   : > { %2637 = vmatprep.subr.bf16.mxu0 %v4541_v37  ;;  %2680 = vmatprep.subr.bf16.mxu1 %v4543_v38  ;;  %v2743_v37 = vld [vmem:[%s7142_s10 + $0x160] sm:$0xff]  ;;  %v2740_v38 = vld [vmem:[%s7142_s10 + $0x148] sm:$0xff] }
 0xcb5   : > { %v4601_v60 = vcombine.high %v2739_v36, %v2743_v37  ;;  %v4600_v16 = vcombine.low %v2739_v36, %v2743_v37  ;;  %v4602_v56 = vcombine.low %v2740_v38, %v2744_v52  ;;  %v2800_v36 = vld [vmem:[%s7142_s10 + $0x328] sm:$0xff] }
 0xcb7   : > { %2638 = vmatpush1.bf16.msra.mxu0 %v4540_v61  ;;  %2681 = vmatpush1.bf16.msra.mxu1 %v4542_v11  ;;  %v4603_v61 = vcombine.high %v2740_v38, %v2744_v52  ;;  %v2747_v11 = vld [vmem:[%s7142_s10 + $0x180] sm:$0xff] }
 0xcb8   : > { %2639 = vmatprep.subr.bf16.mxu0 %v4549_v62  ;;  %2682 = vmatprep.subr.bf16.mxu1 %v4551_v20  ;;  %v2751_v62 = vld [vmem:[%s7142_s10 + $0x1a0] sm:$0xff]  ;;  %v2748_v20 = vld [vmem:[%s7142_s10 + $0x188] sm:$0xff] }
 0xcb9   : > { %v4609_v57 = vcombine.high %v2747_v11, %v2751_v62  ;;  %v4608_v0 = vcombine.low %v2747_v11, %v2751_v62  ;;  %v4610_v15 = vcombine.low %v2748_v20, %v2752_v63  ;;  %v2808_v11 = vld [vmem:[%s7142_s10 + $0x368] sm:$0xff] }
 0xcbb   : > { %2640 = vmatpush1.bf16.msra.mxu0 %v4548_v58  ;;  %2683 = vmatpush1.bf16.msra.mxu1 %v4550_v1  ;;  %v4611_v58 = vcombine.high %v2748_v20, %v2752_v63  ;;  %v2755_v1 = vld [vmem:[%s7142_s10 + $0x1c0] sm:$0xff] }
 0xcbc   : > { %2641 = vmatprep.subr.bf16.mxu0 %v4557_v9  ;;  %2684 = vmatprep.subr.bf16.mxu1 %v4559_v8  ;;  %v2759_v9 = vld [vmem:[%s7142_s10 + $0x1e0] sm:$0xff]  ;;  %v2756_v8 = vld [vmem:[%s7142_s10 + $0x1c8] sm:$0xff] }
 0xcbd   : > { %v4617_v32 = vcombine.high %v2755_v1, %v2759_v9  ;;  %v4616_v17 = vcombine.low %v2755_v1, %v2759_v9  ;;  %v4618_v18 = vcombine.low %v2756_v8, %v2760_v4  ;;  %v2816_v1 = vld [vmem:[%s7142_s10 + $0x3a8] sm:$0xff] }
 0xcbf   : > { %2642 = vmatpush1.bf16.msra.mxu0 %v4556_v5  ;;  %2685 = vmatpush1.bf16.msra.mxu1 %v4558_v10  ;;  %v4619_v5 = vcombine.high %v2756_v8, %v2760_v4  ;;  %v2763_v10 = vld [vmem:[%s7142_s10 + $0x200] sm:$0xff] }
 0xcc0   : > { %3477 = vmatprep.subr.bf16.mxu0 %v4561_v13  ;;  %3518 = vmatprep.subr.bf16.mxu1 %v4563_v25  ;;  %v2767_v13 = vld [vmem:[%s7142_s10 + $0x220] sm:$0xff]  ;;  %v2764_v25 = vld [vmem:[%s7142_s10 + $0x208] sm:$0xff] }
 0xcc1   : > { %v4625_v48 = vcombine.high %v2763_v10, %v2767_v13  ;;  %v4624_v39 = vcombine.low %v2763_v10, %v2767_v13  ;;  %v4626_v40 = vcombine.low %v2764_v25, %v2768_v33  ;;  %v2824_v10 = vld [vmem:[%s7142_s10 + $0x3e8] sm:$0xff] }
 0xcc2   : > { %2644 = vmatmul.mubr.bf16.vlgmr.msra.gmra.mrb[24].mxu0 %v5968_v59  ;;  %2687 = vmatmul.mubr.bf16.vlgmr.msra.gmra.mrb[20].mxu1 %v5968_v59  ;;  %v2724_v59 = vld [vmem:[%s7142_s10 + $0xc8] sm:$0xff] }
 0xcc3   : > { %3478 = vmatpush1.bf16.msra.mxu0 %v4560_v44  ;;  %3519 = vmatpush1.bf16.msra.mxu1 %v4562_v22  ;;  %v4587_v49 = vcombine.high %v2724_v59, %v2728_v55  ;;  %v4586_v12 = vcombine.low %v2724_v59, %v2728_v55  ;;  %v4627_v44 = vcombine.high %v2764_v25, %v2768_v33  ;;  %v2771_v22 = vld [vmem:[%s7142_s10 + $0x240] sm:$0xff] }
 0xcc4   : > { %3479 = vmatprep.subr.bf16.mxu0 %v4569_v23  ;;  %3520 = vmatprep.subr.bf16.mxu1 %v4571_v31  ;;  %v2775_v23 = vld [vmem:[%s7142_s10 + $0x260] sm:$0xff]  ;;  %v2772_v31 = vld [vmem:[%s7142_s10 + $0x248] sm:$0xff] }
 0xcc5   : > { %3509 = vmatprep.mubr.bf16.mxu0 %v6187_v43  ;;  %3550 = vmatprep.mubr.bf16.mxu1 %v6187_v43  ;;  %v4633_v24 = vcombine.high %v2771_v22, %v2775_v23  ;;  %v4632_v7 = vcombine.low %v2771_v22, %v2775_v23  ;;  %v4634_v59 = vcombine.low %v2772_v31, %v2776_v34  ;;  %v2706_v22 = vld [vmem:[%s7142_s10 + $0x38] sm:$0xff] }
 0xcc7   : > { %3480 = vmatpush1.bf16.msra.mxu0 %v4568_v45  ;;  %3521 = vmatpush1.bf16.msra.mxu1 %v4570_v27  ;;  %v4635_v45 = vcombine.high %v2772_v31, %v2776_v34  ;;  %v2779_v27 = vld [vmem:[%s7142_s10 + $0x280] sm:$0xff] }
 0xcc8   : > { %3481 = vmatprep.subr.bf16.mxu0 %v4577_v28  ;;  %3522 = vmatprep.subr.bf16.mxu1 %v4579_v30  ;;  %v2783_v28 = vld [vmem:[%s7142_s10 + $0x2a0] sm:$0xff]  ;;  %v2780_v30 = vld [vmem:[%s7142_s10 + $0x288] sm:$0xff] }
 0xcc9   : > { %v4641_v55 = vcombine.high %v2779_v27, %v2783_v28  ;;  %v4640_v51 = vcombine.low %v2779_v27, %v2783_v28  ;;  %v4642_v53 = vcombine.low %v2780_v30, %v2784_v41  ;;  %v2714_v27 = vld [vmem:[%s7142_s10 + $0x78] sm:$0xff]  ;;  %v6375_v28 = vpack.c.bf16 %v4829_v6, %v4829_v6 }
 0xcca   : > { %v2718_v6 = vld [vmem:[%s7142_s10 + $0x98] sm:$0xff] }
 0xccb   : > { %3482 = vmatpush1.bf16.msra.mxu0 %v4576_v42  ;;  %3523 = vmatpush1.bf16.msra.mxu1 %v4578_v21  ;;  %v4643_v42 = vcombine.high %v2780_v30, %v2784_v41  ;;  %v2787_v21 = vld [vmem:[%s7142_s10 + $0x2c0] sm:$0xff] }
 0xccc   : > { %3483 = vmatprep.subr.bf16.mxu0 %v4585_v26  ;;  %3524 = vmatprep.subr.bf16.mxu1 %v4587_v49  ;;  %v2791_v26 = vld [vmem:[%s7142_s10 + $0x2e0] sm:$0xff]  ;;  %v2788_v49 = vld [vmem:[%s7142_s10 + $0x2c8] sm:$0xff] }
 0xccd   : > { %v4649_v19 = vcombine.high %v2787_v21, %v2791_v26  ;;  %v4648_v37 = vcombine.low %v2787_v21, %v2791_v26  ;;  %v4650_v38 = vcombine.low %v2788_v49, %v2792_v50  ;;  %v2722_v21 = vld [vmem:[%s7142_s10 + $0xb8] sm:$0xff] }
 0xccf   : > { %3484 = vmatpush1.bf16.msra.mxu0 %v4584_v29  ;;  %3525 = vmatpush1.bf16.msra.mxu1 %v4586_v12  ;;  %v4651_v29 = vcombine.high %v2788_v49, %v2792_v50  ;;  %v2795_v12 = vld [vmem:[%s7142_s10 + $0x300] sm:$0xff] }
 0xcd0   : > { %3485 = vmatprep.subr.bf16.mxu0 %v4593_v47  ;;  %3526 = vmatprep.subr.bf16.mxu1 %v4595_v35  ;;  %v2799_v47 = vld [vmem:[%s7142_s10 + $0x320] sm:$0xff]  ;;  %v2796_v35 = vld [vmem:[%s7142_s10 + $0x308] sm:$0xff] }
 0xcd1   : > { %v4657_v52 = vcombine.high %v2795_v12, %v2799_v47  ;;  %v4656_v62 = vcombine.low %v2795_v12, %v2799_v47  ;;  %v4658_v20 = vcombine.low %v2796_v35, %v2800_v36  ;;  %v2730_v12 = vld [vmem:[%s7142_s10 + $0xf8] sm:$0xff] }
 0xcd3   : > { %3486 = vmatpush1.bf16.msra.mxu0 %v4592_v46  ;;  %3527 = vmatpush1.bf16.msra.mxu1 %v4594_v54  ;;  %v4659_v46 = vcombine.high %v2796_v35, %v2800_v36  ;;  %v2803_v54 = vld [vmem:[%s7142_s10 + $0x340] sm:$0xff]  ;;  %v4582_v35 = vcombine.low %v2718_v6, %v2722_v21 }
 0xcd4   : > { %3487 = vmatprep.subr.bf16.mxu0 %v4601_v60  ;;  %3528 = vmatprep.subr.bf16.mxu1 %v4603_v61  ;;  %v2807_v60 = vld [vmem:[%s7142_s10 + $0x360] sm:$0xff]  ;;  %v2804_v61 = vld [vmem:[%s7142_s10 + $0x348] sm:$0xff] }
 0xcd5   : > { %v4665_v63 = vcombine.high %v2803_v54, %v2807_v60  ;;  %v4664_v9 = vcombine.low %v2803_v54, %v2807_v60  ;;  %v4666_v8 = vcombine.low %v2804_v61, %v2808_v11 }
 0xcd7   : > { %3488 = vmatpush1.bf16.msra.mxu0 %v4600_v16  ;;  %3529 = vmatpush1.bf16.msra.mxu1 %v4602_v56  ;;  %v4667_v16 = vcombine.high %v2804_v61, %v2808_v11  ;;  %v2811_v56 = vld [vmem:[%s7142_s10 + $0x380] sm:$0xff] }
 0xcd8   : > { %3489 = vmatprep.subr.bf16.mxu0 %v4609_v57  ;;  %3530 = vmatprep.subr.bf16.mxu1 %v4611_v58  ;;  %v2815_v57 = vld [vmem:[%s7142_s10 + $0x3a0] sm:$0xff]  ;;  %v2812_v58 = vld [vmem:[%s7142_s10 + $0x388] sm:$0xff] }
 0xcd9   : > { %v4673_v4 = vcombine.high %v2811_v56, %v2815_v57  ;;  %v4672_v13 = vcombine.low %v2811_v56, %v2815_v57  ;;  %v4674_v25 = vcombine.low %v2812_v58, %v2816_v1 }
 0xcdb   : > { %3490 = vmatpush1.bf16.msra.mxu0 %v4608_v0  ;;  %3531 = vmatpush1.bf16.msra.mxu1 %v4610_v15  ;;  %v4675_v0 = vcombine.high %v2812_v58, %v2816_v1  ;;  %v2819_v15 = vld [vmem:[%s7142_s10 + $0x3c0] sm:$0xff] }
 0xcdc   : > { %3491 = vmatprep.subr.bf16.mxu0 %v4617_v32  ;;  %3532 = vmatprep.subr.bf16.mxu1 %v4619_v5  ;;  %v2823_v32 = vld [vmem:[%s7142_s10 + $0x3e0] sm:$0xff]  ;;  %v2820_v5 = vld [vmem:[%s7142_s10 + $0x3c8] sm:$0xff] }
 0xcdd   : > { %v4681_v33 = vcombine.high %v2819_v15, %v2823_v32  ;;  %v4680_v23 = vcombine.low %v2819_v15, %v2823_v32  ;;  %v4682_v31 = vcombine.low %v2820_v5, %v2824_v10 }
 0xcdf   : > { %3492 = vmatpush1.bf16.msra.mxu0 %v4616_v17  ;;  %3533 = vmatpush1.bf16.msra.mxu1 %v4618_v18  ;;  %v4683_v17 = vcombine.high %v2820_v5, %v2824_v10  ;;  %v2701_v18 = vld [vmem:[%s7142_s10 + $0x10] sm:$0xff] }
 0xce0   : > { %3493 = vmatprep.subr.bf16.mxu0 %v4625_v48  ;;  %3534 = vmatprep.subr.bf16.mxu1 %v4627_v44  ;;  %v2705_v48 = vld [vmem:[%s7142_s10 + $0x30] sm:$0xff]  ;;  %v2702_v44 = vld [vmem:[%s7142_s10 + $0x18] sm:$0xff] }
 0xce1   : > { %v4565_v34 = vcombine.high %v2701_v18, %v2705_v48  ;;  %v4564_v30 = vcombine.low %v2701_v18, %v2705_v48  ;;  %v4566_v41 = vcombine.low %v2702_v44, %v2706_v22 }
 0xce3   : > { %3494 = vmatpush1.bf16.msra.mxu0 %v4624_v39  ;;  %3535 = vmatpush1.bf16.msra.mxu1 %v4626_v40  ;;  %v4567_v39 = vcombine.high %v2702_v44, %v2706_v22  ;;  %v2709_v40 = vld [vmem:[%s7142_s10 + $0x50] sm:$0xff] }
 0xce4   : > { %3495 = vmatprep.subr.bf16.mxu0 %v4633_v24  ;;  %3536 = vmatprep.subr.bf16.mxu1 %v4635_v45  ;;  %v2713_v24 = vld [vmem:[%s7142_s10 + $0x70] sm:$0xff]  ;;  %v2710_v45 = vld [vmem:[%s7142_s10 + $0x58] sm:$0xff] }
 0xce5   : > { %v4572_v26 = vcombine.low %v2709_v40, %v2713_v24  ;;  %v4574_v49 = vcombine.low %v2710_v45, %v2714_v27 }
 0xce7   : > { %3496 = vmatpush1.bf16.msra.mxu0 %v4632_v7  ;;  %3537 = vmatpush1.bf16.msra.mxu1 %v4634_v59  ;;  %v4573_v7 = vcombine.high %v2709_v40, %v2713_v24  ;;  %v4575_v59 = vcombine.high %v2710_v45, %v2714_v27 }
 0xce8   : > { %3497 = vmatprep.subr.bf16.mxu0 %v4641_v55  ;;  %3538 = vmatprep.subr.bf16.mxu1 %v4643_v42  ;;  %v2717_v55 = vld [vmem:[%s7142_s10 + $0x90] sm:$0xff] }
 0xce9   : > { %v2721_v42 = vld [vmem:[%s7142_s10 + $0xb0] sm:$0xff] }
 0xcea   : > { %v4581_v50 = vcombine.high %v2717_v55, %v2721_v42  ;;  %v4580_v47 = vcombine.low %v2717_v55, %v2721_v42 }
 0xceb   : > { %3498 = vmatpush1.bf16.msra.mxu0 %v4640_v51  ;;  %3539 = vmatpush1.bf16.msra.mxu1 %v4642_v53  ;;  %v4583_v51 = vcombine.high %v2718_v6, %v2722_v21  ;;  %v2725_v53 = vld [vmem:[%s7142_s10 + $0xd0] sm:$0xff] }
 0xcec   : > { %3499 = vmatprep.subr.bf16.mxu0 %v4649_v19  ;;  %3540 = vmatprep.subr.bf16.mxu1 %v4651_v29  ;;  %v2729_v19 = vld [vmem:[%s7142_s10 + $0xf0] sm:$0xff]  ;;  %v2726_v29 = vld [vmem:[%s7142_s10 + $0xd8] sm:$0xff] }
 0xced   : > { %v4589_v36 = vcombine.high %v2725_v53, %v2729_v19  ;;  %v4588_v54 = vcombine.low %v2725_v53, %v2729_v19  ;;  %v4590_v60 = vcombine.low %v2726_v29, %v2730_v12 }
 0xcef   : > { %3500 = vmatpush1.bf16.msra.mxu0 %v4648_v37  ;;  %3541 = vmatpush1.bf16.msra.mxu1 %v4650_v38  ;;  %v4591_v37 = vcombine.high %v2726_v29, %v2730_v12  ;;  %v2733_v38 = vld [vmem:[%s7142_s10 + $0x110] sm:$0xff] }
 0xcf0   : > { %3501 = vmatprep.subr.bf16.mxu0 %v4657_v52  ;;  %3542 = vmatprep.subr.bf16.mxu1 %v4659_v46  ;;  %v2737_v52 = vld [vmem:[%s7142_s10 + $0x130] sm:$0xff]  ;;  %v2738_v46 = vld [vmem:[%s7142_s10 + $0x138] sm:$0xff] }
 0xcf1   : > { %v4597_v61 = vcombine.high %v2733_v38, %v2737_v52  ;;  %v4596_v56 = vcombine.low %v2733_v38, %v2737_v52 }
 0xcf3   : > { %3502 = vmatpush1.bf16.msra.mxu0 %v4656_v62  ;;  %3543 = vmatpush1.bf16.msra.mxu1 %v4658_v20  ;;  %v2741_v62 = vld [vmem:[%s7142_s10 + $0x150] sm:$0xff] }
 0xcf4   : > { %3503 = vmatprep.subr.bf16.mxu0 %v4665_v63  ;;  %3544 = vmatprep.subr.bf16.mxu1 %v4667_v16  ;;  %v2745_v20 = vld [vmem:[%s7142_s10 + $0x170] sm:$0xff]  ;;  %v2742_v63 = vld [vmem:[%s7142_s10 + $0x158] sm:$0xff] }
 0xcf5   : > { %v2746_v16 = vld [vmem:[%s7142_s10 + $0x178] sm:$0xff]  ;;  %v4605_v58 = vcombine.high %v2741_v62, %v2745_v20  ;;  %v4604_v15 = vcombine.low %v2741_v62, %v2745_v20 }
 0xcf6   : > { %v4607_v1 = vcombine.high %v2742_v63, %v2746_v16  ;;  %v4606_v32 = vcombine.low %v2742_v63, %v2746_v16 }
 0xcf7   : > { %3504 = vmatpush1.bf16.msra.mxu0 %v4664_v9  ;;  %3545 = vmatpush1.bf16.msra.mxu1 %v4666_v8  ;;  %v2749_v9 = vld [vmem:[%s7142_s10 + $0x190] sm:$0xff] }
 0xcf8   : > { %3505 = vmatprep.subr.bf16.mxu0 %v4673_v4  ;;  %3546 = vmatprep.subr.bf16.mxu1 %v4675_v0  ;;  %v2753_v8 = vld [vmem:[%s7142_s10 + $0x1b0] sm:$0xff]  ;;  %v2750_v4 = vld [vmem:[%s7142_s10 + $0x198] sm:$0xff] }
 0xcf9   : > { %v2754_v0 = vld [vmem:[%s7142_s10 + $0x1b8] sm:$0xff]  ;;  %v4613_v5 = vcombine.high %v2749_v9, %v2753_v8  ;;  %v4612_v18 = vcombine.low %v2749_v9, %v2753_v8 }
 0xcfa   : > { %v4615_v10 = vcombine.high %v2750_v4, %v2754_v0  ;;  %v4614_v48 = vcombine.low %v2750_v4, %v2754_v0 }
 0xcfb   : > { %3506 = vmatpush1.bf16.msra.mxu0 %v4672_v13  ;;  %3547 = vmatpush1.bf16.msra.mxu1 %v4674_v25  ;;  %v2757_v13 = vld [vmem:[%s7142_s10 + $0x1d0] sm:$0xff] }
 0xcfc   : > { %3507 = vmatprep.subr.bf16.mxu0 %v4681_v33  ;;  %3548 = vmatprep.subr.bf16.mxu1 %v4683_v17  ;;  %v2761_v25 = vld [vmem:[%s7142_s10 + $0x1f0] sm:$0xff]  ;;  %v2758_v33 = vld [vmem:[%s7142_s10 + $0x1d8] sm:$0xff] }
 0xcfd   : > { %v2762_v17 = vld [vmem:[%s7142_s10 + $0x1f8] sm:$0xff]  ;;  %v4621_v44 = vcombine.high %v2757_v13, %v2761_v25  ;;  %v4620_v40 = vcombine.low %v2757_v13, %v2761_v25 }
 0xcfe   : > { %v4623_v22 = vcombine.high %v2758_v33, %v2762_v17  ;;  %v4622_v24 = vcombine.low %v2758_v33, %v2762_v17 }
 0xcff   : > { %3508 = vmatpush1.bf16.msra.mxu0 %v4680_v23  ;;  %3549 = vmatpush1.bf16.msra.mxu1 %v4682_v31  ;;  %v2765_v23 = vld [vmem:[%s7142_s10 + $0x210] sm:$0xff] }
 0xd00   : > { %3559 = vmatprep.subr.bf16.mxu0 %v4565_v34  ;;  %3600 = vmatprep.subr.bf16.mxu1 %v4567_v39  ;;  %v2769_v31 = vld [vmem:[%s7142_s10 + $0x230] sm:$0xff]  ;;  %v2766_v34 = vld [vmem:[%s7142_s10 + $0x218] sm:$0xff] }
 0xd01   : > { %v2770_v39 = vld [vmem:[%s7142_s10 + $0x238] sm:$0xff]  ;;  %v4629_v45 = vcombine.high %v2765_v23, %v2769_v31  ;;  %v4628_v55 = vcombine.low %v2765_v23, %v2769_v31 }
 0xd02   : > { %3510 = vmatmul.mubr.bf16.vlgmr.msra.gmra.mrb[28].mxu0 %v6375_v28  ;;  %3551 = vmatmul.mubr.bf16.vlgmr.msra.gmra.mrb[24].mxu1 %v6375_v28  ;;  %v4631_v27 = vcombine.high %v2766_v34, %v2770_v39  ;;  %v4630_v42 = vcombine.low %v2766_v34, %v2770_v39 }
 0xd03   : > { %3560 = vmatpush1.bf16.msra.mxu0 %v4564_v30  ;;  %3601 = vmatpush1.bf16.msra.mxu1 %v4566_v41  ;;  %v2773_v30 = vld [vmem:[%s7142_s10 + $0x250] sm:$0xff] }
 0xd04   : > { %3561 = vmatprep.subr.bf16.mxu0 %v4573_v7  ;;  %3602 = vmatprep.subr.bf16.mxu1 %v4575_v59  ;;  %v2777_v41 = vld [vmem:[%s7142_s10 + $0x270] sm:$0xff]  ;;  %v2774_v7 = vld [vmem:[%s7142_s10 + $0x258] sm:$0xff] }
 0xd05   : > { %3591 = vmatprep.mubr.bf16.mxu0 %v6187_v43  ;;  %3632 = vmatprep.mubr.bf16.mxu1 %v6187_v43  ;;  %v2734_v43 = vld [vmem:[%s7142_s10 + $0x118] sm:$0xff]  ;;  %v4637_v6 = vcombine.high %v2773_v30, %v2777_v41  ;;  %v4636_v53 = vcombine.low %v2773_v30, %v2777_v41 }
 0xd06   : > { %v4599_v11 = vcombine.high %v2734_v43, %v2738_v46  ;;  %v4598_v57 = vcombine.low %v2734_v43, %v2738_v46  ;;  %v2778_v59 = vld [vmem:[%s7142_s10 + $0x278] sm:$0xff] }
 0xd07   : > { %3562 = vmatpush1.bf16.msra.mxu0 %v4572_v26  ;;  %3603 = vmatpush1.bf16.msra.mxu1 %v4574_v49  ;;  %v4639_v21 = vcombine.high %v2774_v7, %v2778_v59  ;;  %v2781_v26 = vld [vmem:[%s7142_s10 + $0x290] sm:$0xff]  ;;  %v4638_v19 = vcombine.low %v2774_v7, %v2778_v59 }
 0xd08   : > { %3563 = vmatprep.subr.bf16.mxu0 %v4581_v50  ;;  %3604 = vmatprep.subr.bf16.mxu1 %v4583_v51  ;;  %v2785_v49 = vld [vmem:[%s7142_s10 + $0x2b0] sm:$0xff]  ;;  %v2782_v50 = vld [vmem:[%s7142_s10 + $0x298] sm:$0xff] }
 0xd09   : > { %v2786_v51 = vld [vmem:[%s7142_s10 + $0x2b8] sm:$0xff]  ;;  %v4645_v29 = vcombine.high %v2781_v26, %v2785_v49  ;;  %v4644_v38 = vcombine.low %v2781_v26, %v2785_v49 }
 0xd0a   : > { %v4647_v12 = vcombine.high %v2782_v50, %v2786_v51  ;;  %v4646_v52 = vcombine.low %v2782_v50, %v2786_v51 }
 0xd0b   : > { %3564 = vmatpush1.bf16.msra.mxu0 %v4580_v47  ;;  %3605 = vmatpush1.bf16.msra.mxu1 %v4582_v35  ;;  %v2789_v47 = vld [vmem:[%s7142_s10 + $0x2d0] sm:$0xff] }
 0xd0c   : > { %3565 = vmatprep.subr.bf16.mxu0 %v4589_v36  ;;  %3606 = vmatprep.subr.bf16.mxu1 %v4591_v37  ;;  %v2793_v35 = vld [vmem:[%s7142_s10 + $0x2f0] sm:$0xff]  ;;  %v2790_v36 = vld [vmem:[%s7142_s10 + $0x2d8] sm:$0xff] }
 0xd0d   : > { %v2794_v37 = vld [vmem:[%s7142_s10 + $0x2f8] sm:$0xff]  ;;  %v4653_v43 = vcombine.high %v2789_v47, %v2793_v35  ;;  %v4652_v62 = vcombine.low %v2789_v47, %v2793_v35 }
 0xd0e   : > { %v4655_v46 = vcombine.high %v2790_v36, %v2794_v37  ;;  %v4654_v20 = vcombine.low %v2790_v36, %v2794_v37 }
 0xd0f   : > { %3566 = vmatpush1.bf16.msra.mxu0 %v4588_v54  ;;  %3607 = vmatpush1.bf16.msra.mxu1 %v4590_v60  ;;  %v2797_v54 = vld [vmem:[%s7142_s10 + $0x310] sm:$0xff] }
 0xd10   : > { %3567 = vmatprep.subr.bf16.mxu0 %v4597_v61  ;;  %3608 = vmatprep.subr.bf16.mxu1 %v4599_v11  ;;  %v2801_v60 = vld [vmem:[%s7142_s10 + $0x330] sm:$0xff]  ;;  %v2798_v61 = vld [vmem:[%s7142_s10 + $0x318] sm:$0xff] }
 0xd11   : > { %v2802_v11 = vld [vmem:[%s7142_s10 + $0x338] sm:$0xff]  ;;  %v4661_v63 = vcombine.high %v2797_v54, %v2801_v60  ;;  %v4660_v9 = vcombine.low %v2797_v54, %v2801_v60 }
 0xd12   : > { %v4663_v16 = vcombine.high %v2798_v61, %v2802_v11  ;;  %v4662_v8 = vcombine.low %v2798_v61, %v2802_v11 }
 0xd13   : > { %3568 = vmatpush1.bf16.msra.mxu0 %v4596_v56  ;;  %3609 = vmatpush1.bf16.msra.mxu1 %v4598_v57  ;;  %v2805_v56 = vld [vmem:[%s7142_s10 + $0x350] sm:$0xff] }
 0xd14   : > { %3569 = vmatprep.subr.bf16.mxu0 %v4605_v58  ;;  %3610 = vmatprep.subr.bf16.mxu1 %v4607_v1  ;;  %v2809_v57 = vld [vmem:[%s7142_s10 + $0x370] sm:$0xff]  ;;  %v2806_v58 = vld [vmem:[%s7142_s10 + $0x358] sm:$0xff] }
 0xd15   : > { %v2810_v1 = vld [vmem:[%s7142_s10 + $0x378] sm:$0xff]  ;;  %v4669_v4 = vcombine.high %v2805_v56, %v2809_v57  ;;  %v4668_v13 = vcombine.low %v2805_v56, %v2809_v57 }
 0xd16   : > { %v4671_v0 = vcombine.high %v2806_v58, %v2810_v1  ;;  %v4670_v25 = vcombine.low %v2806_v58, %v2810_v1 }
 0xd17   : > { %3570 = vmatpush1.bf16.msra.mxu0 %v4604_v15  ;;  %3611 = vmatpush1.bf16.msra.mxu1 %v4606_v32  ;;  %v2813_v15 = vld [vmem:[%s7142_s10 + $0x390] sm:$0xff] }
 0xd18   : > { %3571 = vmatprep.subr.bf16.mxu0 %v4613_v5  ;;  %3612 = vmatprep.subr.bf16.mxu1 %v4615_v10  ;;  %v2817_v32 = vld [vmem:[%s7142_s10 + $0x3b0] sm:$0xff]  ;;  %v2814_v5 = vld [vmem:[%s7142_s10 + $0x398] sm:$0xff] }
 0xd19   : > { %v2818_v10 = vld [vmem:[%s7142_s10 + $0x3b8] sm:$0xff]  ;;  %v4677_v33 = vcombine.high %v2813_v15, %v2817_v32  ;;  %v4676_v23 = vcombine.low %v2813_v15, %v2817_v32 }
 0xd1a   : > { %v4679_v17 = vcombine.high %v2814_v5, %v2818_v10  ;;  %v4678_v31 = vcombine.low %v2814_v5, %v2818_v10 }
 0xd1b   : > { %3572 = vmatpush1.bf16.msra.mxu0 %v4612_v18  ;;  %3613 = vmatpush1.bf16.msra.mxu1 %v4614_v48  ;;  %v2821_v18 = vld [vmem:[%s7142_s10 + $0x3d0] sm:$0xff] }
 0xd1c   : > { %3573 = vmatprep.subr.bf16.mxu0 %v4621_v44  ;;  %3614 = vmatprep.subr.bf16.mxu1 %v4623_v22  ;;  %v2825_v48 = vld [vmem:[%s7142_s10 + $0x3f0] sm:$0xff]  ;;  %v2822_v44 = vld [vmem:[%s7142_s10 + $0x3d8] sm:$0xff] }
 0xd1d   : > { %v2826_v22 = vld [vmem:[%s7142_s10 + $0x3f8] sm:$0xff]  ;;  %v4685_v34 = vcombine.high %v2821_v18, %v2825_v48 }
 0xd1e   : > { %v4687_v39 = vcombine.high %v2822_v44, %v2826_v22 }
 0xd1f   : > { %3574 = vmatpush1.bf16.msra.mxu0 %v4620_v40  ;;  %3615 = vmatpush1.bf16.msra.mxu1 %v4622_v24  ;;  %v4684_v40 = vcombine.low %v2821_v18, %v2825_v48  ;;  %v4686_v24 = vcombine.low %v2822_v44, %v2826_v22 }
 0xd20   : > { %3575 = vmatprep.subr.bf16.mxu0 %v4629_v45  ;;  %3616 = vmatprep.subr.bf16.mxu1 %v4631_v27 }
 0xd23   : > { %3576 = vmatpush1.bf16.msra.mxu0 %v4628_v55  ;;  %3617 = vmatpush1.bf16.msra.mxu1 %v4630_v42 }
 0xd24   : > { %3577 = vmatprep.subr.bf16.mxu0 %v4637_v6  ;;  %3618 = vmatprep.subr.bf16.mxu1 %v4639_v21 }
 0xd27   : > { %3578 = vmatpush1.bf16.msra.mxu0 %v4636_v53  ;;  %3619 = vmatpush1.bf16.msra.mxu1 %v4638_v19 }
 0xd28   : > { %3579 = vmatprep.subr.bf16.mxu0 %v4645_v29  ;;  %3620 = vmatprep.subr.bf16.mxu1 %v4647_v12 }
 0xd2b   : > { %3580 = vmatpush1.bf16.msra.mxu0 %v4644_v38  ;;  %3621 = vmatpush1.bf16.msra.mxu1 %v4646_v52 }
 0xd2c   : > { %3581 = vmatprep.subr.bf16.mxu0 %v4653_v43  ;;  %3622 = vmatprep.subr.bf16.mxu1 %v4655_v46 }
 0xd2f   : > { %3582 = vmatpush1.bf16.msra.mxu0 %v4652_v62  ;;  %3623 = vmatpush1.bf16.msra.mxu1 %v4654_v20 }
 0xd30   : > { %3583 = vmatprep.subr.bf16.mxu0 %v4661_v63  ;;  %3624 = vmatprep.subr.bf16.mxu1 %v4663_v16 }
 0xd33   : > { %3584 = vmatpush1.bf16.msra.mxu0 %v4660_v9  ;;  %3625 = vmatpush1.bf16.msra.mxu1 %v4662_v8 }
 0xd34   : > { %3585 = vmatprep.subr.bf16.mxu0 %v4669_v4  ;;  %3626 = vmatprep.subr.bf16.mxu1 %v4671_v0 }
 0xd37   : > { %3586 = vmatpush1.bf16.msra.mxu0 %v4668_v13  ;;  %3627 = vmatpush1.bf16.msra.mxu1 %v4670_v25 }
 0xd38   : > { %3587 = vmatprep.subr.bf16.mxu0 %v4677_v33  ;;  %3628 = vmatprep.subr.bf16.mxu1 %v4679_v17 }
 0xd3b   : > { %3588 = vmatpush1.bf16.msra.mxu0 %v4676_v23  ;;  %3629 = vmatpush1.bf16.msra.mxu1 %v4678_v31 }
 0xd3c   : > { %3589 = vmatprep.subr.bf16.mxu0 %v4685_v34  ;;  %3630 = vmatprep.subr.bf16.mxu1 %v4687_v39 }
 0xd3f   : > { %3590 = vmatpush1.bf16.msra.mxu0 %v4684_v40  ;;  %3631 = vmatpush1.bf16.msra.mxu1 %v4686_v24 }
 0xd42   : > { %3592 = vmatmul.mubr.bf16.vlgmr.msra.gmra.mrb[32].mxu0 %v6375_v28  ;;  %3633 = vmatmul.mubr.bf16.vlgmr.msra.gmra.mrb[28].mxu1 %v6375_v28 }
 0xd55   : > { %v6551_v45 = vpop.f32.mrb[20].mxu0  ;;  %v6553_v27 = vpop.f32.mrb[16].mxu1 }
 0xd56   : > { %7163 = vst [vmem:[#allocation4_spill] sm:$0xff] %v6551_v45  ;;  %v6555_v30 = vpop.f32.mrb[17].mxu1  ;;  %3641 = vrot.lane.b32.xlu0 %v6551_v45, %s4736_s22  ;;  %v6559_v41 = vpop.f32.mrb[21].mxu0  ;;  %v3702_v28 = vrot.slane %v6551_v45, 1  ;;  %v3704_v21 = vrot.slane %v6553_v27, 1  ;;  %v3783_v49 = vrot.slane %v6551_v45, 2 }
 0xd57   : > { %v2606_v7 = vpop.f32.mrb[18].mxu1  ;;  %3643 = vrot.lane.b32.xlu1 %v6559_v41, %s4736_s22  ;;  %v2563_v59 = vpop.f32.mrb[22].mxu0  ;;  %v3703_v6 = vrot.slane %v6559_v41, 1  ;;  %v3705_v26 = vrot.slane %v6555_v30, 1  ;;  %v3784_v50 = vrot.slane %v6559_v41, 2  ;;  %v3785_v51 = vrot.slane %v6553_v27, 2 }
 0xd58   : > { %v2565_v55 = vpop.f32.mrb[23].mxu0  ;;  %v2608_v42 = vpop.f32.mrb[19].mxu1  ;;  %v3786_v53 = vrot.slane %v6555_v30, 2  ;;  %v3876_v19 = vrot.slane %v6551_v45, 3  ;;  %v3877_v29 = vrot.slane %v6559_v41, 3  ;;  %v3878_v12 = vrot.slane %v6553_v27, 3 }
 0xd59   : > { %v3879_v47 = vrot.slane %v6555_v30, 3  ;;  %v3972_v35 = vrot.slane %v6551_v45, 5  ;;  %v3973_v36 = vrot.slane %v6559_v41, 5  ;;  %v3974_v37 = vrot.slane %v6553_v27, 5 }
 0xd5a   : > { %3645 = vrot.lane.b32.xlu0 %v6553_v27, %s4736_s22  ;;  %v3975_v38 = vrot.slane %v6555_v30, 5  ;;  %v4064_v52 = vrot.slane %v6551_v45, 6  ;;  %v4065_v43 = vrot.slane %v6559_v41, 6  ;;  %v4066_v46 = vrot.slane %v6553_v27, 6 }
 0xd5b   : > { %3647 = vrot.lane.b32.xlu1 %v6555_v30, %s4736_s22  ;;  %v4067_v54 = vrot.slane %v6555_v30, 6  ;;  %v4157_v60 = vrot.slane %v6551_v45, 7  ;;  %v4158_v61 = vrot.slane %v6559_v41, 7  ;;  %v4159_v11 = vrot.slane %v6553_v27, 7 }
 0xd5c   : > { %v4160_v62 = vrot.slane %v6555_v30, 7 }
 0xd5e   : > { %3718 = vrot.lane.b32.xlu0 %v3702_v28, %s4737_s23 }
 0xd5f   : > { %3720 = vrot.lane.b32.xlu1 %v3703_v6, %s4737_s23 }
 0xd62   : > { %3722 = vrot.lane.b32.xlu0 %v3704_v21, %s4737_s23 }
 0xd63   : > { %3724 = vrot.lane.b32.xlu1 %v3705_v26, %s4737_s23  ;;  %v3667_v26 = vld [vmem:[%s7140_s8 + $0x8] sm:$0x11] }
 0xd66   : > { %3799 = vrot.lane.b32.xlu0 %v3783_v49, %s4738_s13 }
 0xd67   : > { %3801 = vrot.lane.b32.xlu1 %v3784_v50, %s4738_s13 }
 0xd6a   : > { %3803 = vrot.lane.b32.xlu0 %v3785_v51, %s4738_s13 }
 0xd6b   : > { %3805 = vrot.lane.b32.xlu1 %v3786_v53, %s4738_s13  ;;  %v6707_v53 = vld [vmem:[%s7140_s8] sm:$0x22] }
 0xd6e   : > { %3892 = vrot.lane.b32.xlu0 %v3876_v19, %s4729_s27  ;;  %v6712_v19 = vld [vmem:[%s7140_s8] sm:$0x11] }
 0xd6f   : > { %3894 = vrot.lane.b32.xlu1 %v3877_v29, %s4729_s27  ;;  %v3672_v29 = vunpack.c.l.bf16 %v3667_v26 }
 0xd72   : > { %3896 = vrot.lane.b32.xlu0 %v3878_v12, %s4729_s27 }
 0xd73   : > { %3898 = vrot.lane.b32.xlu1 %v3879_v47, %s4729_s27 }
 0xd76   : > { %3988 = vrot.lane.b32.xlu0 %v3972_v35, %s4730_s28  ;;  %v3829_v35 = vunpack.c.h.bf16 %v6707_v53 }
 0xd77   : > { %3990 = vrot.lane.b32.xlu1 %v3973_v36, %s4730_s28  ;;  %v3671_v36 = vunpack.c.h.bf16 %v6712_v19 }
 0xd7a   : > { %3992 = vrot.lane.b32.xlu0 %v3974_v37, %s4730_s28  ;;  %v3673_v37 = vunpack.c.h.bf16 %v3667_v26 }
 0xd7b   : > { %3994 = vrot.lane.b32.xlu1 %v3975_v38, %s4730_s28  ;;  %v3753_v38 = vrot.slane %v3672_v29, 1 }
 0xd7e   : > { %4080 = vrot.lane.b32.xlu0 %v4064_v52, %s4739_s14  ;;  %v3825_v52 = vld [vmem:[%s7140_s8 + $0x8] sm:$0x22] }
 0xd7f   : > { %4082 = vrot.lane.b32.xlu1 %v4065_v43, %s4739_s14 }
 0xd82   : > { %4084 = vrot.lane.b32.xlu0 %v4066_v46, %s4739_s14 }
 0xd83   : > { %4086 = vrot.lane.b32.xlu1 %v4067_v54, %s4739_s14  ;;  %v3752_v54 = vrot.slane %v3671_v36, 1 }
 0xd86   : > { %4173 = vrot.lane.b32.xlu0 %v4157_v60, %s4740_s15 }
 0xd87   : > { %4175 = vrot.lane.b32.xlu1 %v4158_v61, %s4740_s15  ;;  %v3754_v61 = vrot.slane %v3673_v37, 1 }
 0xd8a   : > { %4177 = vrot.lane.b32.xlu0 %v4159_v11, %s4740_s15 }
 0xd8b   : > { %4179 = vrot.lane.b32.xlu1 %v4160_v62, %s4740_s15 }
 0xd8e   : > { %4230 = vrot.lane.b32.xlu0 %v2563_v59, %s4741_s16 }
 0xd8f   : > { %4232 = vrot.lane.b32.xlu1 %v2565_v55, %s4741_s16 }
 0xd92   : > { %4234 = vrot.lane.b32.xlu0 %v2606_v7, %s4741_s16  ;;  %v2831_v7 = vpop.permute.xlu1 %2830 }
 0xd93   : > { %4236 = vrot.lane.b32.xlu1 %v2608_v42, %s4741_s16  ;;  %v6728_v43 = vrot.slane %v2831_v7, %v4820_v3 }
 0xd95   : > { %v6619_v20 = vpop.f32.mrb[24].mxu0  ;;  %v6621_v63 = vpop.f32.mrb[20].mxu1 }
 0xd96   : > { %7164 = vst [vmem:[#allocation5_spill] sm:$0xff] %v6621_v63  ;;  %v6623_v16 = vpop.f32.mrb[25].mxu0  ;;  %v6625_v56 = vpop.f32.mrb[21].mxu1  ;;  %3649 = vrot.lane.b32.xlu0 %v6619_v20, %s4736_s22  ;;  %v3706_v8 = vrot.slane %v6619_v20, 1  ;;  %v3708_v0 = vrot.slane %v6621_v63, 1  ;;  %v3787_v32 = vrot.slane %v6619_v20, 2 }
 0xd97   : > { %v6629_v57 = vpop.f32.mrb[22].mxu1  ;;  %v6631_v58 = vpop.f32.mrb[26].mxu0  ;;  %3651 = vrot.lane.b32.xlu1 %v6623_v16, %s4736_s22  ;;  %v3707_v4 = vrot.slane %v6623_v16, 1  ;;  %v3709_v15 = vrot.slane %v6625_v56, 1  ;;  %v3788_v5 = vrot.slane %v6623_v16, 2  ;;  %v3789_v10 = vrot.slane %v6621_v63, 2 }
 0xd98   : > { %v6635_v1 = vpop.f32.mrb[23].mxu1  ;;  %v2651_v9 = vpop.f32.mrb[27].mxu0  ;;  %v3790_v13 = vrot.slane %v6625_v56, 2  ;;  %v3880_v25 = vrot.slane %v6619_v20, 3  ;;  %v3881_v33 = vrot.slane %v6623_v16, 3  ;;  %v3882_v17 = vrot.slane %v6621_v63, 3 }
 0xd99   : > { %v3883_v18 = vrot.slane %v6625_v56, 3  ;;  %v3976_v48 = vrot.slane %v6619_v20, 5  ;;  %v3977_v44 = vrot.slane %v6623_v16, 5  ;;  %v3978_v22 = vrot.slane %v6621_v63, 5 }
 0xd9a   : > { %3653 = vrot.lane.b32.xlu0 %v6621_v63, %s4736_s22  ;;  %v3979_v23 = vrot.slane %v6625_v56, 5  ;;  %v4068_v31 = vrot.slane %v6619_v20, 6  ;;  %v4069_v34 = vrot.slane %v6623_v16, 6  ;;  %v4070_v39 = vrot.slane %v6621_v63, 6 }
 0xd9b   : > { %3655 = vrot.lane.b32.xlu1 %v6625_v56, %s4736_s22  ;;  %v4071_v40 = vrot.slane %v6625_v56, 6  ;;  %v4161_v24 = vrot.slane %v6619_v20, 7  ;;  %v4162_v59 = vrot.slane %v6623_v16, 7  ;;  %v4163_v42 = vrot.slane %v6621_v63, 7 }
 0xd9c   : > { %v4164_v6 = vrot.slane %v6625_v56, 7 }
 0xd9e   : > { %3726 = vrot.lane.b32.xlu0 %v3706_v8, %s4737_s23 }
 0xd9f   : > { %3728 = vrot.lane.b32.xlu1 %v3707_v4, %s4737_s23 }
 0xda2   : > { %3730 = vrot.lane.b32.xlu0 %v3708_v0, %s4737_s23 }
 0xda3   : > { %3732 = vrot.lane.b32.xlu1 %v3709_v15, %s4737_s23 }
 0xda6   : > { %3807 = vrot.lane.b32.xlu0 %v3787_v32, %s4738_s13 }
 0xda7   : > { %3809 = vrot.lane.b32.xlu1 %v3788_v5, %s4738_s13 }
 0xdaa   : > { %3811 = vrot.lane.b32.xlu0 %v3789_v10, %s4738_s13 }
 0xdab   : > { %3813 = vrot.lane.b32.xlu1 %v3790_v13, %s4738_s13 }
 0xdae   : > { %3900 = vrot.lane.b32.xlu0 %v3880_v25, %s4729_s27  ;;  %v3831_v25 = vunpack.c.h.bf16 %v3825_v52 }
 0xdaf   : > { %3902 = vrot.lane.b32.xlu1 %v3881_v33, %s4729_s27 }
 0xdb2   : > { %3904 = vrot.lane.b32.xlu0 %v3882_v17, %s4729_s27 }
 0xdb3   : > { %3906 = vrot.lane.b32.xlu1 %v3883_v18, %s4729_s27 }
 0xdb6   : > { %3996 = vrot.lane.b32.xlu0 %v3976_v48, %s4730_s28 }
 0xdb7   : > { %3998 = vrot.lane.b32.xlu1 %v3977_v44, %s4730_s28 }
 0xdba   : > { %4000 = vrot.lane.b32.xlu0 %v3978_v22, %s4730_s28 }
 0xdbb   : > { %4002 = vrot.lane.b32.xlu1 %v3979_v23, %s4730_s28 }
 0xdbe   : > { %4088 = vrot.lane.b32.xlu0 %v4068_v31, %s4739_s14 }
 0xdbf   : > { %4090 = vrot.lane.b32.xlu1 %v4069_v34, %s4739_s14 }
 0xdc2   : > { %4092 = vrot.lane.b32.xlu0 %v4070_v39, %s4739_s14 }
 0xdc3   : > { %4094 = vrot.lane.b32.xlu1 %v4071_v40, %s4739_s14 }
 0xdc6   : > { %4181 = vrot.lane.b32.xlu0 %v4161_v24, %s4740_s15 }
 0xdc7   : > { %4183 = vrot.lane.b32.xlu1 %v4162_v59, %s4740_s15 }
 0xdc8   : > { %v6685_v55 = vpop.permute.xlu0 %3641 }
 0xdc9   : > { %v3644_v28 = vpop.permute.xlu1 %3643 }
 0xdca   : > { %4185 = vrot.lane.b32.xlu0 %v4163_v42, %s4740_s15  ;;  %v3664_v46 = vsel %vm3657_vm1, %v6685_v55, %v3644_v28 }
 0xdcb   : > { %4187 = vrot.lane.b32.xlu1 %v4164_v6, %s4740_s15  ;;  %v3679_v32 = vmul.f32 %v3671_v36, %v3664_v46 }
 0xdcc   : > { %v3646_v21 = vpop.permute.xlu0 %3645 }
 0xdcd   : > { %v3663_v49 = vsel %vm3657_vm1, %v3644_v28, %v3646_v21  ;;  %v6697_v50 = vpop.permute.xlu1 %3647 }
 0xdce   : > { %v3662_v51 = vsel %vm3657_vm1, %v3646_v21, %v6697_v50  ;;  %4238 = vrot.lane.b32.xlu0 %v6631_v58, %s4741_s16  ;;  %v3845_v58 = vrot.slane %v3829_v35, 2 }
 0xdcf   : > { %4240 = vrot.lane.b32.xlu1 %v2651_v9, %s4741_s16  ;;  %v3680_v9 = vmul.f32 %v3672_v29, %v3663_v49  ;;  %v3681_v17 = vmul.f32 %v3673_v37, %v3662_v51  ;;  %v3847_v51 = vrot.slane %v3831_v25, 2 }
 0xdd0   : > { %v6715_v12 = vpop.permute.xlu0 %3718 }
 0xdd1   : > { %v3721_v47 = vpop.permute.xlu1 %3720 }
 0xdd2   : > { %4242 = vrot.lane.b32.xlu0 %v6629_v57, %s4741_s16  ;;  %v3741_v3 = vsel %vm3734_vm2, %v6715_v12, %v3721_v47 }
 0xdd3   : > { %4244 = vrot.lane.b32.xlu1 %v6635_v1, %s4741_s16  ;;  %v3830_v1 = vunpack.c.l.bf16 %v3825_v52  ;;  %v3768_v31 = vmul.f32 %v3752_v54, %v3741_v3 }
 0xdd4   : > { %v3723_v60 = vpop.permute.xlu0 %3722 }
 0xdd5   : > { %v3740_v11 = vsel %vm3734_vm2, %v3721_v47, %v3723_v60  ;;  %v6735_v62 = vpop.f32.mrb[28].mxu0  ;;  %v3552_v57 = vpop.f32.mrb[24].mxu1  ;;  %v3846_v42 = vrot.slane %v3830_v1, 2 }
 0xdd6   : > { %v3769_v8 = vmul.f32 %v3753_v38, %v3740_v11  ;;  %v3553_v4 = vadd.f32 %v3552_v57, %v6728_v43  ;;  %v6742_v0 = vpop.permute.xlu1 %3724  ;;  %v3513_v15 = vpop.f32.mrb[29].mxu0  ;;  %v3918_v57 = vrot.slane %v3830_v1, 3 }
 0xdd7   : > { %v3739_v5 = vsel %vm3734_vm2, %v3723_v60, %v6742_v0  ;;  %v3514_v10 = vadd.f32 %v3513_v15, %v6728_v43  ;;  %v3554_v13 = vpop.f32.mrb[25].mxu1  ;;  %v3515_v33 = vpop.f32.mrb[30].mxu0  ;;  %v3917_v60 = vrot.slane %v3829_v35, 3  ;;  %v6771_v15 = vld [vmem:[%s7140_s8] sm:$0x44] }
 0xdd8   : > { %v3688_v18 = vadd.f32 %v3680_v9, %v3553_v4  ;;  %v3770_v48 = vmul.f32 %v3754_v61, %v3739_v5  ;;  %v3555_v44 = vadd.f32 %v3554_v13, %v6728_v43  ;;  %v6749_v22 = vpop.permute.xlu0 %3799  ;;  %v3556_v23 = vpop.f32.mrb[26].mxu1  ;;  %v6776_v35 = vld [vmem:[%s7140_s8 + $0x8] sm:$0x44]  ;;  %v3949_v13 = vrot.slane %v6559_v41, 4 }
 0xdd9   : > { %v3687_v34 = vadd.f32 %v3679_v32, %v3514_v10  ;;  %v3516_v39 = vpop.f32.mrb[31].mxu0  ;;  %v3557_v40 = vpop.f32.mrb[27].mxu1  ;;  %v4017_v10 = vunpack.c.h.bf16 %v6771_v15  ;;  %v3950_v33 = vrot.slane %v6553_v27, 4  ;;  %v4018_v23 = vunpack.c.l.bf16 %v6776_v35 }
 0xdda   : > { %v3777_v24 = vadd.f32 %v3769_v8, %v3688_v18  ;;  %v3689_v7 = vadd.f32 %v3681_v17, %v3555_v44  ;;  %v3802_v59 = vpop.permute.xlu1 %3801  ;;  %v3919_v8 = vrot.slane %v3831_v25, 3  ;;  %v3951_v41 = vrot.slane %v6555_v30, 4 }
 0xddb   : > { %v3776_v28 = vadd.f32 %v3768_v31, %v3687_v34  ;;  %v3822_v6 = vsel %vm3815_vm5, %v6749_v22, %v3802_v59  ;;  %v4033_v39 = vrot.slane %v4017_v10, 5 }
 0xddc   : > { %v3778_v21 = vadd.f32 %v3770_v48, %v3689_v7  ;;  %v3861_v26 = vmul.f32 %v3845_v58, %v3822_v6  ;;  %v3804_v49 = vpop.permute.xlu0 %3803  ;;  %v4034_v7 = vrot.slane %v4018_v23, 5 }
 0xddd   : > { %v3821_v29 = vsel %vm3815_vm5, %v3802_v59, %v3804_v49 }
 0xdde   : > { %v3869_v47 = vadd.f32 %v3861_v26, %v3776_v28  ;;  %v3862_v36 = vmul.f32 %v3846_v42, %v3821_v29  ;;  %v6756_v37 = vpop.permute.xlu1 %3805  ;;  %v6800_v42 = vld [vmem:[%s7140_s8] sm:$0x88]  ;;  %v6805_v28 = vld [vmem:[%s7140_s8 + $0x8] sm:$0x88] }
 0xddf   : > { %v3820_v38 = vsel %vm3815_vm5, %v3804_v49, %v6756_v37  ;;  %7166 = vst [vmem:[#allocation7_spill] sm:$0xff] %v6800_v42 }
 0xde0   : > { %v3870_v52 = vadd.f32 %v3862_v36, %v3777_v24  ;;  %v3863_v46 = vmul.f32 %v3847_v51, %v3820_v38  ;;  %v6761_v54 = vpop.permute.xlu0 %3892 }
 0xde2   : > { %v3871_v61 = vadd.f32 %v3863_v46, %v3778_v21  ;;  %v3895_v11 = vpop.permute.xlu1 %3894  ;;  %v4110_v21 = vunpack.c.h.bf16 %v6800_v42 }
 0xde3   : > { %v3914_v58 = vsel %vm448_vm4, %v6761_v54, %v3895_v11 }
 0xde4   : > { %v3933_v9 = vmul.f32 %v3917_v60, %v3914_v58  ;;  %v3897_v3 = vpop.permute.xlu0 %3896 }
 0xde5   : > { %v3913_v4 = vsel %vm448_vm4, %v3895_v11, %v3897_v3 }
 0xde6   : > { %v3941_v1 = vadd.f32 %v3933_v9, %v3869_v47  ;;  %v3934_v32 = vmul.f32 %v3918_v57, %v3913_v4  ;;  %v6778_v5 = vpop.permute.xlu1 %3898  ;;  %v4111_v47 = vunpack.c.l.bf16 %v6805_v28 }
 0xde7   : > { %v3912_v25 = vsel %vm448_vm4, %v3897_v3, %v6778_v5 }
 0xde8   : > { %v3942_v17 = vadd.f32 %v3934_v32, %v3870_v52  ;;  %v3935_v18 = vmul.f32 %v3919_v8, %v3912_v25  ;;  %v6786_v48 = vpop.permute.xlu0 %3988  ;;  %v3965_v44 = vadd.f32 %v3949_v13, %v3941_v1  ;;  %v4126_v52 = vrot.slane %v4110_v21, 6 }
 0xde9   : > { %v4127_v60 = vrot.slane %v4111_v47, 6  ;;  %v4199_v32 = vrot.slane %v4110_v21, 7  ;;  %v4200_v13 = vrot.slane %v4111_v47, 7 }
 0xdea   : > { %v3943_v31 = vadd.f32 %v3935_v18, %v3871_v61  ;;  %v6789_v34 = vpop.permute.xlu1 %3990  ;;  %v3966_v40 = vadd.f32 %v3950_v33, %v3942_v17 }
 0xdec   : > { %v3993_v24 = vpop.permute.xlu0 %3992  ;;  %v6792_v59 = vadd.f32 %v3951_v41, %v3943_v31 }
 0xded   : > { %v4009_v27 = vsel %vm461_vm7, %v6789_v34, %v3993_v24 }
 0xdee   : > { %7165 = vst [vmem:[#allocation6_spill] sm:$0xff] %v6792_v59  ;;  %v4049_v6 = vmul.f32 %v4033_v39, %v4009_v27  ;;  %v6807_v30 = vpop.permute.xlu1 %3994  ;;  %v6845_v39 = vld [vmem:[%s7140_s8 + $0x20] sm:$0x11] }
 0xdef   : > { %v4008_v26 = vsel %vm461_vm7, %v3993_v24, %v6807_v30  ;;  %7174 = vst [vmem:[#allocation15_spill] sm:$0xff] %v6845_v39 }
 0xdf0   : > { %v4057_v49 = vadd.f32 %v4049_v6, %v3965_v44  ;;  %v4050_v51 = vmul.f32 %v4034_v7, %v4008_v26  ;;  %v6813_v29 = vpop.permute.xlu0 %4080  ;;  %v4260_v7 = vunpack.c.h.bf16 %v6845_v39 }
 0xdf1   : > { %7167 = vst [vmem:[#allocation8_spill] sm:$0xff] %v6813_v29 }
 0xdf2   : > { %v4058_v36 = vadd.f32 %v4050_v51, %v3966_v40  ;;  %v6816_v38 = vpop.permute.xlu1 %4082  ;;  %v6850_v40 = vld [vmem:[%s7140_s8 + $0x28] sm:$0x11] }
 0xdf3   : > { %7168 = vst [vmem:[#allocation9_spill] sm:$0xff] %v6816_v38  ;;  %7175 = vst [vmem:[#allocation16_spill] sm:$0xff] %v6850_v40  ;;  %v4261_v6 = vunpack.c.l.bf16 %v6850_v40 }
 0xdf4   : > { %v4085_v46 = vpop.permute.xlu0 %4084 }
 0xdf5   : > { %v4102_v61 = vsel %vm4096_vm6, %v6816_v38, %v4085_v46 }
 0xdf6   : > { %v4142_v11 = vmul.f32 %v4126_v52, %v4102_v61  ;;  %v6822_v57 = vpop.permute.xlu1 %4086 }
 0xdf7   : > { %7169 = vst [vmem:[#allocation10_spill] sm:$0xff] %v6822_v57  ;;  %v4101_v58 = vsel %vm4096_vm6, %v4085_v46, %v6822_v57 }
 0xdf8   : > { %v4150_v9 = vadd.f32 %v4142_v11, %v4057_v49  ;;  %v4143_v3 = vmul.f32 %v4127_v60, %v4101_v58  ;;  %v6827_v8 = vpop.permute.xlu0 %4173  ;;  %v4016_v11 = vunpack.c.l.bf16 %v6771_v15  ;;  %v7144_v58 = vunpack.c.l.bf16 %v6800_v42  ;;  %v6889_v15 = vld [vmem:[%s7140_s8 + $0x18] sm:$0x22] }
 0xdf9   : > { %7170 = vst [vmem:[#allocation11_spill] sm:$0xff] %v6827_v8 }
 0xdfa   : > { %v4151_v4 = vadd.f32 %v4143_v3, %v4058_v36  ;;  %v6829_v1 = vpop.permute.xlu1 %4175  ;;  %v6879_v3 = vld [vmem:[%s7140_s8 + $0x18] sm:$0x11] }
 0xdfb   : > { %7171 = vst [vmem:[#allocation12_spill] sm:$0xff] %v6829_v1 }
 0xdfc   : > { %v4178_v10 = vpop.permute.xlu0 %4177 }
 0xdfd   : > { %v4195_v25 = vsel %vm4189_vm8, %v6829_v1, %v4178_v10 }
 0xdfe   : > { %v4215_v33 = vmul.f32 %v4199_v32, %v4195_v25  ;;  %v6835_v17 = vpop.permute.xlu1 %4179  ;;  %v3826_v32 = vld [vmem:[%s7140_s8 + $0x10] sm:$0x22] }
 0xdff   : > { %7172 = vst [vmem:[#allocation13_spill] sm:$0xff] %v6835_v17  ;;  %v4194_v18 = vsel %vm4189_vm8, %v4178_v10, %v6835_v17 }
 0xe00   : > { %v4223_v44 = vadd.f32 %v4215_v33, %v4150_v9  ;;  %v4216_v23 = vmul.f32 %v4200_v13, %v4194_v18  ;;  %v6840_v31 = vpop.permute.xlu0 %4230  ;;  %v3668_v9 = vld [vmem:[%s7140_s8 + $0x10] sm:$0x11]  ;;  %v6892_v33 = vrot.slane %v4016_v11, 5  ;;  %v6896_v18 = vrot.slane %v7144_v58, 6 }
 0xe01   : > { %7173 = vst [vmem:[#allocation14_spill] sm:$0xff] %v6840_v31  ;;  %v3674_v10 = vunpack.c.l.bf16 %v3668_v9 }
 0xe02   : > { %v4224_v41 = vadd.f32 %v4216_v23, %v4151_v4  ;;  %v6852_v24 = vpop.permute.xlu1 %4232  ;;  %7180 = vst [vmem:[#allocation21_spill] sm:$0xff] %v6892_v33  ;;  %7181 = vst [vmem:[#allocation22_spill] sm:$0xff] %v6896_v18  ;;  %v3676_v23 = vunpack.c.l.bf16 %v6879_v3 }
 0xe03   : > { %7176 = vst [vmem:[#allocation17_spill] sm:$0xff] %v6852_v24 }
 0xe04   : > { %v4235_v27 = vpop.permute.xlu0 %4234 }
 0xe05   : > { %v4252_v21 = vsel %vm4246_vm9, %v6852_v24, %v4235_v27 }
 0xe06   : > { %v4268_v26 = vmul.f32 %v4260_v7, %v4252_v21  ;;  %v6860_v49 = vpop.permute.xlu1 %4236  ;;  %v3832_v21 = vunpack.c.l.bf16 %v3826_v32 }
 0xe07   : > { %7177 = vst [vmem:[#allocation18_spill] sm:$0xff] %v6860_v49  ;;  %v4251_v51 = vsel %vm4246_vm9, %v4235_v27, %v6860_v49  ;;  %v3755_v27 = vrot.slane %v3674_v10, 1 }
 0xe08   : > { %v6865_v47 = vadd.f32 %v4268_v26, %v4223_v44  ;;  %v4269_v36 = vmul.f32 %v4261_v6, %v4251_v51  ;;  %v3650_v52 = vpop.permute.xlu0 %3649  ;;  %v3675_v44 = vunpack.c.h.bf16 %v3668_v9  ;;  %v3833_v51 = vunpack.c.h.bf16 %v3826_v32 }
 0xe09   : > { %v3661_v26 = vsel %vm3657_vm1, %v6697_v50, %v3650_v52  ;;  %v3757_v9 = vrot.slane %v3676_v23, 1  ;;  %v7182_v32 = vunpack.c.h.bf16 %v6879_v3  ;;  %v3848_v24 = vrot.slane %v3832_v21, 2 }
 0xe0a   : > { %7178 = vst [vmem:[#allocation19_spill] sm:$0xff] %v6865_v47  ;;  %v6867_v46 = vadd.f32 %v4269_v36, %v4224_v41  ;;  %v3652_v60 = vpop.permute.xlu1 %3651  ;;  %v7151_v41 = vunpack.c.l.bf16 %v6712_v19  ;;  %v3834_v36 = vunpack.c.l.bf16 %v6889_v15  ;;  %v3756_v25 = vrot.slane %v3675_v44, 1 }
 0xe0b   : > { %v3758_v2 = vrot.slane %v7182_v32, 1  ;;  %v3682_v47 = vmul.f32 %v3674_v10, %v3661_v26  ;;  %v3849_v39 = vrot.slane %v3833_v51, 2  ;;  %v7183_v32 = vunpack.c.l.bf16 %v6707_v53 }
 0xe0c   : > { %7179 = vst [vmem:[#allocation20_spill] sm:$0xff] %v6867_v46  ;;  %v6869_v61 = vpop.permute.xlu0 %3653  ;;  %v6908_v46 = vrot.slane %v7151_v41, 1  ;;  %v3850_v8 = vrot.slane %v3834_v36, 2  ;;  %v7184_v26 = vunpack.c.h.bf16 %v6889_v15  ;;  %v3920_v7 = vrot.slane %v3832_v21, 3 }
 0xe0d   : > { %v3844_v1 = vrot.slane %v7183_v32, 2  ;;  %v3921_v42 = vrot.slane %v3833_v51, 3  ;;  %v3922_v29 = vrot.slane %v3834_v36, 3  ;;  %v7185_v21 = vunpack.c.l.bf16 %v6712_v19 }
 0xe0e   : > { %v6881_v4 = vpop.permute.xlu1 %3655  ;;  %v3851_v45 = vrot.slane %v7184_v26, 2 }
 0xe10   : > { %v3727_v13 = vpop.permute.xlu0 %3726 }
 0xe11   : > { %v3738_v49 = vsel %vm3734_vm2, %v6742_v0, %v3727_v13  ;;  %v3660_v0 = vsel %vm3657_vm1, %v3650_v52, %v3652_v60 }
 0xe12   : > { %v3729_v6 = vpop.permute.xlu1 %3728  ;;  %v3771_v59 = vmul.f32 %v3755_v27, %v3738_v49  ;;  %v3683_v32 = vmul.f32 %v3675_v44, %v3660_v0 }
 0xe14   : > { %v3731_v58 = vpop.permute.xlu0 %3730 }
 0xe15   : > { %v3593_v40 = vpop.f32.mrb[32].mxu0  ;;  %v3634_v50 = vpop.f32.mrb[28].mxu1 }
 0xe16   : > { %v3594_v57 = vadd.f32 %v3593_v40, %v6728_v43  ;;  %v3733_v41 = vpop.permute.xlu1 %3732  ;;  %v3595_v31 = vpop.f32.mrb[33].mxu0  ;;  %v3635_v27 = vadd.f32 %v3634_v50, %v6728_v43 }
 0xe17   : > { %v3636_v18 = vpop.f32.mrb[29].mxu1  ;;  %v3597_v11 = vpop.f32.mrb[34].mxu0  ;;  %v3596_v10 = vadd.f32 %v3595_v31, %v6728_v43 }
 0xe18   : > { %v3690_v17 = vadd.f32 %v3682_v47, %v3594_v57  ;;  %v3808_v40 = vpop.permute.xlu0 %3807  ;;  %v3638_v33 = vpop.f32.mrb[30].mxu1  ;;  %v3659_v57 = vsel %vm3657_vm1, %v3652_v60, %v6869_v61 }
 0xe19   : > { %v3819_v52 = vsel %vm3815_vm5, %v6756_v37, %v3808_v40  ;;  %v3598_v38 = vpop.f32.mrb[35].mxu0  ;;  %v3639_v63 = vpop.f32.mrb[31].mxu1  ;;  %v3665_v33 = vsel %vm3657_vm1, %v6881_v4, %v6685_v55  ;;  %v3737_v37 = vsel %vm3734_vm2, %v3727_v13, %v3729_v6  ;;  %v3512_v55 = vadd.f32 %v6735_v62, %v6728_v43 }
 0xe1a   : > { %v3779_v31 = vadd.f32 %v3771_v59, %v3690_v17  ;;  %v3864_v49 = vmul.f32 %v3848_v24, %v3819_v52  ;;  %v3810_v47 = vpop.permute.xlu1 %3809  ;;  %v4019_v63 = vunpack.c.h.bf16 %v6776_v35  ;;  %v3658_v38 = vsel %vm3657_vm1, %v6869_v61, %v6881_v4 }
 0xe1b   : > { %v3736_v59 = vsel %vm3734_vm2, %v3729_v6, %v3731_v58  ;;  %v3691_v17 = vadd.f32 %v3683_v32, %v3596_v10  ;;  %v3684_v44 = vmul.f32 %v3676_v23, %v3659_v57  ;;  %v3637_v13 = vadd.f32 %v3636_v18, %v6728_v43 }
 0xe1c   : > { %v3872_v24 = vadd.f32 %v3864_v49, %v3779_v31  ;;  %v3812_v60 = vpop.permute.xlu0 %3811  ;;  %v3818_v35 = vsel %vm3815_vm5, %v3808_v40, %v3810_v47  ;;  %v3678_v51 = vmul.f32 %v7185_v21, %v3665_v33  ;;  %v3772_v36 = vmul.f32 %v3756_v25, %v3737_v37 }
 0xe1d   : > { %v3735_v61 = vsel %vm3734_vm2, %v3731_v58, %v3733_v41  ;;  %v3742_v4 = vsel %vm3734_vm2, %v3733_v41, %v6715_v12  ;;  %v7186_v62 = vunpack.c.h.bf16 %v6879_v3  ;;  %v3773_v11 = vmul.f32 %v3757_v9, %v3736_v59 }
 0xe1e   : > { %v3814_v6 = vpop.permute.xlu1 %3813  ;;  %v3692_v43 = vadd.f32 %v3684_v44, %v3635_v27  ;;  %v3817_v18 = vsel %vm3815_vm5, %v3810_v47, %v3812_v60  ;;  %v3780_v50 = vadd.f32 %v3772_v36, %v3691_v17  ;;  %v3865_v19 = vmul.f32 %v3849_v39, %v3818_v35 }
 0xe1f   : > { %v3685_v23 = vmul.f32 %v7186_v62, %v3658_v38  ;;  %v3816_v25 = vsel %vm3815_vm5, %v3812_v60, %v3814_v6  ;;  %v3823_v58 = vsel %vm3815_vm5, %v3814_v6, %v6749_v22  ;;  %v3767_v12 = vmul.f32 %v6908_v46, %v3742_v4  ;;  %v7191_v62 = vld [vmem:[#allocation5_spill] sm:$0xff] }
 0xe20   : > { %v3901_v0 = vpop.permute.xlu0 %3900  ;;  %v3774_v41 = vmul.f32 %v3758_v2, %v3735_v61  ;;  %v3866_v10 = vmul.f32 %v3850_v8, %v3817_v18  ;;  %v7187_v39 = vunpack.c.l.bf16 %v6707_v53  ;;  %v7188_v32 = vunpack.c.h.bf16 %v6889_v15  ;;  %v7194_v18 = vld [vmem:[#allocation8_spill] sm:$0xff] }
 0xe21   : > { %v3693_v3 = vadd.f32 %v3685_v23, %v3637_v13  ;;  %v3911_v9 = vsel %vm448_vm4, %v6778_v5, %v3901_v0  ;;  %v3686_v31 = vadd.f32 %v3678_v51, %v3512_v55  ;;  %v3860_v22 = vmul.f32 %v3844_v1, %v3823_v58  ;;  %v7198_v58 = vld [vmem:[#allocation4_spill] sm:$0xff] }
 0xe22   : > { %v3936_v40 = vmul.f32 %v3920_v7, %v3911_v9  ;;  %v3903_v26 = vpop.permute.xlu1 %3902  ;;  %v3916_v52 = vrot.slane %v7187_v39, 3  ;;  %v3923_v57 = vrot.slane %v7188_v32, 3  ;;  %v3867_v49 = vmul.f32 %v3851_v45, %v3816_v25  ;;  %v7197_v25 = vld [vmem:[#allocation21_spill] sm:$0xff]  ;;  %v7203_v39 = vld [vmem:[#allocation15_spill] sm:$0xff]  ;;  %v7204_v32 = vld [vmem:[#allocation22_spill] sm:$0xff] }
 0xe23   : > { %v3910_v2 = vsel %vm448_vm4, %v3901_v0, %v3903_v26  ;;  %v3781_v46 = vadd.f32 %v3773_v11, %v3692_v43  ;;  %v3873_v47 = vadd.f32 %v3865_v19, %v3780_v50  ;;  %v3775_v8 = vadd.f32 %v3767_v12, %v3686_v31  ;;  %v7193_v43 = vld [vmem:[#allocation9_spill] sm:$0xff]  ;;  %v7195_v50 = vld [vmem:[#allocation7_spill] sm:$0xff]  ;;  %v7200_v12 = vld [vmem:[#allocation6_spill] sm:$0xff] }
 0xe24   : > { %v3944_v33 = vadd.f32 %v3936_v40, %v3872_v24  ;;  %v3937_v37 = vmul.f32 %v3921_v42, %v3910_v2  ;;  %v3905_v5 = vpop.permute.xlu0 %3904  ;;  %v3782_v7 = vadd.f32 %v3774_v41, %v3693_v3  ;;  %v4035_v27 = vrot.slane %v4019_v63, 5  ;;  %v7202_v40 = vld [vmem:[#allocation11_spill] sm:$0xff] }
 0xe25   : > { %v3909_v53 = vsel %vm448_vm4, %v3903_v26, %v3905_v5  ;;  %v3874_v38 = vadd.f32 %v3866_v10, %v3781_v46  ;;  %v7189_v45 = vrot.slane %v6619_v20, 4  ;;  %v3868_v60 = vadd.f32 %v3860_v22, %v3775_v8  ;;  %v7201_v10 = vld [vmem:[#allocation12_spill] sm:$0xff]  ;;  %v4014_v22 = vld [vmem:[%s7140_s8 + $0x10] sm:$0x44]  ;;  %v4015_v8 = vld [vmem:[%s7140_s8 + $0x18] sm:$0x44] }
 0xe26   : > { %v3945_v15 = vadd.f32 %v3937_v37, %v3873_v47  ;;  %v3938_v59 = vmul.f32 %v3922_v29, %v3909_v53  ;;  %v3907_v17 = vpop.permute.xlu1 %3906  ;;  %v3875_v55 = vadd.f32 %v3867_v49, %v3782_v7  ;;  %v7190_v29 = vrot.slane %v6623_v16, 4  ;;  %v7205_v46 = vld [vmem:[#allocation17_spill] sm:$0xff]  ;;  %v7206_v47 = vld [vmem:[#allocation14_spill] sm:$0xff] }
 0xe27   : > { %v6982_v1 = vadd.f32 %v7189_v45, %v3944_v33  ;;  %v3908_v42 = vsel %vm448_vm4, %v3905_v5, %v3907_v17  ;;  %v3915_v24 = vsel %vm448_vm4, %v3907_v17, %v6761_v54  ;;  %v4010_v20 = vsel %vm461_vm7, %v6786_v48, %v6789_v34  ;;  %v4107_v53 = vld [vmem:[%s7140_s8 + $0x10] sm:$0x88] }
 0xe28   : > { %v3946_v44 = vadd.f32 %v3938_v59, %v3874_v38  ;;  %v3932_v13 = vmul.f32 %v3916_v52, %v3915_v24  ;;  %v3939_v63 = vmul.f32 %v3923_v57, %v3908_v42  ;;  %v6989_v35 = vpop.permute.xlu0 %3996  ;;  %v6993_v21 = vadd.f32 %v7190_v29, %v3945_v15  ;;  %v7207_v38 = vld [vmem:[#allocation10_spill] sm:$0xff] }
 0xe29   : > { %v4007_v51 = vsel %vm461_vm7, %v6807_v30, %v6989_v35  ;;  %v3955_v54 = vrot.slane %v6625_v56, 4  ;;  %v4112_v36 = vunpack.c.h.bf16 %v6805_v28  ;;  %v7192_v23 = vrot.slane %v7191_v62, 4  ;;  %v4108_v59 = vld [vmem:[%s7140_s8 + $0x18] sm:$0x88] }
 0xe2a   : > { %v3940_v61 = vadd.f32 %v3932_v13, %v3868_v60  ;;  %v3947_v4 = vadd.f32 %v3939_v63, %v3875_v55  ;;  %v4051_v6 = vmul.f32 %v4035_v27, %v4007_v51  ;;  %v3999_v16 = vpop.permute.xlu1 %3998  ;;  %v4103_v34 = vsel %vm4096_vm6, %v7194_v18, %v7193_v43 }
 0xe2b   : > { %v7007_v11 = vadd.f32 %v7192_v23, %v3946_v44  ;;  %v7196_v19 = vunpack.c.l.bf16 %v7195_v50  ;;  %v4048_v56 = vmul.f32 %v7197_v25, %v4010_v20  ;;  %v7199_v28 = vrot.slane %v7198_v58, 4  ;;  %v7208_v50 = vld [vmem:[#allocation19_spill] sm:$0xff] }
 0xe2c   : > { %v4059_v41 = vadd.f32 %v4051_v6, %v7200_v12  ;;  %v4001_v3 = vpop.permute.xlu0 %4000  ;;  %v7019_v9 = vadd.f32 %v3955_v54, %v3947_v4  ;;  %v4196_v26 = vsel %vm4189_vm8, %v7202_v40, %v7201_v10  ;;  %v4259_v52 = vunpack.c.l.bf16 %v7203_v39  ;;  %v7209_v39 = vld [vmem:[#allocation13_spill] sm:$0xff] }
 0xe2d   : > { %v4198_v30 = vrot.slane %v7196_v19, 7  ;;  %v3964_v0 = vadd.f32 %v7199_v28, %v3940_v61  ;;  %v4141_v57 = vmul.f32 %v7204_v32, %v4103_v34  ;;  %v4128_v2 = vrot.slane %v4112_v36, 6 }
 0xe2e   : > { %v4003_v49 = vpop.permute.xlu1 %4002  ;;  %v4253_v33 = vsel %vm4246_vm9, %v7206_v47, %v7205_v46  ;;  %v4020_v27 = vunpack.c.l.bf16 %v4014_v22  ;;  %v4742_v17 = vmov 1966171168   ;;  %v4021_v42 = vunpack.c.h.bf16 %v4014_v22 }
 0xe2f   : > { %v4056_v31 = vadd.f32 %v4048_v56, %v3964_v0  ;;  %v4214_v37 = vmul.f32 %v4198_v30, %v4196_v26  ;;  %v4296_v45 = vunpack.c.l.s4 %v4742_v17  ;;  %v4267_v60 = vmul.f32 %v4259_v52, %v4253_v33 }
 0xe30   : > { %v4089_v7 = vpop.permute.xlu0 %4088  ;;  %v4022_v13 = vunpack.c.l.bf16 %v4015_v8  ;;  %v4023_v63 = vunpack.c.h.bf16 %v4015_v8  ;;  %v4113_v29 = vunpack.c.l.bf16 %v4107_v53  ;;  %v4114_v20 = vunpack.c.h.bf16 %v4107_v53  ;;  %v7211_v8 = vld [vmem:[#allocation16_spill] sm:$0xff] }
 0xe31   : > { %v4149_v5 = vadd.f32 %v4141_v57, %v4056_v31  ;;  %v4100_v15 = vsel %vm4096_vm6, %v7207_v38, %v4089_v7  ;;  %v4115_v4 = vunpack.c.l.bf16 %v4108_v59  ;;  %v4116_v6 = vunpack.c.h.bf16 %v4108_v59  ;;  %v7210_v57 = vld [vmem:[#allocation3_spill] sm:$0xff] }
 0xe32   : > { %v4144_v24 = vmul.f32 %v4128_v2, %v4100_v15  ;;  %v4091_v44 = vpop.permute.xlu1 %4090  ;;  %v4297_v62 = vunpack.c.0.s8 %v4296_v45  ;;  %v4036_v23 = vrot.slane %v4020_v27, 5  ;;  %v4201_v34 = vrot.slane %v4112_v36, 7 }
 0xe33   : > { %v4222_v55 = vadd.f32 %v4214_v37, %v4149_v5  ;;  %v4037_v30 = vrot.slane %v4021_v42, 5  ;;  %v4038_v25 = vrot.slane %v4022_v13, 5  ;;  %v4039_v56 = vrot.slane %v4023_v63, 5  ;;  %v7069_v5 = vld [vmem:[%s7140_s8 + $0x38] sm:$0x11] }
 0xe34   : > { %v4152_v54 = vadd.f32 %v4144_v24, %v4059_v41  ;;  %v4093_v61 = vpop.permute.xlu0 %4092  ;;  %v4129_v58 = vrot.slane %v4113_v29, 6  ;;  %v4130_v28 = vrot.slane %v4114_v20, 6  ;;  %v4131_v0 = vrot.slane %v4115_v4, 6  ;;  %v7053_v41 = vld [vmem:[%s7140_s8 + $0x30] sm:$0x11] }
 0xe35   : > { %v7046_v51 = vadd.f32 %v4267_v60, %v4222_v55  ;;  %v4132_v12 = vrot.slane %v4116_v6, 6  ;;  %v4202_v26 = vrot.slane %v4113_v29, 7  ;;  %v4006_v36 = vsel %vm461_vm7, %v6989_v35, %v3999_v16 }
 0xe36   : > { %v4095_v43 = vpop.permute.xlu1 %4094  ;;  %v4203_v32 = vrot.slane %v4114_v20, 7  ;;  %v7062_v31 = vsub.s32 %v4297_v62, %v7210_v57  ;;  %v4005_v22 = vsel %vm461_vm7, %v3999_v16, %v4001_v3  ;;  %v4204_v33 = vrot.slane %v4115_v4, 7 }
 0xe37   : > { %v4291_v19 = vcombine.low %v7046_v51, %v7208_v50  ;;  %v4205_v37 = vrot.slane %v4116_v6, 7  ;;  %v4004_v35 = vsel %vm461_vm7, %v4001_v3, %v4003_v49  ;;  %v4262_v53 = vunpack.c.h.bf16 %v7211_v8 }
 0xe38   : > { %v4182_v10 = vpop.permute.xlu0 %4181  ;;  %v4263_v27 = vunpack.c.l.bf16 %v7053_v41  ;;  %v4264_v38 = vunpack.c.h.bf16 %v7053_v41  ;;  %v4052_v15 = vmul.f32 %v4036_v23, %v4006_v36  ;;  %v4011_v16 = vsel %vm461_vm7, %v4003_v49, %v6786_v48 }
 0xe39   : > { %v4193_v52 = vsel %vm4189_vm8, %v7209_v39, %v4182_v10  ;;  %v4099_v59 = vsel %vm4096_vm6, %v4089_v7, %v4091_v44  ;;  %v4053_v60 = vmul.f32 %v4037_v30, %v4005_v22  ;;  %v4098_v3 = vsel %vm4096_vm6, %v4091_v44, %v4093_v61 }
 0xe3a   : > { %v4217_v2 = vmul.f32 %v4201_v34, %v4193_v52  ;;  %v4184_v46 = vpop.permute.xlu1 %4183  ;;  %v4097_v55 = vsel %vm4096_vm6, %v4093_v61, %v4095_v43  ;;  %v4265_v42 = vunpack.c.l.bf16 %v7069_v5  ;;  %v4054_v24 = vmul.f32 %v4038_v25, %v4004_v35  ;;  %v7212_v34 = vld [vmem:[#allocation18_spill] sm:$0xff] }
 0xe3b   : > { %v4104_v13 = vsel %vm4096_vm6, %v4095_v43, %v7194_v18  ;;  %v4192_v48 = vsel %vm4189_vm8, %v4182_v10, %v4184_v46  ;;  %v4266_v7 = vunpack.c.h.bf16 %v7069_v5  ;;  %v4055_v63 = vmul.f32 %v4039_v56, %v4011_v16 }
 0xe3c   : > { %v4225_v17 = vadd.f32 %v4217_v2, %v4152_v54  ;;  %v4186_v45 = vpop.permute.xlu0 %4185  ;;  %v4145_v29 = vmul.f32 %v4129_v58, %v4099_v59  ;;  %v4060_v54 = vadd.f32 %v4052_v15, %v6982_v1  ;;  %v4146_v61 = vmul.f32 %v4130_v28, %v4098_v3  ;;  %v7213_v2 = vld [vmem:[#allocation20_spill] sm:$0xff] }
 0xe3d   : > { %v4191_v44 = vsel %vm4189_vm8, %v4184_v46, %v4186_v45  ;;  %v4147_v4 = vmul.f32 %v4131_v0, %v4097_v55  ;;  %v4061_v62 = vadd.f32 %v4053_v60, %v6993_v21  ;;  %v4148_v23 = vmul.f32 %v4132_v12, %v4104_v13 }
 0xe3e   : > { %v4188_v49 = vpop.permute.xlu1 %4187  ;;  %v4218_v43 = vmul.f32 %v4202_v26, %v4192_v48  ;;  %v4062_v25 = vadd.f32 %v4054_v24, %v7007_v11  ;;  %v4219_v56 = vmul.f32 %v4203_v32, %v4191_v44  ;;  %v4063_v0 = vadd.f32 %v4055_v63, %v7019_v9 }
 0xe3f   : > { %v4190_v20 = vsel %vm4189_vm8, %v4186_v45, %v4188_v49  ;;  %v4197_v18 = vsel %vm4189_vm8, %v4188_v49, %v7202_v40  ;;  %v4153_v10 = vadd.f32 %v4145_v29, %v4060_v54  ;;  %v4154_v21 = vadd.f32 %v4146_v61, %v4061_v62 }
 0xe40   : > { %v4239_v6 = vpop.permute.xlu0 %4238  ;;  %v4220_v58 = vmul.f32 %v4204_v33, %v4190_v20  ;;  %v4221_v41 = vmul.f32 %v4205_v37, %v4197_v18  ;;  %v4155_v12 = vadd.f32 %v4147_v4, %v4062_v25  ;;  %v4156_v52 = vadd.f32 %v4148_v23, %v4063_v0 }
 0xe41   : > { %v4250_v30 = vsel %vm4246_vm9, %v7212_v34, %v4239_v6  ;;  %v4226_v57 = vadd.f32 %v4218_v43, %v4153_v10  ;;  %v4301_v11 = vrot.slane %v4291_v19, %v7062_v31  ;;  %v4227_v32 = vadd.f32 %v4219_v56, %v4154_v21 }
 0xe42   : > { %v4270_v1 = vmul.f32 %v4262_v53, %v4250_v30  ;;  %v4241_v28 = vpop.permute.xlu1 %4240  ;;  %v4228_v22 = vadd.f32 %v4220_v58, %v4155_v12  ;;  %v4229_v5 = vadd.f32 %v4221_v41, %v4156_v52 }
 0xe43   : > { %v4249_v40 = vsel %vm4246_vm9, %v4239_v6, %v4241_v28 }
 0xe44   : > { %v4278_v26 = vadd.f32 %v4270_v1, %v4225_v17  ;;  %v4271_v36 = vmul.f32 %v4263_v27, %v4249_v40  ;;  %v4243_v39 = vpop.permute.xlu0 %4242 }
 0xe45   : > { %v4248_v9 = vsel %vm4246_vm9, %v4241_v28, %v4243_v39 }
 0xe46   : > { %v4292_v46 = vcombine.low %v7213_v2, %v4278_v26  ;;  %v4272_v33 = vmul.f32 %v4264_v38, %v4248_v9  ;;  %v4245_v37 = vpop.permute.xlu1 %4244  ;;  %v4279_v35 = vadd.f32 %v4271_v36, %v4226_v57 }
 0xe47   : > { %v4247_v8 = vsel %vm4246_vm9, %v4243_v39, %v4245_v37  ;;  %v4254_v51 = vsel %vm4246_vm9, %v4245_v37, %v7206_v47 }
 0xe48   : > { %v4308_v50 = vrot.slane %v4292_v46, %v7062_v31  ;;  %v4280_v19 = vadd.f32 %v4272_v33, %v4227_v32  ;;  %v4273_v53 = vmul.f32 %v4265_v42, %v4247_v8  ;;  %v4274_v27 = vmul.f32 %v4266_v7, %v4254_v51 }
 0xe4a   : > { %v4323_v15 = vcombine.low %v4301_v11, %v4308_v50  ;;  %v4293_v16 = vcombine.low %v4279_v35, %v4280_v19  ;;  %v4281_v59 = vadd.f32 %v4273_v53, %v4228_v22  ;;  %v4282_v38 = vadd.f32 %v4274_v27, %v4229_v5 }
 0xe4c   : > { %v4315_v17 = vrot.slane %v4293_v16, %v7062_v31  ;;  %v4294_v45 = vcombine.low %v4281_v59, %v4282_v38  ;;  %v4331_v55 = vrot.slane %v4323_v15, %v7062_v31 }
 0xe4e   : > { %v4322_v60 = vrot.slane %v4294_v45, %v7062_v31 }
 0xe50   : > { %v4324_v3 = vcombine.low %v4315_v17, %v4322_v60 }
 0xe52   : > { %v4338_v14 = vrot.slane %v4324_v3, %v7062_v31 }
 0xe54   : > { %v4339_v47 = vcombine.low %v4331_v55, %v4338_v14 }
 0xe56   : > { %4341 = vst [vmem:[%s383_s25] sm:$0xff] %v4339_v47 }
 0xe57 PF: > { %s23_s19 = sadd.s32 1, %s4724_s19  }
 0xe58   : > { %p20_p4 = scmp.ge.s32.totalorder %s23_s19, 4  }
 0xe5a   :  { %22 = sbr.rel (!%p20_p4) target bundleno = 3 (0x3), region = 106 }

</bundles_post_ra>
